<compile_context>
chip_gen: v7x
topology: tpu7x:2x2x1
jax: 0.10.0
libtpu: 0.0.40
codegen_flags: <defaults>
</compile_context>

<pallas_src>
import functools

import jax
import jax.numpy as jnp
from jax.experimental import pallas as pl
from jax.experimental.pallas import tpu as pltpu


def _round_up(x: int, m: int) -> int:
    return ((x + m - 1) // m) * m


def _num_tensorcores() -> int:
    """Best-effort TensorCore-per-chip count. v7x has 2; v5e/v6e have 1."""
    try:
        kind = (getattr(jax.devices()[0], "device_kind", "") or "").lower()
    except Exception:
        return 1
    if "v7" in kind or "7x" in kind:
        return 2
    return 1


def _mlp_kernel(x_ref, w1_ref, b1_ref, w2_ref, b2_ref, o_ref):
    """Fused MLP forward for one batch tile.

    x_ref:  (TB, input_dim)        VMEM (double-buffered over the grid)
    w1_ref: (input_dim, hidden)    VMEM (resident, single-buffered)
    b1_ref: (1, hidden)            VMEM (resident, f32)
    w2_ref: (hidden, out_pad)      VMEM (resident, lane-padded to 128)
    b2_ref: (1, out_pad)           VMEM (resident, f32)
    o_ref:  (TB, out_pad)          VMEM (f32)
    """
    x = x_ref[...]
    # First linear layer + ReLU (MXU matmul, f32 accumulate; bias/ReLU in f32).
    h = jnp.dot(x, w1_ref[...], preferred_element_type=jnp.float32)
    h = jnp.maximum(h + b1_ref[...], 0.0)
    # Second linear layer (lane-dense padded output width -> unmasked vst).
    out = jnp.dot(h.astype(w2_ref.dtype), w2_ref[...],
                  preferred_element_type=jnp.float32)
    o_ref[...] = (out + b2_ref[...]).astype(o_ref.dtype)


def prepare_params(w1, b1, w2, b2):
    """One-time parameter prep (hoisted out of the per-call forward).

    Pads W2/b2 columns to a multiple of 128 lanes (padded columns are zero and
    sliced off after the kernel) and reshapes b1 to 2-D for VMEM residency.
    """
    hidden_dim, output_dim = w2.shape
    out_pad = _round_up(max(output_dim, 128), 128)
    w2_p = jnp.zeros((hidden_dim, out_pad), w2.dtype).at[:, :output_dim].set(w2)
    b2_p = jnp.zeros((1, out_pad), jnp.float32).at[0, :output_dim].set(
        b2.astype(jnp.float32))
    b1_2d = b1.astype(jnp.float32).reshape(1, hidden_dim)
    return w1, b1_2d, w2_p, b2_p, output_dim


@functools.partial(jax.jit,
                   static_argnames=("output_dim", "block_batch", "half_precision"))
def classifier_forward(x, w1, b1_2d, w2_p, b2_p, *, output_dim,
                       block_batch=256, half_precision=False):
    """Classifier forward pass as a single fused Pallas TPU kernel.

    x:     (B, input_dim) float32
    w1:    (input_dim, hidden_dim)       (pre-transposed torch weight)
    b1_2d: (1, hidden_dim) float32
    w2_p:  (hidden_dim, out_pad)         (lane-padded, from prepare_params)
    b2_p:  (1, out_pad) float32
    returns logits of shape (B, output_dim) float32.
    """
    B, input_dim = x.shape
    hidden_dim = w1.shape[1]
    out_pad = w2_p.shape[1]

    if half_precision:
        # Opt-in bf16 fast path (halves x/W bytes; accumulation stays f32).
        x = x.astype(jnp.bfloat16)
        w1 = w1.astype(jnp.bfloat16)
        w2_p = w2_p.astype(jnp.bfloat16)

    # ---- Remainder-minimizing batch tile (sublane-aligned). ----
    n_steps = max(1, -(-B // block_batch))
    bb = _round_up(max(1, -(-B // n_steps)), 8)
    # Only force a >=2-step grid where a second TensorCore can actually use it (v7x).
    if _num_tensorcores() >= 2 and B > 8 and -(-B // bb) < 2:
        bb = max(8, _round_up(-(-B // 2), 8))
    grid = (pl.cdiv(B, bb),)

    # Resident (constant index_map) operands: single-buffer to save VMEM.
    resident = dict(pipeline_mode=pl.Buffered(1))

    out = pl.pallas_call(
        _mlp_kernel,
        out_shape=jax.ShapeDtypeStruct((B, out_pad), jnp.float32),
        grid_spec=pltpu.PrefetchScalarGridSpec(
            num_scalar_prefetch=0,
            grid=grid,
            in_specs=[
                # batch tile of the input (double-buffered over the grid; the ragged
                # last block is handled by Pallas — those rows never reach HBM)
                pl.BlockSpec((bb, input_dim), lambda i: (i, 0)),
                # weights / biases: resident, single-buffered
                pl.BlockSpec((input_dim, hidden_dim), lambda i: (0, 0), **resident),
                pl.BlockSpec((1, hidden_dim), lambda i: (0, 0), **resident),
                pl.BlockSpec((hidden_dim, out_pad), lambda i: (0, 0), **resident),
                pl.BlockSpec((1, out_pad), lambda i: (0, 0), **resident),
            ],
            out_specs=pl.BlockSpec((bb, out_pad), lambda i: (i, 0)),
        ),
        compiler_params=pltpu.CompilerParams(
            dimension_semantics=("parallel",),
            vmem_limit_bytes=32 * 1024 * 1024,
        ),
    )(x, w1, b1_2d, w2_p, b2_p)

    # Padded output columns are exactly zero (W2/b2 zero-padded) -> slice off.
    return out[:, :output_dim]


def init_params(key, input_dim=1024, hidden_dim=512, output_dim=2,
                dtype=jnp.float32):
    """Deterministic parameter init mirroring the PyTorch module's __init__.

    Layer 0: kaiming_normal_ (fan_in, gain sqrt(2)) on the weight,
             default uniform(-1/sqrt(fan_in), 1/sqrt(fan_in)) on the bias.
    Layer 1: default torch.nn.Linear init (uniform) on weight and bias.
    """
    k1, k2, k3, k4 = jax.random.split(key, 4)
    # W1 stored as (input_dim, hidden_dim) == torch weight (hidden, input) transposed.
    w1 = (jax.random.normal(k1, (input_dim, hidden_dim), dtype)
          * jnp.sqrt(2.0 / input_dim).astype(dtype))
    bound1 = 1.0 / jnp.sqrt(input_dim)
    b1 = jax.random.uniform(k2, (hidden_dim,), dtype, -bound1, bound1)

    bound2 = 1.0 / jnp.sqrt(hidden_dim)
    w2 = jax.random.uniform(k3, (hidden_dim, output_dim), dtype, -bound2, bound2)
    b2 = jax.random.uniform(k4, (output_dim,), dtype, -bound2, bound2)
    return w1, b1, w2, b2


if __name__ == "__main__":
    # Module-consistent shapes (Classifier defaults: input_dim=1024, hidden_dim=512,
    # output_dim=2; half_precision=False -> f32).  Batch 300 exercises the
    # remainder-minimizing tile (two ~152-row tiles) and the ragged last block.
    batch = 300
    input_dim, hidden_dim, output_dim = 1024, 512, 2

    key = jax.random.PRNGKey(0)
    kx, kp = jax.random.split(key)
    x = jax.random.normal(kx, (batch, input_dim), jnp.float32)
    w1, b1, w2, b2 = init_params(kp, input_dim, hidden_dim, output_dim)

    # One-time parameter prep (lane-pad W2/b2, reshape b1) — hoisted out of forward.
    w1_r, b1_2d, w2_p, b2_p, out_dim = prepare_params(w1, b1, w2, b2)

    logits = classifier_forward(x, w1_r, b1_2d, w2_p, b2_p,
                                output_dim=out_dim, block_batch=256)
    logits = jax.block_until_ready(logits)

    # Pure-JAX reference for correctness (exact f32 path).
    ref = jnp.maximum(x @ w1 + b1, 0.0) @ w2 + b2
    assert logits.shape == (batch, output_dim)
    assert jnp.allclose(logits, ref, atol=1e-3, rtol=1e-3), "mismatch vs reference"

    # TODO(synk): half_precision=True bf16 path is implemented but opt-in; module
    # default is float32 so it is not exercised here.
    print("KERNEL_OK")
</pallas_src>

<mosaic_0001>
module attributes {stable_mosaic.version = 11 : i64} {
  func.func @_mlp_kernel(%arg0: i32, %arg1: memref<152x1024xf32, #tpu.memory_space<vmem>>, %arg2: memref<1024x512xf32, #tpu.memory_space<vmem>>, %arg3: memref<1x512xf32, #tpu.memory_space<vmem>>, %arg4: memref<512x128xf32, #tpu.memory_space<vmem>>, %arg5: memref<1x128xf32, #tpu.memory_space<vmem>>, %arg6: memref<152x128xf32, #tpu.memory_space<vmem>>) attributes {dimension_semantics = [#tpu.dimension_semantics<parallel>], iteration_bounds = array<i64: 2>, scalar_prefetch = 0 : i64, scratch_operands = 0 : i64, tpu.core_type = #tpu.core_type<tc>, window_params = [{transform_indices = @transform_0, window_bounds = array<i64: 152, 1024>}, {pipeline_mode = #tpu.pipeline_mode<synchronous>, transform_indices = @transform_1, window_bounds = array<i64: 1024, 512>}, {pipeline_mode = #tpu.pipeline_mode<synchronous>, transform_indices = @transform_2, window_bounds = array<i64: 1, 512>}, {pipeline_mode = #tpu.pipeline_mode<synchronous>, transform_indices = @transform_3, window_bounds = array<i64: 512, 128>}, {pipeline_mode = #tpu.pipeline_mode<synchronous>, transform_indices = @transform_4, window_bounds = array<i64: 1, 128>}, {transform_indices = @transform_5, window_bounds = array<i64: 152, 128>}]} {
    %c0 = arith.constant 0 : index
    %c0_0 = arith.constant 0 : index
    %0 = vector.load %arg1[%c0, %c0_0] : memref<152x1024xf32, #tpu.memory_space<vmem>>, vector<152x1024xf32>
    %c0_1 = arith.constant 0 : index
    %c0_2 = arith.constant 0 : index
    %1 = vector.load %arg2[%c0_1, %c0_2] : memref<1024x512xf32, #tpu.memory_space<vmem>>, vector<1024x512xf32>
    %cst = arith.constant dense<0.000000e+00> : vector<152x512xf32>
    %2 = tpu.matmul %0, %1, %cst {dimension_numbers = #tpu.dot_dimension_numbers<[1], [0], [0], [1], [0, 0, 1, 1], [], []>} : vector<152x1024xf32>, vector<1024x512xf32>, vector<152x512xf32> -> vector<152x512xf32>
    %c0_3 = arith.constant 0 : index
    %c0_4 = arith.constant 0 : index
    %3 = vector.load %arg3[%c0_3, %c0_4] : memref<1x512xf32, #tpu.memory_space<vmem>>, vector<1x512xf32>
    %4 = vector.broadcast %3 : vector<1x512xf32> to vector<152x512xf32>
    %5 = arith.addf %2, %4 : vector<152x512xf32>
    %cst_5 = arith.constant 0.000000e+00 : f32
    %6 = vector.broadcast %cst_5 : f32 to vector<152x512xf32>
    %7 = arith.maximumf %5, %6 : vector<152x512xf32>
    %c0_6 = arith.constant 0 : index
    %c0_7 = arith.constant 0 : index
    %8 = vector.load %arg4[%c0_6, %c0_7] : memref<512x128xf32, #tpu.memory_space<vmem>>, vector<512x128xf32>
    %cst_8 = arith.constant dense<0.000000e+00> : vector<152x128xf32>
    %9 = tpu.matmul %7, %8, %cst_8 {dimension_numbers = #tpu.dot_dimension_numbers<[1], [0], [0], [1], [0, 0, 1, 1], [], []>} : vector<152x512xf32>, vector<512x128xf32>, vector<152x128xf32> -> vector<152x128xf32>
    %c0_9 = arith.constant 0 : index
    %c0_10 = arith.constant 0 : index
    %10 = vector.load %arg5[%c0_9, %c0_10] : memref<1x128xf32, #tpu.memory_space<vmem>>, vector<1x128xf32>
    %11 = vector.broadcast %10 : vector<1x128xf32> to vector<152x128xf32>
    %12 = arith.addf %9, %11 : vector<152x128xf32>
    %c0_11 = arith.constant 0 : index
    %c0_12 = arith.constant 0 : index
    %13 = vector.load %arg6[%c0_11, %c0_12] : memref<152x128xf32, #tpu.memory_space<vmem>>, vector<152x128xf32>
    tpu.vector_store %arg6[%c0_11, %c0_12], %12 {strides = array<i32>} : memref<152x128xf32, #tpu.memory_space<vmem>>, vector<152x128xf32>,
    return
  }
  func.func @transform_0(%arg0: i32) -> (i32, i32) {
    %c0_i32 = arith.constant 0 : i32
    %c0_i32_0 = arith.constant 0 : i32
    return %arg0, %c0_i32 : i32, i32
  }
  func.func @transform_1(%arg0: i32) -> (i32, i32) {
    %c0_i32 = arith.constant 0 : i32
    %c0_i32_0 = arith.constant 0 : i32
    %c0_i32_1 = arith.constant 0 : i32
    return %c0_i32, %c0_i32_0 : i32, i32
  }
  func.func @transform_2(%arg0: i32) -> (i32, i32) {
    %c0_i32 = arith.constant 0 : i32
    %c0_i32_0 = arith.constant 0 : i32
    %c0_i32_1 = arith.constant 0 : i32
    return %c0_i32, %c0_i32_0 : i32, i32
  }
  func.func @transform_3(%arg0: i32) -> (i32, i32) {
    %c0_i32 = arith.constant 0 : i32
    %c0_i32_0 = arith.constant 0 : i32
    %c0_i32_1 = arith.constant 0 : i32
    return %c0_i32, %c0_i32_0 : i32, i32
  }
  func.func @transform_4(%arg0: i32) -> (i32, i32) {
    %c0_i32 = arith.constant 0 : i32
    %c0_i32_0 = arith.constant 0 : i32
    %c0_i32_1 = arith.constant 0 : i32
    return %c0_i32, %c0_i32_0 : i32, i32
  }
  func.func @transform_5(%arg0: i32) -> (i32, i32) {
    %c0_i32 = arith.constant 0 : i32
    %c0_i32_0 = arith.constant 0 : i32
    return %arg0, %c0_i32 : i32, i32
  }
}

</mosaic_0001>

<bundles_post_ra>
// kernel: classifier_forward.1
= control target key start
LH: loop header
LB: loop body
LE: loop exit
PB: predicated region body
PF: predicated region fallthrough
CT: control target
= control target key end

     0   :  { %10 = vsyncpa [#allocation3], 0  ;;  %s5433_s0 = inlined_call_operand.hbm [shape: f32[300,1024], index: 0, kind: input, shape index: {}]   ;;  %s5434_s1 = inlined_call_operand.hbm [shape: f32[1024,512], index: 1, kind: input, shape index: {}]   ;;  %s5435_s2 = inlined_call_operand.hbm [shape: f32[1,512], index: 2, kind: input, shape index: {}]   ;;  %s5436_s3 = inlined_call_operand.hbm [shape: f32[512,128], index: 3, kind: input, shape index: {}]   ;;  %s5437_s4 = inlined_call_operand.hbm [shape: f32[1,128], index: 4, kind: input, shape index: {}]   ;;  %s5438_s5 = inlined_call_operand.vmem [shape: f32[300,128], index: 5, kind: output, shape index: {}]  }
   0x1   :  { %12 = vsyncpa [#allocation3 + $0x1], 0 }
   0x2   :  { %13 = vsyncpa [#allocation5], 0 }
   0x3   :  { %14 = vsyncpa [#allocation8], 0  ;;  %s4398_s18 = smov 0   ;;  %s4400_s19 = smov 0  }
   0x4   :  { %s4402_s20 = smov 0   ;;  %s4404_s21 = smov 0  }
   0x5 LB: > { %s3011_s22 = sadd.s32 4294967295, %s4354_s21   ;;  %p40_p0 = scmp.ne.s32.totalorder %s4346_s19, %s4342_s18  ;;  %s4354_s21 = sphi %s4404_s21, %s5504_s21   ;;  %s4350_s20 = sphi %s4402_s20, %s5503_s20   ;;  %s4346_s19 = sphi %s4400_s19, %s5502_s19   ;;  %s4342_s18 = sphi %s4398_s18, %s5501_s18  }
   0x6   : > { %p4420_p1 = scmp.eq.s32.totalorder %s3011_s22, 0  ;;  %p3013_p2 = scmp.ge.s32.totalorder %s4354_s21, 1 }
   0x7   : > { %p161_p3 = scmp.lt.s32.totalorder %s4354_s21, 3  ;;  %s4356_s26 = smov [#allocation4]  }
   0x8   : > { %s5445_s23 = scalar_select %p4420_p1, 1, 0 }
   0x9   : > { %p4428_p4 = por %p4420_p1, %p40_p0  ;;  %p4432_p5 = pnand %p3013_p2, %p161_p3 }
   0xa   : > { %s173_s27 = sshll.u32 %s4356_s26, 4  ;;  %s4357_s29 = smov [#allocation7]   ;;  %s174_s27 = int_to_ptr.vmem [resolvable:$true] %s173_s27 }
   0xb   : > { %s5446_s24 = scalar_select %p4428_p4, 1, 0 }
   0xc   : > { %s5447_s25 = scalar_select %p4432_p5, 1, 0 }
   0xd   : > { %p4022_p6 = pneg %p4432_p5  ;;  %s197_s30 = sshll.u32 %s4357_s29, 4  ;;  %s4444_s30 = int_to_ptr.vmem [resolvable:$true] %s197_s30 }
   0xe   : > { %s4170_s8 = scalar_lea.hbm %s5434_s1, 65536 }
   0xf   : > { %p4440_p7 = pnand %p4022_p6, %p4420_p1  ;;  %p4171_p8 = scmp.ne.s32.totalorder %s5434_s1, %s4170_s8 }
  0x10   : > { %p4177_p12 = scmp.lt.u32.totalorder %s4170_s8, %s5434_s1 }
  0x11   : > { %p4454_p9 = pneg %p4440_p7 }
  0x13   : > { %p4173_p10 = pnand %p4454_p9, %p4171_p8 }
  0x15   : > { %p4174_p11 = pneg %p4173_p10 }
  0x17   : > { %p4179_p13 = pnand %p4177_p12, %p4174_p11 }
  0x19   : > { %4182 = shalt.err (!%p4179_p13)
}
  0x1a   : > { %s4183_s14 = scalar_lea.vmem %s174_s27, 65536  ;;  %p4191_p6 = scmp.lt.s32.totalorder %s174_s27, %s174_s27 }
  0x1b   : > { %p4184_p0 = scmp.ne.s32.totalorder %s174_s27, %s4183_s14  ;;  %p4192_p1 = scmp.lt.s32.totalorder %s4183_s14, %s4183_s14 }
  0x1d   : > { %p4186_p2 = pnand %p4184_p0, %p4454_p9  ;;  %p4193_p4 = por %p4192_p1, %p4191_p6 }
  0x1f   : > { %p4187_p3 = pneg %p4186_p2 }
  0x21   : > { %p4194_p5 = pnand %p4193_p4, %p4187_p3 }
  0x23   : > { %4197 = shalt.err (!%p4194_p5)
}
  0x24   : > { %s4358_s15 = smov 512   ;;  %s4359_s16 = smov 32  }
  0x25   : > { %4025 = dma.hbm_to_vmem [thread:$0]  (!%p4440_p7), %s5434_s1, 65536, %s174_s27, [#allocation5], %s4358_s15, %s4358_s15, %s4359_s16  }
  0x26   : > { %s4198_s6 = scalar_lea.hbm %s5436_s3, 8192 }
  0x27   : > { %p4199_p8 = scmp.ne.s32.totalorder %s5436_s3, %s4198_s6  ;;  %p4205_p5 = scmp.lt.u32.totalorder %s4198_s6, %s5436_s3 }
  0x29   : > { %p4201_p1 = pnand %p4199_p8, %p4454_p9 }
  0x2b   : > { %p4202_p4 = pneg %p4201_p1 }
  0x2d   : > { %p4207_p10 = pnand %p4205_p5, %p4202_p4 }
  0x2f   : > { %4210 = shalt.err (!%p4207_p10)
}
  0x30   : > { %s4211_s27 = scalar_lea.vmem %s4444_s30, 8192  ;;  %p4219_p0 = scmp.lt.s32.totalorder %s4444_s30, %s4444_s30 }
  0x31   : > { %p4212_p11 = scmp.ne.s32.totalorder %s4444_s30, %s4211_s27  ;;  %p4220_p2 = scmp.lt.s32.totalorder %s4211_s27, %s4211_s27 }
  0x33   : > { %p4214_p12 = pnand %p4212_p11, %p4454_p9  ;;  %p4221_p3 = por %p4220_p2, %p4219_p0 }
  0x35   : > { %p4215_p13 = pneg %p4214_p12 }
  0x37   : > { %p4222_p6 = pnand %p4221_p3, %p4215_p13 }
  0x39   : > { %4225 = shalt.err (!%p4222_p6)
}
  0x3a   : > { %s4360_s12 = smov 128   ;;  %s4361_s13 = smov 8  }
  0x3b   : > { %4031 = dma.hbm_to_vmem [thread:$0]  (!%p4440_p7), %s5436_s3, 8192, %s4444_s30, [#allocation8], %s4360_s12, %s4360_s12, %s4361_s13  }
  0x3c   : > { %s4362_s16 = smov [#allocation6]   ;;  %s4363_s18 = smov [#allocation9]  }
  0x3d   : > { %s187_s17 = sshll.u32 %s4362_s16, 4  ;;  %s211_s26 = sshll.u32 %s4363_s18, 4  ;;  %s188_s17 = int_to_ptr.vmem [resolvable:$true] %s187_s17  ;;  %s4493_s26 = int_to_ptr.vmem [resolvable:$true] %s211_s26 }
  0x3e   : > { %s4226_s7 = scalar_lea.hbm %s5435_s2, 64 }
  0x3f   : > { %p4227_p8 = scmp.ne.s32.totalorder %s5435_s2, %s4226_s7  ;;  %p4233_p5 = scmp.lt.u32.totalorder %s4226_s7, %s5435_s2 }
  0x41   : > { %p4229_p1 = pnand %p4227_p8, %p4454_p9 }
  0x43   : > { %p4230_p4 = pneg %p4229_p1 }
  0x45   : > { %p4235_p10 = pnand %p4233_p5, %p4230_p4 }
  0x47   : > { %4238 = shalt.err (!%p4235_p10)
}
  0x48   : > { %s4239_s27 = scalar_lea.vmem %s188_s17, 64  ;;  %p4247_p0 = scmp.lt.s32.totalorder %s188_s17, %s188_s17 }
  0x49   : > { %p4240_p11 = scmp.ne.s32.totalorder %s188_s17, %s4239_s27  ;;  %p4248_p2 = scmp.lt.s32.totalorder %s4239_s27, %s4239_s27 }
  0x4b   : > { %p4242_p12 = pnand %p4240_p11, %p4454_p9  ;;  %p4249_p3 = por %p4248_p2, %p4247_p0 }
  0x4d   : > { %p4243_p13 = pneg %p4242_p12 }
  0x4f   : > { %p4250_p6 = pnand %p4249_p3, %p4243_p13 }
  0x51   : > { %4253 = shalt.err (!%p4250_p6)
}
  0x52   : > { %4028 = dma.hbm_to_vmem [thread:$0]  (!%p4440_p7), %s5435_s2, 64, %s188_s17, [#allocation5]  }
  0x53   : > { %s4254_s16 = scalar_lea.hbm %s5437_s4, 16 }
  0x54   : > { %p4255_p8 = scmp.ne.s32.totalorder %s5437_s4, %s4254_s16  ;;  %p4261_p5 = scmp.lt.u32.totalorder %s4254_s16, %s5437_s4 }
  0x56   : > { %p4257_p1 = pnand %p4255_p8, %p4454_p9 }
  0x58   : > { %p4258_p4 = pneg %p4257_p1 }
  0x5a   : > { %p4263_p10 = pnand %p4261_p5, %p4258_p4 }
  0x5c   : > { %4266 = shalt.err (!%p4263_p10)
}
  0x5d   : > { %s4267_s17 = scalar_lea.vmem %s4493_s26, 16  ;;  %s4274_s8 = scalar_lea.vmem %s4493_s26, 32 }
  0x5e   : > { %p4268_p11 = scmp.ne.s32.totalorder %s4493_s26, %s4267_s17  ;;  %p4275_p0 = scmp.lt.s32.totalorder %s4493_s26, %s4493_s26 }
  0x5f   : > { %p4276_p2 = scmp.lt.s32.totalorder %s4274_s8, %s4267_s17 }
  0x60   : > { %p4270_p12 = pnand %p4268_p11, %p4454_p9 }
  0x61   : > { %p4277_p3 = por %p4276_p2, %p4275_p0 }
  0x62   : > { %p4271_p13 = pneg %p4270_p12 }
  0x64   : > { %p4278_p6 = pnand %p4277_p3, %p4271_p13 }
  0x66   : > { %4281 = shalt.err (!%p4278_p6)
}
  0x67   : > { %4034 = dma.hbm_to_vmem [thread:$0]  (!%p4440_p7), %s5437_s4, 16, %s4493_s26, [#allocation8]  }
  0x68   : > { %s4538_s11 = sadd.s32 1, %s4354_s21   ;;  %s27_s28 = sadd.s32 1, %s4350_s20 }
  0x69   : > { %s24_s30 = ssub.s32 %s4354_s21, %s4538_s11  ;;  %p34_p8 = scmp.ne.s32.totalorder %s4350_s20, %s4346_s19 }
  0x6a   : > { %p25_p9 = scmp.eq.s32.totalorder %s24_s30, 0  ;;  %p35_p1 = scmp.eq.s32.totalorder %s4354_s21, 0 }
  0x6b   : > { %p4043_p5 = scmp.lt.s32.totalorder %s4354_s21, 2  ;;  %s222_s12 = sand.u32 1, %s4350_s20  }
  0x6c   : > { %s4547_s27 = scalar_select %p25_p9, %s4350_s20, %s27_s28  }
  0x6d   : > { %p36_p4 = por %p35_p1, %p34_p8  ;;  %s3032_s13 = smul.u32 19456, %s4354_s21 }
  0x6e   : > { %s4002_s14 = smul.u32 1216, %s222_s12  ;;  %s4563_s7 = scalar_lea.sflag [#allocation3], %s222_s12 }
  0x6f   : > { %s4555_s18 = scalar_lea.hbm %s5433_s0, %s3032_s13  ;;  %p4557_p7 = pnand %p4043_p5, %p36_p4 }
  0x70   : > { %s226_s29 = scalar_lea.vmem [#allocation2], %s4002_s14  ;;  %s4282_s17 = scalar_lea.hbm %s4555_s18, 19456 }
  0x71   : > { %s234_s6 = sshll.u32 %s226_s29, 4  ;;  %p4283_p10 = scmp.ne.s32.totalorder %s4555_s18, %s4282_s17  ;;  %s4561_s6 = int_to_ptr.vmem [resolvable:$true] %s234_s6 }
  0x72   : > { %p4284_p11 = pneg %p4557_p7  ;;  %s4287_s10 = scalar_lea.hbm %s5433_s0, 38912 }
  0x73   : > { %p4288_p0 = scmp.lt.u32.totalorder %s4555_s18, %s5433_s0  ;;  %p4289_p2 = scmp.lt.u32.totalorder %s4287_s10, %s4282_s17 }
  0x74   : > { %p4285_p12 = pnand %p4284_p11, %p4283_p10  ;;  %p4291_p6 = scmp.lt.u32.totalorder %s4282_s17, %s4555_s18 }
  0x75   : > { %p4290_p3 = por %p4289_p2, %p4288_p0 }
  0x76   : > { %p4286_p13 = pneg %p4285_p12 }
  0x77   : > { %p4292_p9 = por %p4291_p6, %p4290_p3 }
  0x79   : > { %p4293_p8 = pnand %p4292_p9, %p4286_p13 }
  0x7b   : > { %4296 = shalt.err (!%p4293_p8)
}
  0x7c   : > { %s4297_s12 = scalar_lea.vmem %s4561_s6, 19456  ;;  %s4364_s13 = smov [#allocation2]  }
  0x7d   : > { %p4298_p1 = scmp.ne.s32.totalorder %s4561_s6, %s4297_s12  ;;  %s4302_s14 = sshll.u32 %s4364_s13, 4  ;;  %s4303_s14 = int_to_ptr.vmem [resolvable:$false] %s4302_s14 }
  0x7e   : > { %s4304_s15 = scalar_lea.vmem %s4303_s14, 38912  ;;  %p4305_p10 = scmp.lt.s32.totalorder %s4561_s6, %s4303_s14 }
  0x7f   : > { %p4300_p4 = pnand %p4298_p1, %p4284_p11  ;;  %p4306_p12 = scmp.lt.s32.totalorder %s4304_s15, %s4297_s12 }
  0x81   : > { %p4301_p5 = pneg %p4300_p4  ;;  %p4307_p0 = por %p4306_p12, %p4305_p10 }
  0x83   : > { %p4308_p2 = pnand %p4307_p0, %p4301_p5 }
  0x85   : > { %4311 = shalt.err (!%p4308_p2)
}
  0x86   : > { %s4365_s16 = smov 1024   ;;  %s4366_s29 = smov 64  }
  0x87   : > { %4038 = dma.hbm_to_vmem [thread:$0]  (!%p4557_p7), %s4555_s18, 19456, %s4561_s6, %s4563_s7, %s4365_s16, %s4365_s16, %s4366_s29  }
  0x88   : > { %p5451_p11 = scmp.ne.s32.totalorder %s5447_s25, 0 }
  0x8a   : > { %246 = sbr.rel (%p5451_p11) target bundleno = 1033 (0x409), region = 40 }
  0x91   : > { %s248_s17 = sand.u32 1, %s4346_s19   ;;  %p5452_p13 = scmp.ne.s32.totalorder %s5446_s24, 0 }
  0x92   : > { %s4003_s8 = smul.u32 1216, %s248_s17  ;;  %s249_s9 = scalar_lea.sflag [#allocation3], %s248_s17 }
  0x94   : > { %s4594_s10 = scalar_lea.vmem [#allocation2], %s4003_s8 }
  0x95   : > { %4329 = dma.done.wait (%p5452_p13), %s249_s9, 19456  }
  0x96   : > { %4331 = vsyncadd (%p5452_p13), %s249_s9, 4294947840  ;;  %p5453_p3 = scmp.ne.s32.totalorder %s5445_s23, 0 }
  0x98   : > { %4333 = dma.done.wait (%p5453_p3), [#allocation5], 65600  }
  0x99   : > { %4335 = vsyncadd (%p5453_p3), [#allocation5], 4294901696 }
  0x9a   : > { %4337 = dma.done.wait (%p5453_p3), [#allocation8], 8208  }
  0x9b   : > { %4339 = vsyncadd (%p5453_p3), [#allocation8], 4294959088  ;;  %v455_v0 = vld [vmem:[#allocation4 + $0x8] sm:$0xff]  ;;  %v454_v5 = vld [vmem:[#allocation4] sm:$0xff]  ;;  %s296_s23 = smul.u32 19, %s3011_s22 }
  0x9c   : > { %v459_v1 = vld [vmem:[#allocation4 + $0x28] sm:$0xff]  ;;  %v458_v6 = vld [vmem:[#allocation4 + $0x20] sm:$0xff] }
  0x9d   : > { %v583_v2 = vld [vmem:[#allocation4 + $0x408] sm:$0xff]  ;;  %v3033_v3 = vpack.c.bf16 %v459_v1, %v455_v0  ;;  %v3035_v8 = vpack.c.bf16 %v458_v6, %v454_v5  ;;  %v582_v9 = vld [vmem:[#allocation4 + $0x400] sm:$0xff]  ;;  %p297_p7 = scmp.lt.s32.totalorder %s296_s23, 37 }
  0x9e   : > { %v587_v4 = vld [vmem:[#allocation4 + $0x428] sm:$0xff]  ;;  %v586_v10 = vld [vmem:[#allocation4 + $0x420] sm:$0xff] }
  0x9f   : > { %v3097_v7 = vpack.c.bf16 %v587_v4, %v583_v2  ;;  %v463_v11 = vld [vmem:[#allocation4 + $0x48] sm:$0xff]  ;;  %3034 = vmatprep.subr.bf16.mxu1 %v3033_v3  ;;  %v3099_v12 = vpack.c.bf16 %v586_v10, %v582_v9  ;;  %v462_v18 = vld [vmem:[#allocation4 + $0x40] sm:$0xff]  ;;  %s5506_s23 = smov (!%p297_p7, %s296_s23), 37 }
  0xa0   : > { %v467_v13 = vld [vmem:[#allocation4 + $0x68] sm:$0xff]  ;;  %3036 = vmatpush1.bf16.msra.mxu1 %v3035_v8  ;;  %v466_v19 = vld [vmem:[#allocation4 + $0x60] sm:$0xff]  ;;  %s3026_s24 = sshll.u32 %s5506_s23, 3 }
  0xa1   : > { %v591_v14 = vld [vmem:[#allocation4 + $0x448] sm:$0xff]  ;;  %3098 = vmatprep.subr.bf16.mxu0 %v3097_v7  ;;  %v3037_v16 = vpack.c.bf16 %v467_v13, %v463_v11  ;;  %v590_v20 = vld [vmem:[#allocation4 + $0x440] sm:$0xff]  ;;  %v3039_v21 = vpack.c.bf16 %v466_v19, %v462_v18  ;;  %s5380_s26 = scalar_lea.vmem %s5438_s5, %s3026_s24 }
  0xa2   : > { %v595_v15 = vld [vmem:[#allocation4 + $0x468] sm:$0xff]  ;;  %3100 = vmatpush1.bf16.msra.mxu0 %v3099_v12  ;;  %v594_v22 = vld [vmem:[#allocation4 + $0x460] sm:$0xff] }
  0xa3   : > { %v3101_v17 = vpack.c.bf16 %v595_v15, %v591_v14  ;;  %v471_v23 = vld [vmem:[#allocation4 + $0x88] sm:$0xff]  ;;  %3038 = vmatprep.subr.bf16.mxu1 %v3037_v16  ;;  %v3103_v25 = vpack.c.bf16 %v594_v22, %v590_v20  ;;  %v470_v29 = vld [vmem:[#allocation4 + $0x80] sm:$0xff] }
  0xa4   : > { %v475_v24 = vld [vmem:[#allocation4 + $0xa8] sm:$0xff]  ;;  %v474_v31 = vld [vmem:[#allocation4 + $0xa0] sm:$0xff]  ;;  %3040 = vmatpush1.bf16.msra.mxu1 %v3039_v21 }
  0xa5   : > { %3102 = vmatprep.subr.bf16.mxu0 %v3101_v17  ;;  %v3041_v26 = vpack.c.bf16 %v475_v24, %v471_v23  ;;  %v599_v27 = vld [vmem:[#allocation4 + $0x488] sm:$0xff]  ;;  %v598_v32 = vld [vmem:[#allocation4 + $0x480] sm:$0xff]  ;;  %v3043_v34 = vpack.c.bf16 %v474_v31, %v470_v29 }
  0xa6   : > { %v603_v28 = vld [vmem:[#allocation4 + $0x4a8] sm:$0xff]  ;;  %v602_v33 = vld [vmem:[#allocation4 + $0x4a0] sm:$0xff]  ;;  %3104 = vmatpush1.bf16.msra.mxu0 %v3103_v25 }
  0xa7   : > { %v3105_v30 = vpack.c.bf16 %v603_v28, %v599_v27  ;;  %v479_v35 = vld [vmem:[#allocation4 + $0xc8] sm:$0xff]  ;;  %3042 = vmatprep.subr.bf16.mxu1 %v3041_v26  ;;  %v3107_v38 = vpack.c.bf16 %v602_v33, %v598_v32  ;;  %v478_v41 = vld [vmem:[#allocation4 + $0xc0] sm:$0xff] }
  0xa8   : > { %v483_v36 = vld [vmem:[#allocation4 + $0xe8] sm:$0xff]  ;;  %v482_v42 = vld [vmem:[#allocation4 + $0xe0] sm:$0xff]  ;;  %3044 = vmatpush1.bf16.msra.mxu1 %v3043_v34 }
  0xa9   : > { %v607_v37 = vld [vmem:[#allocation4 + $0x4c8] sm:$0xff]  ;;  %v3045_v39 = vpack.c.bf16 %v483_v36, %v479_v35  ;;  %3106 = vmatprep.subr.bf16.mxu0 %v3105_v30  ;;  %v606_v44 = vld [vmem:[#allocation4 + $0x4c0] sm:$0xff]  ;;  %v3047_v50 = vpack.c.bf16 %v482_v42, %v478_v41 }
  0xaa   : > { %v611_v40 = vld [vmem:[#allocation4 + $0x4e8] sm:$0xff]  ;;  %v610_v45 = vld [vmem:[#allocation4 + $0x4e0] sm:$0xff]  ;;  %3108 = vmatpush1.bf16.msra.mxu0 %v3107_v38 }
  0xab   : > { %v3109_v43 = vpack.c.bf16 %v611_v40, %v607_v37  ;;  %v487_v46 = vld [vmem:[#allocation4 + $0x108] sm:$0xff]  ;;  %3046 = vmatprep.subr.bf16.mxu1 %v3045_v39  ;;  %v3111_v51 = vpack.c.bf16 %v610_v45, %v606_v44  ;;  %v486_v53 = vld [vmem:[#allocation4 + $0x100] sm:$0xff] }
  0xac   : > { %v491_v47 = vld [vmem:[#allocation4 + $0x128] sm:$0xff]  ;;  %v490_v54 = vld [vmem:[#allocation4 + $0x120] sm:$0xff]  ;;  %3048 = vmatpush1.bf16.msra.mxu1 %v3047_v50 }
  0xad   : > { %v615_v48 = vld [vmem:[#allocation4 + $0x508] sm:$0xff]  ;;  %v3049_v52 = vpack.c.bf16 %v491_v47, %v487_v46  ;;  %v614_v55 = vld [vmem:[#allocation4 + $0x500] sm:$0xff]  ;;  %3110 = vmatprep.subr.bf16.mxu0 %v3109_v43  ;;  %v3051_v62 = vpack.c.bf16 %v490_v54, %v486_v53 }
  0xae   : > { %v619_v49 = vld [vmem:[#allocation4 + $0x528] sm:$0xff]  ;;  %v618_v57 = vld [vmem:[#allocation4 + $0x520] sm:$0xff]  ;;  %3112 = vmatpush1.bf16.msra.mxu0 %v3111_v51 }
  0xaf   : > { %v3113_v56 = vpack.c.bf16 %v619_v49, %v615_v48  ;;  %v495_v58 = vld [vmem:[#allocation4 + $0x148] sm:$0xff]  ;;  %3050 = vmatprep.subr.bf16.mxu1 %v3049_v52  ;;  %v3115_v63 = vpack.c.bf16 %v618_v57, %v614_v55  ;;  %v494_v1 = vld [vmem:[#allocation4 + $0x140] sm:$0xff] }
  0xb0   : > { %v499_v59 = vld [vmem:[#allocation4 + $0x168] sm:$0xff]  ;;  %v498_v2 = vld [vmem:[#allocation4 + $0x160] sm:$0xff]  ;;  %3052 = vmatpush1.bf16.msra.mxu1 %v3051_v62 }
  0xb1   : > { %v623_v60 = vld [vmem:[#allocation4 + $0x548] sm:$0xff]  ;;  %v3053_v0 = vpack.c.bf16 %v499_v59, %v495_v58  ;;  %v622_v3 = vld [vmem:[#allocation4 + $0x540] sm:$0xff]  ;;  %3114 = vmatprep.subr.bf16.mxu0 %v3113_v56  ;;  %v3055_v10 = vpack.c.bf16 %v498_v2, %v494_v1 }
  0xb2   : > { %v627_v61 = vld [vmem:[#allocation4 + $0x568] sm:$0xff]  ;;  %v626_v5 = vld [vmem:[#allocation4 + $0x560] sm:$0xff]  ;;  %3116 = vmatpush1.bf16.msra.mxu0 %v3115_v63 }
  0xb3   : > { %v3117_v4 = vpack.c.bf16 %v627_v61, %v623_v60  ;;  %v503_v6 = vld [vmem:[#allocation4 + $0x188] sm:$0xff]  ;;  %3054 = vmatprep.subr.bf16.mxu1 %v3053_v0  ;;  %v3119_v11 = vpack.c.bf16 %v626_v5, %v622_v3  ;;  %v502_v13 = vld [vmem:[#allocation4 + $0x180] sm:$0xff] }
  0xb4   : > { %v507_v7 = vld [vmem:[#allocation4 + $0x1a8] sm:$0xff]  ;;  %v506_v14 = vld [vmem:[#allocation4 + $0x1a0] sm:$0xff]  ;;  %3056 = vmatpush1.bf16.msra.mxu1 %v3055_v10 }
  0xb5   : > { %v631_v8 = vld [vmem:[#allocation4 + $0x588] sm:$0xff]  ;;  %v3057_v12 = vpack.c.bf16 %v507_v7, %v503_v6  ;;  %v630_v15 = vld [vmem:[#allocation4 + $0x580] sm:$0xff]  ;;  %3118 = vmatprep.subr.bf16.mxu0 %v3117_v4  ;;  %v3059_v22 = vpack.c.bf16 %v506_v14, %v502_v13 }
  0xb6   : > { %v635_v9 = vld [vmem:[#allocation4 + $0x5a8] sm:$0xff]  ;;  %v634_v17 = vld [vmem:[#allocation4 + $0x5a0] sm:$0xff]  ;;  %3120 = vmatpush1.bf16.msra.mxu0 %v3119_v11 }
  0xb7   : > { %v3121_v16 = vpack.c.bf16 %v635_v9, %v631_v8  ;;  %v511_v18 = vld [vmem:[#allocation4 + $0x1c8] sm:$0xff]  ;;  %3058 = vmatprep.subr.bf16.mxu1 %v3057_v12  ;;  %v3123_v23 = vpack.c.bf16 %v634_v17, %v630_v15  ;;  %v510_v25 = vld [vmem:[#allocation4 + $0x1c0] sm:$0xff] }
  0xb8   : > { %v515_v19 = vld [vmem:[#allocation4 + $0x1e8] sm:$0xff]  ;;  %v514_v26 = vld [vmem:[#allocation4 + $0x1e0] sm:$0xff]  ;;  %3060 = vmatpush1.bf16.msra.mxu1 %v3059_v22 }
  0xb9   : > { %v639_v20 = vld [vmem:[#allocation4 + $0x5c8] sm:$0xff]  ;;  %v3061_v24 = vpack.c.bf16 %v515_v19, %v511_v18  ;;  %v638_v27 = vld [vmem:[#allocation4 + $0x5c0] sm:$0xff]  ;;  %3122 = vmatprep.subr.bf16.mxu0 %v3121_v16  ;;  %v3063_v34 = vpack.c.bf16 %v514_v26, %v510_v25  ;;  %v305_v19 = vld [vmem:[%s4594_s10 + $0x18] sm:$0xff] }
  0xba   : > { %v643_v21 = vld [vmem:[#allocation4 + $0x5e8] sm:$0xff]  ;;  %v642_v29 = vld [vmem:[#allocation4 + $0x5e0] sm:$0xff]  ;;  %3124 = vmatpush1.bf16.msra.mxu0 %v3123_v23  ;;  %1231 = vmatprep.mubr.f32.mxu0 %v305_v19  ;;  %v304_v19 = vld [vmem:[%s4594_s10 + $0x10] sm:$0xff] }
  0xbb   : > { %v3125_v28 = vpack.c.bf16 %v643_v21, %v639_v20  ;;  %v519_v30 = vld [vmem:[#allocation4 + $0x208] sm:$0xff]  ;;  %3062 = vmatprep.subr.bf16.mxu1 %v3061_v24  ;;  %v3127_v35 = vpack.c.bf16 %v642_v29, %v638_v27  ;;  %v518_v37 = vld [vmem:[#allocation4 + $0x200] sm:$0xff] }
  0xbc   : > { %v523_v31 = vld [vmem:[#allocation4 + $0x228] sm:$0xff]  ;;  %v522_v38 = vld [vmem:[#allocation4 + $0x220] sm:$0xff]  ;;  %3064 = vmatpush1.bf16.msra.mxu1 %v3063_v34 }
  0xbd   : > { %v647_v32 = vld [vmem:[#allocation4 + $0x608] sm:$0xff]  ;;  %v3065_v36 = vpack.c.bf16 %v523_v31, %v519_v30  ;;  %v646_v39 = vld [vmem:[#allocation4 + $0x600] sm:$0xff]  ;;  %3126 = vmatprep.subr.bf16.mxu0 %v3125_v28  ;;  %v3067_v46 = vpack.c.bf16 %v522_v38, %v518_v37 }
  0xbe   : > { %v651_v33 = vld [vmem:[#allocation4 + $0x628] sm:$0xff]  ;;  %v650_v41 = vld [vmem:[#allocation4 + $0x620] sm:$0xff]  ;;  %3128 = vmatpush1.bf16.msra.mxu0 %v3127_v35 }
  0xbf   : > { %v3129_v40 = vpack.c.bf16 %v651_v33, %v647_v32  ;;  %v527_v42 = vld [vmem:[#allocation4 + $0x248] sm:$0xff]  ;;  %3066 = vmatprep.subr.bf16.mxu1 %v3065_v36  ;;  %v3131_v47 = vpack.c.bf16 %v650_v41, %v646_v39  ;;  %v526_v49 = vld [vmem:[#allocation4 + $0x240] sm:$0xff] }
  0xc0   : > { %v531_v43 = vld [vmem:[#allocation4 + $0x268] sm:$0xff]  ;;  %v530_v50 = vld [vmem:[#allocation4 + $0x260] sm:$0xff]  ;;  %3068 = vmatpush1.bf16.msra.mxu1 %v3067_v46 }
  0xc1   : > { %v655_v44 = vld [vmem:[#allocation4 + $0x648] sm:$0xff]  ;;  %v3069_v48 = vpack.c.bf16 %v531_v43, %v527_v42  ;;  %v654_v51 = vld [vmem:[#allocation4 + $0x640] sm:$0xff]  ;;  %3130 = vmatprep.subr.bf16.mxu0 %v3129_v40  ;;  %v3071_v58 = vpack.c.bf16 %v530_v50, %v526_v49 }
  0xc2   : > { %v659_v45 = vld [vmem:[#allocation4 + $0x668] sm:$0xff]  ;;  %v658_v53 = vld [vmem:[#allocation4 + $0x660] sm:$0xff]  ;;  %3132 = vmatpush1.bf16.msra.mxu0 %v3131_v47 }
  0xc3   : > { %v3133_v52 = vpack.c.bf16 %v659_v45, %v655_v44  ;;  %v535_v54 = vld [vmem:[#allocation4 + $0x288] sm:$0xff]  ;;  %3070 = vmatprep.subr.bf16.mxu1 %v3069_v48  ;;  %v3135_v59 = vpack.c.bf16 %v658_v53, %v654_v51  ;;  %v534_v61 = vld [vmem:[#allocation4 + $0x280] sm:$0xff] }
  0xc4   : > { %v539_v55 = vld [vmem:[#allocation4 + $0x2a8] sm:$0xff]  ;;  %v538_v62 = vld [vmem:[#allocation4 + $0x2a0] sm:$0xff]  ;;  %3072 = vmatpush1.bf16.msra.mxu1 %v3071_v58 }
  0xc5   : > { %v663_v56 = vld [vmem:[#allocation4 + $0x688] sm:$0xff]  ;;  %v3073_v60 = vpack.c.bf16 %v539_v55, %v535_v54  ;;  %v662_v63 = vld [vmem:[#allocation4 + $0x680] sm:$0xff]  ;;  %3134 = vmatprep.subr.bf16.mxu0 %v3133_v52  ;;  %v3075_v6 = vpack.c.bf16 %v538_v62, %v534_v61 }
  0xc6   : > { %v667_v57 = vld [vmem:[#allocation4 + $0x6a8] sm:$0xff]  ;;  %v666_v1 = vld [vmem:[#allocation4 + $0x6a0] sm:$0xff]  ;;  %3136 = vmatpush1.bf16.msra.mxu0 %v3135_v59 }
  0xc7   : > { %v3137_v0 = vpack.c.bf16 %v667_v57, %v663_v56  ;;  %v543_v2 = vld [vmem:[#allocation4 + $0x2c8] sm:$0xff]  ;;  %v542_v7 = vld [vmem:[#allocation4 + $0x2c0] sm:$0xff]  ;;  %3074 = vmatprep.subr.bf16.mxu1 %v3073_v60  ;;  %v3139_v8 = vpack.c.bf16 %v666_v1, %v662_v63  ;;  %v461_v1 = vld [vmem:[#allocation4 + $0x38] sm:$0xff] }
  0xc8   : > { %v547_v3 = vld [vmem:[#allocation4 + $0x2e8] sm:$0xff]  ;;  %v546_v10 = vld [vmem:[#allocation4 + $0x2e0] sm:$0xff]  ;;  %3076 = vmatpush1.bf16.msra.mxu1 %v3075_v6 }
  0xc9   : > { %v671_v4 = vld [vmem:[#allocation4 + $0x6c8] sm:$0xff]  ;;  %v3077_v9 = vpack.c.bf16 %v547_v3, %v543_v2  ;;  %v670_v11 = vld [vmem:[#allocation4 + $0x6c0] sm:$0xff]  ;;  %3138 = vmatprep.subr.bf16.mxu0 %v3137_v0  ;;  %v3079_v20 = vpack.c.bf16 %v546_v10, %v542_v7  ;;  %v457_v0 = vld [vmem:[#allocation4 + $0x18] sm:$0xff] }
  0xca   : > { %v675_v5 = vld [vmem:[#allocation4 + $0x6e8] sm:$0xff]  ;;  %v674_v12 = vld [vmem:[#allocation4 + $0x6e0] sm:$0xff]  ;;  %3140 = vmatpush1.bf16.msra.mxu0 %v3139_v8  ;;  %v3289_v6 = vpack.c.bf16 %v461_v1, %v457_v0  ;;  %v456_v7 = vld [vmem:[#allocation4 + $0x10] sm:$0xff] }
  0xcb   : > { %v3141_v13 = vpack.c.bf16 %v675_v5, %v671_v4  ;;  %v551_v14 = vld [vmem:[#allocation4 + $0x308] sm:$0xff]  ;;  %3078 = vmatprep.subr.bf16.mxu1 %v3077_v9  ;;  %v3143_v21 = vpack.c.bf16 %v674_v12, %v670_v11  ;;  %v550_v23 = vld [vmem:[#allocation4 + $0x300] sm:$0xff]  ;;  %v460_v8 = vld [vmem:[#allocation4 + $0x30] sm:$0xff] }
  0xcc   : > { %v555_v15 = vld [vmem:[#allocation4 + $0x328] sm:$0xff]  ;;  %v554_v24 = vld [vmem:[#allocation4 + $0x320] sm:$0xff]  ;;  %3080 = vmatpush1.bf16.msra.mxu1 %v3079_v20  ;;  %v465_v9 = vld [vmem:[#allocation4 + $0x58] sm:$0xff] }
  0xcd   : > { %v4609_v16 = vld [vmem:[%s4594_s10 + $0x8] sm:$0xff]  ;;  %v3081_v22 = vpack.c.bf16 %v555_v15, %v551_v14  ;;  %v678_v25 = vld [vmem:[#allocation4 + $0x700] sm:$0xff]  ;;  %3142 = vmatprep.subr.bf16.mxu0 %v3141_v13  ;;  %v3083_v32 = vpack.c.bf16 %v554_v24, %v550_v23  ;;  %v469_v11 = vld [vmem:[#allocation4 + $0x78] sm:$0xff]  ;;  %v3291_v15 = vpack.c.bf16 %v460_v8, %v456_v7 }
  0xce   : > { %v679_v17 = vld [vmem:[#allocation4 + $0x708] sm:$0xff]  ;;  %1052 = vmatprep.mubr.f32.mxu1 %v4609_v16  ;;  %v682_v27 = vld [vmem:[#allocation4 + $0x720] sm:$0xff]  ;;  %3144 = vmatpush1.bf16.msra.mxu0 %v3143_v21  ;;  %v464_v20 = vld [vmem:[#allocation4 + $0x50] sm:$0xff]  ;;  %v3293_v24 = vpack.c.bf16 %v469_v11, %v465_v9 }
  0xcf   : > { %v683_v18 = vld [vmem:[#allocation4 + $0x728] sm:$0xff]  ;;  %3082 = vmatprep.subr.bf16.mxu1 %v3081_v22  ;;  %v3147_v33 = vpack.c.bf16 %v682_v27, %v678_v25  ;;  %v558_v35 = vld [vmem:[#allocation4 + $0x340] sm:$0xff]  ;;  %v468_v21 = vld [vmem:[#allocation4 + $0x70] sm:$0xff] }
  0xd0   : > { %v3145_v26 = vpack.c.bf16 %v683_v18, %v679_v17  ;;  %v559_v28 = vld [vmem:[#allocation4 + $0x348] sm:$0xff]  ;;  %v562_v36 = vld [vmem:[#allocation4 + $0x360] sm:$0xff]  ;;  %3084 = vmatpush1.bf16.msra.mxu1 %v3083_v32  ;;  %v313_v23 = vld [vmem:[%s4594_s10 + $0x58] sm:$0xff]  ;;  %v3295_v32 = vpack.c.bf16 %v468_v21, %v464_v20 }
  0xd1   : > { %v563_v29 = vld [vmem:[#allocation4 + $0x368] sm:$0xff]  ;;  %v686_v37 = vld [vmem:[#allocation4 + $0x740] sm:$0xff]  ;;  %v3087_v44 = vpack.c.bf16 %v562_v36, %v558_v35  ;;  %v473_v25 = vld [vmem:[#allocation4 + $0x98] sm:$0xff] }
  0xd2   : > { %v687_v30 = vld [vmem:[#allocation4 + $0x748] sm:$0xff]  ;;  %v3085_v34 = vpack.c.bf16 %v563_v29, %v559_v28  ;;  %3146 = vmatprep.subr.bf16.mxu0 %v3145_v26  ;;  %v690_v39 = vld [vmem:[#allocation4 + $0x760] sm:$0xff]  ;;  %v477_v27 = vld [vmem:[#allocation4 + $0xb8] sm:$0xff] }
  0xd3   : > { %v691_v31 = vld [vmem:[#allocation4 + $0x768] sm:$0xff]  ;;  %3148 = vmatpush1.bf16.msra.mxu0 %v3147_v33  ;;  %v3151_v45 = vpack.c.bf16 %v690_v39, %v686_v37  ;;  %v566_v47 = vld [vmem:[#allocation4 + $0x380] sm:$0xff]  ;;  %v312_v35 = vld [vmem:[%s4594_s10 + $0x50] sm:$0xff] }
  0xd4   : > { %v3149_v38 = vpack.c.bf16 %v691_v31, %v687_v30  ;;  %v567_v40 = vld [vmem:[#allocation4 + $0x388] sm:$0xff]  ;;  %3086 = vmatprep.subr.bf16.mxu1 %v3085_v34  ;;  %v570_v48 = vld [vmem:[#allocation4 + $0x3a0] sm:$0xff]  ;;  %v321_v37 = vld [vmem:[%s4594_s10 + $0x98] sm:$0xff] }
  0xd5   : > { %v571_v41 = vld [vmem:[#allocation4 + $0x3a8] sm:$0xff]  ;;  %v694_v49 = vld [vmem:[#allocation4 + $0x780] sm:$0xff]  ;;  %3088 = vmatpush1.bf16.msra.mxu1 %v3087_v44  ;;  %v3091_v56 = vpack.c.bf16 %v570_v48, %v566_v47  ;;  %v472_v39 = vld [vmem:[#allocation4 + $0x90] sm:$0xff] }
  0xd6   : > { %v695_v42 = vld [vmem:[#allocation4 + $0x788] sm:$0xff]  ;;  %v3089_v46 = vpack.c.bf16 %v571_v41, %v567_v40  ;;  %3150 = vmatprep.subr.bf16.mxu0 %v3149_v38  ;;  %v698_v51 = vld [vmem:[#allocation4 + $0x7a0] sm:$0xff]  ;;  %v3297_v38 = vpack.c.bf16 %v477_v27, %v473_v25  ;;  %v476_v40 = vld [vmem:[#allocation4 + $0xb0] sm:$0xff] }
  0xd7   : > { %v699_v43 = vld [vmem:[#allocation4 + $0x7a8] sm:$0xff]  ;;  %3152 = vmatpush1.bf16.msra.mxu0 %v3151_v45  ;;  %v3155_v57 = vpack.c.bf16 %v698_v51, %v694_v49  ;;  %v574_v59 = vld [vmem:[#allocation4 + $0x3c0] sm:$0xff]  ;;  %v481_v41 = vld [vmem:[#allocation4 + $0xd8] sm:$0xff] }
  0xd8   : > { %v3153_v50 = vpack.c.bf16 %v699_v43, %v695_v42  ;;  %v575_v52 = vld [vmem:[#allocation4 + $0x3c8] sm:$0xff]  ;;  %3090 = vmatprep.subr.bf16.mxu1 %v3089_v46  ;;  %v578_v60 = vld [vmem:[#allocation4 + $0x3e0] sm:$0xff]  ;;  %v485_v43 = vld [vmem:[#allocation4 + $0xf8] sm:$0xff] }
  0xd9   : > { %v579_v53 = vld [vmem:[#allocation4 + $0x3e8] sm:$0xff]  ;;  %v702_v61 = vld [vmem:[#allocation4 + $0x7c0] sm:$0xff]  ;;  %3092 = vmatpush1.bf16.msra.mxu1 %v3091_v56  ;;  %v3095_v4 = vpack.c.bf16 %v578_v60, %v574_v59  ;;  %v484_v56 = vld [vmem:[#allocation4 + $0xf0] sm:$0xff] }
  0xda   : > { %v703_v54 = vld [vmem:[#allocation4 + $0x7c8] sm:$0xff]  ;;  %v3093_v58 = vpack.c.bf16 %v579_v53, %v575_v52  ;;  %3154 = vmatprep.subr.bf16.mxu0 %v3153_v50  ;;  %v706_v63 = vld [vmem:[#allocation4 + $0x7e0] sm:$0xff]  ;;  %v320_v50 = vld [vmem:[%s4594_s10 + $0x90] sm:$0xff]  ;;  %v3299_v53 = vpack.c.bf16 %v476_v40, %v472_v39 }
  0xdb   : > { %v707_v55 = vld [vmem:[#allocation4 + $0x7e8] sm:$0xff]  ;;  %3156 = vmatpush1.bf16.msra.mxu0 %v3155_v57  ;;  %v3159_v5 = vpack.c.bf16 %v706_v63, %v702_v61  ;;  %v710_v12 = vld [vmem:[#allocation4 + $0x800] sm:$0xff]  ;;  %v329_v52 = vld [vmem:[%s4594_s10 + $0xd8] sm:$0xff] }
  0xdc   : > { %v3157_v62 = vpack.c.bf16 %v707_v55, %v703_v54  ;;  %v711_v2 = vld [vmem:[#allocation4 + $0x808] sm:$0xff]  ;;  %3094 = vmatprep.subr.bf16.mxu1 %v3093_v58  ;;  %v714_v13 = vld [vmem:[#allocation4 + $0x820] sm:$0xff]  ;;  %v3301_v54 = vpack.c.bf16 %v485_v43, %v481_v41  ;;  %v480_v55 = vld [vmem:[#allocation4 + $0xd0] sm:$0xff] }
  0xdd   : > { %v715_v3 = vld [vmem:[#allocation4 + $0x828] sm:$0xff]  ;;  %3096 = vmatpush1.bf16.msra.mxu1 %v3095_v4  ;;  %v4614_v14 = vld [vmem:[%s4594_s10] sm:$0xff]  ;;  %v3163_v26 = vpack.c.bf16 %v714_v13, %v710_v12  ;;  %v489_v57 = vld [vmem:[#allocation4 + $0x118] sm:$0xff] }
  0xde   : > { %3158 = vmatprep.subr.bf16.mxu0 %v3157_v62  ;;  %v3161_v10 = vpack.c.bf16 %v715_v3, %v711_v2  ;;  %v719_v17 = vld [vmem:[#allocation4 + $0x848] sm:$0xff]  ;;  %3290 = vmatprep.subr.bf16.mxu1 %v3289_v6  ;;  %v718_v29 = vld [vmem:[#allocation4 + $0x840] sm:$0xff]  ;;  %v493_v59 = vld [vmem:[#allocation4 + $0x138] sm:$0xff] }
  0xdf   : > { %v723_v18 = vld [vmem:[#allocation4 + $0x868] sm:$0xff]  ;;  %3160 = vmatpush1.bf16.msra.mxu0 %v3159_v5  ;;  %v722_v30 = vld [vmem:[#allocation4 + $0x860] sm:$0xff]  ;;  %v328_v2 = vld [vmem:[%s4594_s10 + $0xd0] sm:$0xff]  ;;  %v3303_v5 = vpack.c.bf16 %v484_v56, %v480_v55  ;;  %v3305_v6 = vpack.c.bf16 %v493_v59, %v489_v57 }
  0xe0   : > { %v4618_v22 = vld [vmem:[%s4594_s10 + $0x48] sm:$0xff]  ;;  %3162 = vmatprep.subr.bf16.mxu0 %v3161_v10  ;;  %1053 = vmatmul.mubr.f32.vlgmr.msra.gmra.mrb[0].mxu1 %v4614_v14  ;;  %v3165_v28 = vpack.c.bf16 %v723_v18, %v719_v17  ;;  %v4623_v31 = vld [vmem:[%s4594_s10 + $0x40] sm:$0xff]  ;;  %v3167_v42 = vpack.c.bf16 %v722_v30, %v718_v29  ;;  %v337_v4 = vld [vmem:[%s4594_s10 + $0x118] sm:$0xff] }
  0xe1   : > { %3292 = vmatpush1.bf16.msra.mxu1 %v3291_v15  ;;  %v727_v33 = vld [vmem:[#allocation4 + $0x888] sm:$0xff]  ;;  %1058 = vmatprep.mubr.f32.mxu1 %v4618_v22  ;;  %v726_v45 = vld [vmem:[#allocation4 + $0x880] sm:$0xff]  ;;  %v488_v7 = vld [vmem:[#allocation4 + $0x110] sm:$0xff] }
  0xe2   : > { %1232 = vmatmul.mubr.f32.vlgmr.msra.gmra.mrb[0].mxu0 %v304_v19  ;;  %v731_v34 = vld [vmem:[#allocation4 + $0x8a8] sm:$0xff]  ;;  %3294 = vmatprep.subr.bf16.mxu1 %v3293_v24  ;;  %v730_v46 = vld [vmem:[#allocation4 + $0x8a0] sm:$0xff]  ;;  %v492_v8 = vld [vmem:[#allocation4 + $0x130] sm:$0xff] }
  0xe3   : > { %1237 = vmatprep.mubr.f32.mxu0 %v313_v23  ;;  %v4628_v36 = vld [vmem:[%s4594_s10 + $0x88] sm:$0xff]  ;;  %3164 = vmatpush1.bf16.msra.mxu0 %v3163_v26  ;;  %v3169_v44 = vpack.c.bf16 %v731_v34, %v727_v33  ;;  %v4633_v47 = vld [vmem:[%s4594_s10 + $0x80] sm:$0xff]  ;;  %v3171_v58 = vpack.c.bf16 %v730_v46, %v726_v45  ;;  %v497_v9 = vld [vmem:[#allocation4 + $0x158] sm:$0xff]  ;;  %v3307_v24 = vpack.c.bf16 %v492_v8, %v488_v7 }
  0xe4   : > { %1059 = vmatmul.mubr.f32.gmra.mrb[2].mxu1 %v4623_v31  ;;  %3166 = vmatprep.subr.bf16.mxu0 %v3165_v28  ;;  %v735_v48 = vld [vmem:[#allocation4 + $0x8c8] sm:$0xff]  ;;  %v734_v61 = vld [vmem:[#allocation4 + $0x8c0] sm:$0xff]  ;;  %v501_v11 = vld [vmem:[#allocation4 + $0x178] sm:$0xff] }
  0xe5   : > { %3296 = vmatpush1.bf16.msra.mxu1 %v3295_v32  ;;  %v739_v49 = vld [vmem:[#allocation4 + $0x8e8] sm:$0xff]  ;;  %1064 = vmatprep.mubr.f32.mxu1 %v4628_v36  ;;  %v738_v62 = vld [vmem:[#allocation4 + $0x8e0] sm:$0xff]  ;;  %v336_v20 = vld [vmem:[%s4594_s10 + $0x110] sm:$0xff]  ;;  %v3309_v25 = vpack.c.bf16 %v501_v11, %v497_v9 }
  0xe6   : > { %1238 = vmatmul.mubr.f32.gmra.mrb[2].mxu0 %v312_v35  ;;  %v4638_v51 = vld [vmem:[%s4594_s10 + $0xc8] sm:$0xff]  ;;  %3298 = vmatprep.subr.bf16.mxu1 %v3297_v38  ;;  %v3173_v60 = vpack.c.bf16 %v739_v49, %v735_v48  ;;  %v4644_v63 = vld [vmem:[%s4594_s10 + $0xc0] sm:$0xff]  ;;  %v3175_v10 = vpack.c.bf16 %v738_v62, %v734_v61  ;;  %v345_v23 = vld [vmem:[%s4594_s10 + $0x158] sm:$0xff] }
  0xe7   : > { %1243 = vmatprep.mubr.f32.mxu0 %v321_v37  ;;  %3168 = vmatpush1.bf16.msra.mxu0 %v3167_v42  ;;  %v743_v0 = vld [vmem:[#allocation4 + $0x908] sm:$0xff]  ;;  %v742_v13 = vld [vmem:[#allocation4 + $0x900] sm:$0xff]  ;;  %v496_v26 = vld [vmem:[#allocation4 + $0x150] sm:$0xff] }
  0xe8   : > { %1065 = vmatmul.mubr.f32.gmra.mrb[4].mxu1 %v4633_v47  ;;  %3170 = vmatprep.subr.bf16.mxu0 %v3169_v44  ;;  %v747_v1 = vld [vmem:[#allocation4 + $0x928] sm:$0xff]  ;;  %v746_v15 = vld [vmem:[#allocation4 + $0x920] sm:$0xff]  ;;  %v500_v27 = vld [vmem:[#allocation4 + $0x170] sm:$0xff] }
  0xe9   : > { %1070 = vmatprep.mubr.f32.mxu1 %v4638_v51  ;;  %3300 = vmatpush1.bf16.msra.mxu1 %v3299_v53  ;;  %v4648_v3 = vld [vmem:[%s4594_s10 + $0x108] sm:$0xff]  ;;  %v3177_v12 = vpack.c.bf16 %v747_v1, %v743_v0  ;;  %v4654_v17 = vld [vmem:[%s4594_s10 + $0x100] sm:$0xff]  ;;  %v3179_v28 = vpack.c.bf16 %v746_v15, %v742_v13  ;;  %v505_v29 = vld [vmem:[#allocation4 + $0x198] sm:$0xff]  ;;  %v3311_v42 = vpack.c.bf16 %v500_v27, %v496_v26 }
  0xea   : > { %1244 = vmatmul.mubr.f32.gmra.mrb[4].mxu0 %v320_v50  ;;  %3302 = vmatprep.subr.bf16.mxu1 %v3301_v54  ;;  %v751_v18 = vld [vmem:[#allocation4 + $0x948] sm:$0xff]  ;;  %v509_v30 = vld [vmem:[#allocation4 + $0x1b8] sm:$0xff]  ;;  %v750_v33 = vld [vmem:[#allocation4 + $0x940] sm:$0xff] }
  0xeb   : > { %1249 = vmatprep.mubr.f32.mxu0 %v329_v52  ;;  %3172 = vmatpush1.bf16.msra.mxu0 %v3171_v58  ;;  %v755_v19 = vld [vmem:[#allocation4 + $0x968] sm:$0xff]  ;;  %v754_v34 = vld [vmem:[#allocation4 + $0x960] sm:$0xff]  ;;  %v344_v39 = vld [vmem:[%s4594_s10 + $0x150] sm:$0xff]  ;;  %v3313_v43 = vpack.c.bf16 %v509_v30, %v505_v29 }
  0xec   : > { %1071 = vmatmul.mubr.f32.gmra.mrb[6].mxu1 %v4644_v63  ;;  %3174 = vmatprep.subr.bf16.mxu0 %v3173_v60  ;;  %v4658_v21 = vld [vmem:[%s4594_s10 + $0x148] sm:$0xff]  ;;  %v3181_v32 = vpack.c.bf16 %v755_v19, %v751_v18  ;;  %v4664_v35 = vld [vmem:[%s4594_s10 + $0x140] sm:$0xff]  ;;  %v353_v41 = vld [vmem:[%s4594_s10 + $0x198] sm:$0xff]  ;;  %v3183_v46 = vpack.c.bf16 %v754_v34, %v750_v33 }
  0xed   : > { %1076 = vmatprep.mubr.f32.mxu1 %v4648_v3  ;;  %3304 = vmatpush1.bf16.msra.mxu1 %v3303_v5  ;;  %v759_v37 = vld [vmem:[#allocation4 + $0x988] sm:$0xff]  ;;  %v504_v44 = vld [vmem:[#allocation4 + $0x190] sm:$0xff]  ;;  %v513_v48 = vld [vmem:[#allocation4 + $0x1d8] sm:$0xff] }
  0xee   : > { %1250 = vmatmul.mubr.f32.gmra.mrb[6].mxu0 %v328_v2  ;;  %3306 = vmatprep.subr.bf16.mxu1 %v3305_v6  ;;  %v763_v38 = vld [vmem:[#allocation4 + $0x9a8] sm:$0xff]  ;;  %v508_v45 = vld [vmem:[#allocation4 + $0x1b0] sm:$0xff]  ;;  %v517_v49 = vld [vmem:[#allocation4 + $0x1f8] sm:$0xff] }
  0xef   : > { %1255 = vmatprep.mubr.f32.mxu0 %v337_v4  ;;  %3176 = vmatpush1.bf16.msra.mxu0 %v3175_v10  ;;  %v4668_v40 = vld [vmem:[%s4594_s10 + $0x188] sm:$0xff]  ;;  %v3185_v50 = vpack.c.bf16 %v763_v38, %v759_v37  ;;  %v758_v52 = vld [vmem:[#allocation4 + $0x980] sm:$0xff]  ;;  %v352_v57 = vld [vmem:[%s4594_s10 + $0x190] sm:$0xff]  ;;  %v3315_v60 = vpack.c.bf16 %v508_v45, %v504_v44  ;;  %v3317_v61 = vpack.c.bf16 %v517_v49, %v513_v48 }
  0xf0   : > { %1077 = vmatmul.mubr.f32.gmra.mrb[8].mxu1 %v4654_v17  ;;  %3178 = vmatprep.subr.bf16.mxu0 %v3177_v12  ;;  %v762_v53 = vld [vmem:[#allocation4 + $0x9a0] sm:$0xff]  ;;  %v767_v55 = vld [vmem:[#allocation4 + $0x9c8] sm:$0xff]  ;;  %v361_v59 = vld [vmem:[%s4594_s10 + $0x1d8] sm:$0xff] }
  0xf1   : > { %1082 = vmatprep.mubr.f32.mxu1 %v4658_v21  ;;  %3308 = vmatpush1.bf16.msra.mxu1 %v3307_v24  ;;  %v4674_v54 = vld [vmem:[%s4594_s10 + $0x180] sm:$0xff]  ;;  %v771_v56 = vld [vmem:[#allocation4 + $0x9e8] sm:$0xff]  ;;  %v512_v62 = vld [vmem:[#allocation4 + $0x1d0] sm:$0xff]  ;;  %v3187_v1 = vpack.c.bf16 %v762_v53, %v758_v52 }
  0xf2   : > { %1256 = vmatmul.mubr.f32.gmra.mrb[8].mxu0 %v336_v20  ;;  %3310 = vmatprep.subr.bf16.mxu1 %v3309_v25  ;;  %v4678_v58 = vld [vmem:[%s4594_s10 + $0x1c8] sm:$0xff]  ;;  %v516_v0 = vld [vmem:[#allocation4 + $0x1f0] sm:$0xff]  ;;  %v521_v2 = vld [vmem:[#allocation4 + $0x218] sm:$0xff]  ;;  %v3189_v5 = vpack.c.bf16 %v771_v56, %v767_v55 }
  0xf3   : > { %1261 = vmatprep.mubr.f32.mxu0 %v345_v23  ;;  %3180 = vmatpush1.bf16.msra.mxu0 %v3179_v28  ;;  %v525_v4 = vld [vmem:[#allocation4 + $0x238] sm:$0xff]  ;;  %v766_v6 = vld [vmem:[#allocation4 + $0x9c0] sm:$0xff]  ;;  %v775_v9 = vld [vmem:[#allocation4 + $0xa08] sm:$0xff]  ;;  %v3319_v15 = vpack.c.bf16 %v516_v0, %v512_v62 }
  0xf4   : > { %1083 = vmatmul.mubr.f32.gmra.mrb[10].mxu1 %v4664_v35  ;;  %3182 = vmatprep.subr.bf16.mxu0 %v3181_v32  ;;  %v770_v7 = vld [vmem:[#allocation4 + $0x9e0] sm:$0xff]  ;;  %v779_v10 = vld [vmem:[#allocation4 + $0xa28] sm:$0xff]  ;;  %v360_v11 = vld [vmem:[%s4594_s10 + $0x1d0] sm:$0xff]  ;;  %v3321_v18 = vpack.c.bf16 %v525_v4, %v521_v2 }
  0xf5   : > { %1088 = vmatprep.mubr.f32.mxu1 %v4668_v40  ;;  %3312 = vmatpush1.bf16.msra.mxu1 %v3311_v42  ;;  %v4684_v8 = vld [vmem:[%s4594_s10 + $0x1c0] sm:$0xff]  ;;  %v4688_v12 = vld [vmem:[%s4594_s10 + $0x208] sm:$0xff]  ;;  %v369_v13 = vld [vmem:[%s4594_s10 + $0x218] sm:$0xff]  ;;  %v3191_v23 = vpack.c.bf16 %v770_v7, %v766_v6  ;;  %v3193_v26 = vpack.c.bf16 %v779_v10, %v775_v9 }
  0xf6   : > { %1262 = vmatmul.mubr.f32.gmra.mrb[10].mxu0 %v344_v39  ;;  %3314 = vmatprep.subr.bf16.mxu1 %v3313_v43  ;;  %v520_v19 = vld [vmem:[#allocation4 + $0x210] sm:$0xff]  ;;  %v529_v24 = vld [vmem:[#allocation4 + $0x258] sm:$0xff]  ;;  %v774_v27 = vld [vmem:[#allocation4 + $0xa00] sm:$0xff] }
  0xf7   : > { %1267 = vmatprep.mubr.f32.mxu0 %v353_v41  ;;  %3184 = vmatpush1.bf16.msra.mxu0 %v3183_v46  ;;  %v524_v20 = vld [vmem:[#allocation4 + $0x230] sm:$0xff]  ;;  %v533_v25 = vld [vmem:[#allocation4 + $0x278] sm:$0xff]  ;;  %v778_v28 = vld [vmem:[#allocation4 + $0xa20] sm:$0xff] }
  0xf8   : > { %1089 = vmatmul.mubr.f32.gmra.mrb[12].mxu1 %v4674_v54  ;;  %3186 = vmatprep.subr.bf16.mxu0 %v3185_v50  ;;  %v4694_v29 = vld [vmem:[%s4594_s10 + $0x200] sm:$0xff]  ;;  %v783_v30 = vld [vmem:[#allocation4 + $0xa48] sm:$0xff]  ;;  %v368_v33 = vld [vmem:[%s4594_s10 + $0x210] sm:$0xff]  ;;  %v3323_v38 = vpack.c.bf16 %v524_v20, %v520_v19  ;;  %v3325_v39 = vpack.c.bf16 %v533_v25, %v529_v24  ;;  %v3195_v43 = vpack.c.bf16 %v778_v28, %v774_v27 }
  0xf9   : > { %1094 = vmatprep.mubr.f32.mxu1 %v4678_v58  ;;  %3316 = vmatpush1.bf16.msra.mxu1 %v3315_v60  ;;  %v787_v32 = vld [vmem:[#allocation4 + $0xa68] sm:$0xff]  ;;  %v377_v37 = vld [vmem:[%s4594_s10 + $0x258] sm:$0xff]  ;;  %v528_v41 = vld [vmem:[#allocation4 + $0x250] sm:$0xff] }
  0xfa   : > { %1268 = vmatmul.mubr.f32.gmra.mrb[12].mxu0 %v352_v57  ;;  %3318 = vmatprep.subr.bf16.mxu1 %v3317_v61  ;;  %v4698_v34 = vld [vmem:[%s4594_s10 + $0x248] sm:$0xff]  ;;  %v532_v42 = vld [vmem:[#allocation4 + $0x270] sm:$0xff]  ;;  %v537_v44 = vld [vmem:[#allocation4 + $0x298] sm:$0xff]  ;;  %v3197_v45 = vpack.c.bf16 %v787_v32, %v783_v30 }
  0xfb   : > { %1273 = vmatprep.mubr.f32.mxu0 %v361_v59  ;;  %3188 = vmatpush1.bf16.msra.mxu0 %v3187_v1  ;;  %v541_v46 = vld [vmem:[#allocation4 + $0x2b8] sm:$0xff]  ;;  %v782_v48 = vld [vmem:[#allocation4 + $0xa40] sm:$0xff]  ;;  %v791_v52 = vld [vmem:[#allocation4 + $0xa88] sm:$0xff]  ;;  %v3327_v59 = vpack.c.bf16 %v532_v42, %v528_v41 }
  0xfc   : > { %1095 = vmatmul.mubr.f32.gmra.mrb[14].mxu1 %v4684_v8  ;;  %3190 = vmatprep.subr.bf16.mxu0 %v3189_v5  ;;  %v786_v49 = vld [vmem:[#allocation4 + $0xa60] sm:$0xff]  ;;  %v795_v53 = vld [vmem:[#allocation4 + $0xaa8] sm:$0xff]  ;;  %v376_v55 = vld [vmem:[%s4594_s10 + $0x250] sm:$0xff]  ;;  %v3329_v60 = vpack.c.bf16 %v541_v46, %v537_v44 }
  0xfd   : > { %1100 = vmatprep.mubr.f32.mxu1 %v4688_v12  ;;  %3320 = vmatpush1.bf16.msra.mxu1 %v3319_v15  ;;  %v4704_v50 = vld [vmem:[%s4594_s10 + $0x240] sm:$0xff]  ;;  %v4708_v56 = vld [vmem:[%s4594_s10 + $0x288] sm:$0xff]  ;;  %v385_v57 = vld [vmem:[%s4594_s10 + $0x298] sm:$0xff]  ;;  %v3199_v61 = vpack.c.bf16 %v786_v49, %v782_v48  ;;  %v3201_v2 = vpack.c.bf16 %v795_v53, %v791_v52 }
  0xfe   : > { %1274 = vmatmul.mubr.f32.gmra.mrb[14].mxu0 %v360_v11  ;;  %3322 = vmatprep.subr.bf16.mxu1 %v3321_v18  ;;  %v536_v62 = vld [vmem:[#allocation4 + $0x290] sm:$0xff]  ;;  %v790_v1 = vld [vmem:[#allocation4 + $0xa80] sm:$0xff]  ;;  %v545_v5 = vld [vmem:[#allocation4 + $0x2d8] sm:$0xff] }
  0xff   : > { %1279 = vmatprep.mubr.f32.mxu0 %v369_v13  ;;  %3192 = vmatpush1.bf16.msra.mxu0 %v3191_v23  ;;  %v540_v0 = vld [vmem:[#allocation4 + $0x2b0] sm:$0xff]  ;;  %v794_v4 = vld [vmem:[#allocation4 + $0xaa0] sm:$0xff]  ;;  %v549_v6 = vld [vmem:[#allocation4 + $0x2f8] sm:$0xff] }
 0x100   : > { %1101 = vmatmul.mubr.f32.gmra.mrb[16].mxu1 %v4694_v29  ;;  %3194 = vmatprep.subr.bf16.mxu0 %v3193_v26  ;;  %v4714_v7 = vld [vmem:[%s4594_s10 + $0x280] sm:$0xff]  ;;  %v799_v9 = vld [vmem:[#allocation4 + $0xac8] sm:$0xff]  ;;  %v384_v11 = vld [vmem:[%s4594_s10 + $0x290] sm:$0xff]  ;;  %v3331_v18 = vpack.c.bf16 %v540_v0, %v536_v62  ;;  %v3203_v19 = vpack.c.bf16 %v794_v4, %v790_v1  ;;  %v3333_v20 = vpack.c.bf16 %v549_v6, %v545_v5 }
 0x101   : > { %1106 = vmatprep.mubr.f32.mxu1 %v4698_v34  ;;  %3324 = vmatpush1.bf16.msra.mxu1 %v3323_v38  ;;  %v803_v10 = vld [vmem:[#allocation4 + $0xae8] sm:$0xff]  ;;  %v393_v15 = vld [vmem:[%s4594_s10 + $0x2d8] sm:$0xff]  ;;  %v544_v23 = vld [vmem:[#allocation4 + $0x2d0] sm:$0xff] }
 0x102   : > { %1280 = vmatmul.mubr.f32.gmra.mrb[16].mxu0 %v368_v33  ;;  %3326 = vmatprep.subr.bf16.mxu1 %v3325_v39  ;;  %v4718_v13 = vld [vmem:[%s4594_s10 + $0x2c8] sm:$0xff]  ;;  %v548_v24 = vld [vmem:[#allocation4 + $0x2f0] sm:$0xff]  ;;  %v798_v25 = vld [vmem:[#allocation4 + $0xac0] sm:$0xff]  ;;  %v3205_v26 = vpack.c.bf16 %v803_v10, %v799_v9 }
 0x103   : > { %1285 = vmatprep.mubr.f32.mxu0 %v377_v37  ;;  %3196 = vmatpush1.bf16.msra.mxu0 %v3195_v43  ;;  %v802_v27 = vld [vmem:[#allocation4 + $0xae0] sm:$0xff]  ;;  %v553_v28 = vld [vmem:[#allocation4 + $0x318] sm:$0xff]  ;;  %v807_v33 = vld [vmem:[#allocation4 + $0xb08] sm:$0xff]  ;;  %v3335_v42 = vpack.c.bf16 %v548_v24, %v544_v23 }
 0x104   : > { %1107 = vmatmul.mubr.f32.gmra.mrb[18].mxu1 %v4704_v50  ;;  %3198 = vmatprep.subr.bf16.mxu0 %v3197_v45  ;;  %v557_v30 = vld [vmem:[#allocation4 + $0x338] sm:$0xff]  ;;  %v4724_v32 = vld [vmem:[%s4594_s10 + $0x2c0] sm:$0xff]  ;;  %v811_v37 = vld [vmem:[#allocation4 + $0xb28] sm:$0xff]  ;;  %v3207_v43 = vpack.c.bf16 %v802_v27, %v798_v25 }
 0x105   : > { %1112 = vmatprep.mubr.f32.mxu1 %v4708_v56  ;;  %3328 = vmatpush1.bf16.msra.mxu1 %v3327_v59  ;;  %v392_v38 = vld [vmem:[%s4594_s10 + $0x2d0] sm:$0xff]  ;;  %v4728_v39 = vld [vmem:[%s4594_s10 + $0x308] sm:$0xff]  ;;  %v401_v41 = vld [vmem:[%s4594_s10 + $0x318] sm:$0xff]  ;;  %v3337_v44 = vpack.c.bf16 %v557_v30, %v553_v28  ;;  %v3209_v49 = vpack.c.bf16 %v811_v37, %v807_v33 }
 0x106   : > { %1286 = vmatmul.mubr.f32.gmra.mrb[18].mxu0 %v376_v55  ;;  %3330 = vmatprep.subr.bf16.mxu1 %v3329_v60  ;;  %v552_v45 = vld [vmem:[#allocation4 + $0x310] sm:$0xff]  ;;  %v806_v48 = vld [vmem:[#allocation4 + $0xb00] sm:$0xff]  ;;  %v561_v53 = vld [vmem:[#allocation4 + $0x358] sm:$0xff] }
 0x107   : > { %1291 = vmatprep.mubr.f32.mxu0 %v385_v57  ;;  %3200 = vmatpush1.bf16.msra.mxu0 %v3199_v61  ;;  %v556_v46 = vld [vmem:[#allocation4 + $0x330] sm:$0xff]  ;;  %v810_v52 = vld [vmem:[#allocation4 + $0xb20] sm:$0xff]  ;;  %v565_v55 = vld [vmem:[#allocation4 + $0x378] sm:$0xff] }
 0x108   : > { %1113 = vmatmul.mubr.f32.gmra.mrb[20].mxu1 %v4714_v7  ;;  %3202 = vmatprep.subr.bf16.mxu0 %v3201_v2  ;;  %v4734_v57 = vld [vmem:[%s4594_s10 + $0x300] sm:$0xff]  ;;  %v815_v59 = vld [vmem:[#allocation4 + $0xb48] sm:$0xff]  ;;  %v400_v61 = vld [vmem:[%s4594_s10 + $0x310] sm:$0xff]  ;;  %v3339_v1 = vpack.c.bf16 %v556_v46, %v552_v45  ;;  %v3211_v2 = vpack.c.bf16 %v810_v52, %v806_v48  ;;  %v3341_v4 = vpack.c.bf16 %v565_v55, %v561_v53 }
 0x109   : > { %1118 = vmatprep.mubr.f32.mxu1 %v4718_v13  ;;  %3332 = vmatpush1.bf16.msra.mxu1 %v3331_v18  ;;  %v819_v60 = vld [vmem:[#allocation4 + $0xb68] sm:$0xff]  ;;  %v409_v0 = vld [vmem:[%s4594_s10 + $0x358] sm:$0xff]  ;;  %v560_v5 = vld [vmem:[#allocation4 + $0x350] sm:$0xff] }
 0x10a   : > { %1292 = vmatmul.mubr.f32.gmra.mrb[20].mxu0 %v384_v11  ;;  %3334 = vmatprep.subr.bf16.mxu1 %v3333_v20  ;;  %v4738_v62 = vld [vmem:[%s4594_s10 + $0x348] sm:$0xff]  ;;  %v564_v6 = vld [vmem:[#allocation4 + $0x370] sm:$0xff]  ;;  %v814_v9 = vld [vmem:[#allocation4 + $0xb40] sm:$0xff]  ;;  %v3213_v10 = vpack.c.bf16 %v819_v60, %v815_v59 }
 0x10b   : > { %1297 = vmatprep.mubr.f32.mxu0 %v393_v15  ;;  %3204 = vmatpush1.bf16.msra.mxu0 %v3203_v19  ;;  %v818_v11 = vld [vmem:[#allocation4 + $0xb60] sm:$0xff]  ;;  %v569_v15 = vld [vmem:[#allocation4 + $0x398] sm:$0xff]  ;;  %v823_v20 = vld [vmem:[#allocation4 + $0xb88] sm:$0xff]  ;;  %v3343_v27 = vpack.c.bf16 %v564_v6, %v560_v5 }
 0x10c   : > { %1119 = vmatmul.mubr.f32.gmra.mrb[22].mxu1 %v4724_v32  ;;  %3206 = vmatprep.subr.bf16.mxu0 %v3205_v26  ;;  %v573_v18 = vld [vmem:[#allocation4 + $0x3b8] sm:$0xff]  ;;  %v4744_v19 = vld [vmem:[%s4594_s10 + $0x340] sm:$0xff]  ;;  %v827_v23 = vld [vmem:[#allocation4 + $0xba8] sm:$0xff]  ;;  %v3215_v28 = vpack.c.bf16 %v818_v11, %v814_v9 }
 0x10d   : > { %1124 = vmatprep.mubr.f32.mxu1 %v4728_v39  ;;  %3336 = vmatpush1.bf16.msra.mxu1 %v3335_v42  ;;  %v408_v24 = vld [vmem:[%s4594_s10 + $0x350] sm:$0xff]  ;;  %v4748_v25 = vld [vmem:[%s4594_s10 + $0x388] sm:$0xff]  ;;  %v417_v26 = vld [vmem:[%s4594_s10 + $0x398] sm:$0xff]  ;;  %v3345_v30 = vpack.c.bf16 %v573_v18, %v569_v15 }
 0x10e   : > { %1298 = vmatmul.mubr.f32.gmra.mrb[22].mxu0 %v392_v38  ;;  %3338 = vmatprep.subr.bf16.mxu1 %v3337_v44  ;;  %v568_v33 = vld [vmem:[#allocation4 + $0x390] sm:$0xff]  ;;  %v822_v38 = vld [vmem:[#allocation4 + $0xb80] sm:$0xff]  ;;  %v581_v44 = vld [vmem:[#allocation4 + $0x3f8] sm:$0xff] }
 0x10f   : > { %1303 = vmatprep.mubr.f32.mxu0 %v401_v41  ;;  %3208 = vmatpush1.bf16.msra.mxu0 %v3207_v43  ;;  %v572_v37 = vld [vmem:[#allocation4 + $0x3b0] sm:$0xff]  ;;  %v3217_v41 = vpack.c.bf16 %v827_v23, %v823_v20  ;;  %v826_v42 = vld [vmem:[#allocation4 + $0xba0] sm:$0xff]  ;;  %v577_v43 = vld [vmem:[#allocation4 + $0x3d8] sm:$0xff] }
 0x110   : > { %1125 = vmatmul.mubr.f32.gmra.mrb[24].mxu1 %v4734_v57  ;;  %3210 = vmatprep.subr.bf16.mxu0 %v3209_v49  ;;  %v4754_v45 = vld [vmem:[%s4594_s10 + $0x380] sm:$0xff]  ;;  %v831_v46 = vld [vmem:[#allocation4 + $0xbc8] sm:$0xff]  ;;  %v416_v49 = vld [vmem:[%s4594_s10 + $0x390] sm:$0xff]  ;;  %v3347_v55 = vpack.c.bf16 %v572_v37, %v568_v33  ;;  %v3219_v59 = vpack.c.bf16 %v826_v42, %v822_v38  ;;  %v3349_v60 = vpack.c.bf16 %v581_v44, %v577_v43 }
 0x111   : > { %1130 = vmatprep.mubr.f32.mxu1 %v4738_v62  ;;  %3340 = vmatpush1.bf16.msra.mxu1 %v3339_v1  ;;  %v835_v48 = vld [vmem:[#allocation4 + $0xbe8] sm:$0xff]  ;;  %v425_v53 = vld [vmem:[%s4594_s10 + $0x3d8] sm:$0xff]  ;;  %v580_v1 = vld [vmem:[#allocation4 + $0x3f0] sm:$0xff] }
 0x112   : > { %1304 = vmatmul.mubr.f32.gmra.mrb[24].mxu0 %v400_v61  ;;  %3342 = vmatprep.subr.bf16.mxu1 %v3341_v4  ;;  %v4758_v52 = vld [vmem:[%s4594_s10 + $0x3c8] sm:$0xff]  ;;  %v830_v61 = vld [vmem:[#allocation4 + $0xbc0] sm:$0xff]  ;;  %v585_v5 = vld [vmem:[#allocation4 + $0x418] sm:$0xff] }
 0x113   : > { %1309 = vmatprep.mubr.f32.mxu0 %v409_v0  ;;  %3212 = vmatpush1.bf16.msra.mxu0 %v3211_v2  ;;  %v576_v0 = vld [vmem:[#allocation4 + $0x3d0] sm:$0xff]  ;;  %v3221_v2 = vpack.c.bf16 %v835_v48, %v831_v46  ;;  %v834_v4 = vld [vmem:[#allocation4 + $0xbe0] sm:$0xff]  ;;  %v589_v6 = vld [vmem:[#allocation4 + $0x438] sm:$0xff] }
 0x114   : > { %1131 = vmatmul.mubr.f32.gmra.mrb[26].mxu1 %v4744_v19  ;;  %3214 = vmatprep.subr.bf16.mxu0 %v3213_v10  ;;  %v4764_v9 = vld [vmem:[%s4594_s10 + $0x3c0] sm:$0xff]  ;;  %v839_v10 = vld [vmem:[#allocation4 + $0xc08] sm:$0xff]  ;;  %v424_v15 = vld [vmem:[%s4594_s10 + $0x3d0] sm:$0xff]  ;;  %v3351_v20 = vpack.c.bf16 %v580_v1, %v576_v0 }
 0x115   : > { %1136 = vmatprep.mubr.f32.mxu1 %v4748_v25  ;;  %3344 = vmatpush1.bf16.msra.mxu1 %v3343_v27  ;;  %v843_v11 = vld [vmem:[#allocation4 + $0xc28] sm:$0xff]  ;;  %v433_v23 = vld [vmem:[%s4594_s10 + $0x418] sm:$0xff]  ;;  %v4784_v38 = vld [vmem:[%s4594_s10 + $0x440] sm:$0xff] }
 0x116   : > { %1310 = vmatmul.mubr.f32.gmra.mrb[26].mxu0 %v408_v24  ;;  %3346 = vmatprep.subr.bf16.mxu1 %v3345_v30  ;;  %v4768_v18 = vld [vmem:[%s4594_s10 + $0x408] sm:$0xff]  ;;  %v3223_v24 = vpack.c.bf16 %v834_v4, %v830_v61  ;;  %v3225_v27 = vpack.c.bf16 %v843_v11, %v839_v10  ;;  %v432_v30 = vld [vmem:[%s4594_s10 + $0x410] sm:$0xff]  ;;  %v441_v37 = vld [vmem:[%s4594_s10 + $0x458] sm:$0xff] }
 0x117   : > { %1315 = vmatprep.mubr.f32.mxu0 %v417_v26  ;;  %3216 = vmatpush1.bf16.msra.mxu0 %v3215_v28  ;;  %v3353_v26 = vpack.c.bf16 %v589_v6, %v585_v5  ;;  %v4774_v28 = vld [vmem:[%s4594_s10 + $0x400] sm:$0xff]  ;;  %v4778_v33 = vld [vmem:[%s4594_s10 + $0x448] sm:$0xff]  ;;  %v449_v43 = vld [vmem:[%s4594_s10 + $0x498] sm:$0xff] }
 0x118   : > { %1137 = vmatmul.mubr.f32.gmra.mrb[28].mxu1 %v4754_v45  ;;  %3218 = vmatprep.subr.bf16.mxu0 %v3217_v41  ;;  %v440_v41 = vld [vmem:[%s4594_s10 + $0x450] sm:$0xff]  ;;  %v4788_v42 = vld [vmem:[%s4594_s10 + $0x488] sm:$0xff]  ;;  %v4794_v44 = vld [vmem:[%s4594_s10 + $0x480] sm:$0xff] }
 0x119   : > { %1142 = vmatprep.mubr.f32.mxu1 %v4758_v52  ;;  %3348 = vmatpush1.bf16.msra.mxu1 %v3347_v55  ;;  %v448_v46 = vld [vmem:[%s4594_s10 + $0x490] sm:$0xff]  ;;  %v593_v55 = vld [vmem:[#allocation4 + $0x458] sm:$0xff]  ;;  %v842_v61 = vld [vmem:[#allocation4 + $0xc20] sm:$0xff] }
 0x11a   : > { %1316 = vmatmul.mubr.f32.gmra.mrb[28].mxu0 %v416_v49  ;;  %3350 = vmatprep.subr.bf16.mxu1 %v3349_v60  ;;  %v584_v48 = vld [vmem:[#allocation4 + $0x410] sm:$0xff]  ;;  %v838_v60 = vld [vmem:[#allocation4 + $0xc00] sm:$0xff]  ;;  %v847_v1 = vld [vmem:[#allocation4 + $0xc48] sm:$0xff] }
 0x11b   : > { %1321 = vmatprep.mubr.f32.mxu0 %v425_v53  ;;  %3220 = vmatpush1.bf16.msra.mxu0 %v3219_v59  ;;  %v588_v49 = vld [vmem:[#allocation4 + $0x430] sm:$0xff]  ;;  %v307_v53 = vld [vmem:[%s4594_s10 + $0x28] sm:$0xff]  ;;  %v597_v59 = vld [vmem:[#allocation4 + $0x478] sm:$0xff] }
 0x11c   : > { %1143 = vmatmul.mubr.f32.gmra.mrb[30].mxu1 %v4764_v9  ;;  %3222 = vmatprep.subr.bf16.mxu0 %v3221_v2  ;;  %v3355_v0 = vpack.c.bf16 %v588_v49, %v584_v48  ;;  %v851_v2 = vld [vmem:[#allocation4 + $0xc68] sm:$0xff]  ;;  %v306_v4 = vld [vmem:[%s4594_s10 + $0x20] sm:$0xff]  ;;  %v592_v5 = vld [vmem:[#allocation4 + $0x450] sm:$0xff]  ;;  %v3357_v11 = vpack.c.bf16 %v597_v59, %v593_v55 }
 0x11d   : > { %1148 = vmatprep.mubr.f32.mxu1 %v4768_v18  ;;  %3352 = vmatpush1.bf16.msra.mxu1 %v3351_v20  ;;  %v596_v6 = vld [vmem:[#allocation4 + $0x470] sm:$0xff]  ;;  %v315_v10 = vld [vmem:[%s4594_s10 + $0x68] sm:$0xff]  ;;  %v3227_v20 = vpack.c.bf16 %v842_v61, %v838_v60  ;;  %v613_v55 = vld [vmem:[#allocation4 + $0x4f8] sm:$0xff] }
 0x11e   : > { %1322 = vmatmul.mubr.f32.gmra.mrb[30].mxu0 %v424_v15  ;;  %3354 = vmatprep.subr.bf16.mxu1 %v3353_v26  ;;  %v601_v15 = vld [vmem:[#allocation4 + $0x498] sm:$0xff]  ;;  %v846_v26 = vld [vmem:[#allocation4 + $0xc40] sm:$0xff]  ;;  %v600_v48 = vld [vmem:[#allocation4 + $0x490] sm:$0xff] }
 0x11f   : > { %1327 = vmatprep.mubr.f32.mxu0 %v433_v23  ;;  %3224 = vmatpush1.bf16.msra.mxu0 %v3223_v24  ;;  %v605_v23 = vld [vmem:[#allocation4 + $0x4b8] sm:$0xff]  ;;  %v3229_v24 = vpack.c.bf16 %v851_v2, %v847_v1  ;;  %v604_v49 = vld [vmem:[#allocation4 + $0x4b0] sm:$0xff]  ;;  %v854_v60 = vld [vmem:[#allocation4 + $0xc80] sm:$0xff] }
 0x120   : > { %1149 = vmatmul.mubr.f32.gmra.mrb[32].mxu1 %v4774_v28  ;;  %3226 = vmatprep.subr.bf16.mxu0 %v3225_v27  ;;  %v850_v27 = vld [vmem:[#allocation4 + $0xc60] sm:$0xff]  ;;  %v331_v2 = vld [vmem:[%s4594_s10 + $0xe8] sm:$0xff] }
 0x121   : > { %1154 = vmatprep.mubr.f32.mxu1 %v4778_v33  ;;  %v858_v61 = vld [vmem:[#allocation4 + $0xca0] sm:$0xff] }
 0x122   : > { %1328 = vmatmul.mubr.f32.gmra.mrb[32].mxu0 %v432_v30  ;;  %v855_v30 = vld [vmem:[#allocation4 + $0xc88] sm:$0xff]  ;;  %v322_v1 = vld [vmem:[%s4594_s10 + $0xa0] sm:$0xff] }
 0x123   : > { %1333 = vmatprep.mubr.f32.mxu0 %v441_v37  ;;  %v859_v37 = vld [vmem:[#allocation4 + $0xca8] sm:$0xff] }
 0x124   : > { %1155 = vmatmul.mubr.f32.gmra.mrb[34].mxu1 %v4784_v38  ;;  %v3233_v59 = vpack.c.bf16 %v859_v37, %v855_v30 }
 0x125   : > { %1160 = vmatprep.mubr.f32.mxu1 %v4788_v42 }
 0x126   : > { %1334 = vmatmul.mubr.f32.gmra.mrb[34].mxu0 %v440_v41  ;;  %v314_v41 = vld [vmem:[%s4594_s10 + $0x60] sm:$0xff] }
 0x127   : > { %1339 = vmatprep.mubr.f32.mxu0 %v449_v43  ;;  %v323_v43 = vld [vmem:[%s4594_s10 + $0xa8] sm:$0xff] }
 0x128   : > { %1161 = vmatmul.mubr.f32.gmra.mrb[36].mxu1 %v4794_v44 }
 0x129   : > { %1768 = vmatprep.mubr.f32.mxu1 %v4609_v16  ;;  %v3359_v16 = vpack.c.bf16 %v596_v6, %v592_v5  ;;  %v608_v6 = vld [vmem:[#allocation4 + $0x4d0] sm:$0xff] }
 0x12a   : > { %1340 = vmatmul.mubr.f32.gmra.mrb[36].mxu0 %v448_v46  ;;  %v3361_v46 = vpack.c.bf16 %v605_v23, %v601_v15  ;;  %v621_v15 = vld [vmem:[#allocation4 + $0x538] sm:$0xff]  ;;  %v862_v23 = vld [vmem:[#allocation4 + $0xcc0] sm:$0xff] }
 0x12b   : > { %1410 = vmatprep.mubr.f32.mxu0 %v307_v53  ;;  %v3231_v53 = vpack.c.bf16 %v850_v27, %v846_v26  ;;  %v875_v26 = vld [vmem:[#allocation4 + $0xd28] sm:$0xff]  ;;  %v330_v27 = vld [vmem:[%s4594_s10 + $0xe0] sm:$0xff] }
 0x12c   : > { %1769 = vmatmul.mubr.f32.vlgmr.msra.gmra.mrb[38].mxu1 %v4614_v14  ;;  %v609_v14 = vld [vmem:[#allocation4 + $0x4d8] sm:$0xff] }
 0x12d   : > { %3356 = vmatpush1.bf16.msra.mxu1 %v3355_v0  ;;  %1774 = vmatprep.mubr.f32.mxu1 %v4618_v22  ;;  %v863_v22 = vld [vmem:[#allocation4 + $0xcc8] sm:$0xff]  ;;  %v3365_v5 = vpack.c.bf16 %v613_v55, %v609_v14  ;;  %v874_v14 = vld [vmem:[#allocation4 + $0xd20] sm:$0xff] }
 0x12e   : > { %1411 = vmatmul.mubr.f32.vlgmr.msra.gmra.mrb[0].mxu0 %v306_v4  ;;  %3358 = vmatprep.subr.bf16.mxu1 %v3357_v11  ;;  %v867_v0 = vld [vmem:[#allocation4 + $0xce8] sm:$0xff]  ;;  %v3363_v4 = vpack.c.bf16 %v604_v49, %v600_v48  ;;  %v3235_v11 = vpack.c.bf16 %v858_v61, %v854_v60  ;;  %v870_v49 = vld [vmem:[#allocation4 + $0xd00] sm:$0xff] }
 0x12f   : > { %1416 = vmatprep.mubr.f32.mxu0 %v315_v10  ;;  %3228 = vmatpush1.bf16.msra.mxu0 %v3227_v20  ;;  %v612_v10 = vld [vmem:[#allocation4 + $0x4f0] sm:$0xff]  ;;  %v3237_v20 = vpack.c.bf16 %v867_v0, %v863_v22  ;;  %v883_v55 = vld [vmem:[#allocation4 + $0xd68] sm:$0xff] }
 0x130   : > { %1775 = vmatmul.mubr.f32.gmra.mrb[40].mxu1 %v4623_v31  ;;  %3230 = vmatprep.subr.bf16.mxu0 %v3229_v24  ;;  %v617_v31 = vld [vmem:[#allocation4 + $0x518] sm:$0xff]  ;;  %v866_v24 = vld [vmem:[#allocation4 + $0xce0] sm:$0xff]  ;;  %v3367_v30 = vpack.c.bf16 %v612_v10, %v608_v6  ;;  %v347_v60 = vld [vmem:[%s4594_s10 + $0x168] sm:$0xff] }
 0x131   : > { %3360 = vmatpush1.bf16.msra.mxu1 %v3359_v16  ;;  %1780 = vmatprep.mubr.f32.mxu1 %v4628_v36  ;;  %v871_v36 = vld [vmem:[#allocation4 + $0xd08] sm:$0xff]  ;;  %v3369_v37 = vpack.c.bf16 %v621_v15, %v617_v31  ;;  %v628_v0 = vld [vmem:[#allocation4 + $0x570] sm:$0xff]  ;;  %v882_v6 = vld [vmem:[#allocation4 + $0xd60] sm:$0xff] }
 0x132   : > { %1417 = vmatmul.mubr.f32.gmra.mrb[2].mxu0 %v314_v41  ;;  %3362 = vmatprep.subr.bf16.mxu1 %v3361_v46  ;;  %v339_v16 = vld [vmem:[%s4594_s10 + $0x128] sm:$0xff]  ;;  %v616_v41 = vld [vmem:[#allocation4 + $0x510] sm:$0xff]  ;;  %v3239_v46 = vpack.c.bf16 %v866_v24, %v862_v23  ;;  %v3241_v48 = vpack.c.bf16 %v875_v26, %v871_v36  ;;  %v641_v26 = vld [vmem:[#allocation4 + $0x5d8] sm:$0xff] }
 0x133   : > { %1422 = vmatprep.mubr.f32.mxu0 %v323_v43  ;;  %3232 = vmatpush1.bf16.msra.mxu0 %v3231_v53  ;;  %v625_v43 = vld [vmem:[#allocation4 + $0x558] sm:$0xff]  ;;  %v879_v53 = vld [vmem:[#allocation4 + $0xd48] sm:$0xff]  ;;  %v636_v24 = vld [vmem:[#allocation4 + $0x5b0] sm:$0xff] }
 0x134   : > { %1781 = vmatmul.mubr.f32.gmra.mrb[42].mxu1 %v4633_v47  ;;  %3234 = vmatprep.subr.bf16.mxu0 %v3233_v59  ;;  %v620_v47 = vld [vmem:[#allocation4 + $0x530] sm:$0xff]  ;;  %v338_v59 = vld [vmem:[%s4594_s10 + $0x120] sm:$0xff]  ;;  %v887_v10 = vld [vmem:[#allocation4 + $0xd88] sm:$0xff] }
 0x135   : > { %1786 = vmatprep.mubr.f32.mxu1 %v4638_v51  ;;  %3364 = vmatpush1.bf16.msra.mxu1 %v3363_v4  ;;  %v629_v51 = vld [vmem:[#allocation4 + $0x578] sm:$0xff]  ;;  %v3371_v61 = vpack.c.bf16 %v620_v47, %v616_v41  ;;  %v3245_v4 = vpack.c.bf16 %v883_v55, %v879_v53  ;;  %v891_v31 = vld [vmem:[#allocation4 + $0xda8] sm:$0xff]  ;;  %v354_v47 = vld [vmem:[%s4594_s10 + $0x1a0] sm:$0xff] }
 0x136   : > { %1423 = vmatmul.mubr.f32.gmra.mrb[4].mxu0 %v322_v1  ;;  %3366 = vmatprep.subr.bf16.mxu1 %v3365_v5  ;;  %v3373_v22 = vpack.c.bf16 %v629_v51, %v625_v43  ;;  %v3243_v1 = vpack.c.bf16 %v874_v14, %v870_v49  ;;  %v878_v5 = vld [vmem:[#allocation4 + $0xd40] sm:$0xff]  ;;  %v355_v15 = vld [vmem:[%s4594_s10 + $0x1a8] sm:$0xff]  ;;  %v649_v14 = vld [vmem:[#allocation4 + $0x618] sm:$0xff] }
 0x137   : > { %1428 = vmatprep.mubr.f32.mxu0 %v331_v2  ;;  %3236 = vmatpush1.bf16.msra.mxu0 %v3235_v11  ;;  %v633_v2 = vld [vmem:[#allocation4 + $0x598] sm:$0xff]  ;;  %v346_v11 = vld [vmem:[%s4594_s10 + $0x160] sm:$0xff]  ;;  %v3247_v36 = vpack.c.bf16 %v882_v6, %v878_v5  ;;  %v899_v41 = vld [vmem:[#allocation4 + $0xde8] sm:$0xff] }
 0x138   : > { %1787 = vmatmul.mubr.f32.gmra.mrb[44].mxu1 %v4644_v63  ;;  %3238 = vmatprep.subr.bf16.mxu0 %v3237_v20  ;;  %v624_v63 = vld [vmem:[#allocation4 + $0x550] sm:$0xff]  ;;  %v363_v43 = vld [vmem:[%s4594_s10 + $0x1e8] sm:$0xff]  ;;  %v894_v55 = vld [vmem:[#allocation4 + $0xdc0] sm:$0xff] }
 0x139   : > { %1792 = vmatprep.mubr.f32.mxu1 %v4648_v3  ;;  %3368 = vmatpush1.bf16.msra.mxu1 %v3367_v30  ;;  %v637_v3 = vld [vmem:[#allocation4 + $0x5b8] sm:$0xff]  ;;  %v3375_v20 = vpack.c.bf16 %v628_v0, %v624_v63  ;;  %v890_v30 = vld [vmem:[#allocation4 + $0xda0] sm:$0xff]  ;;  %v371_v63 = vld [vmem:[%s4594_s10 + $0x228] sm:$0xff] }
 0x13a   : > { %1429 = vmatmul.mubr.f32.gmra.mrb[6].mxu0 %v330_v27  ;;  %3370 = vmatprep.subr.bf16.mxu1 %v3369_v37  ;;  %v3377_v23 = vpack.c.bf16 %v637_v3, %v633_v2  ;;  %v3249_v27 = vpack.c.bf16 %v891_v31, %v887_v10  ;;  %v895_v37 = vld [vmem:[#allocation4 + $0xdc8] sm:$0xff]  ;;  %v652_v2 = vld [vmem:[#allocation4 + $0x630] sm:$0xff]  ;;  %v902_v6 = vld [vmem:[#allocation4 + $0xe00] sm:$0xff] }
 0x13b   : > { %1434 = vmatprep.mubr.f32.mxu0 %v339_v16  ;;  %3240 = vmatpush1.bf16.msra.mxu0 %v3239_v46  ;;  %v886_v16 = vld [vmem:[#allocation4 + $0xd80] sm:$0xff]  ;;  %v3253_v53 = vpack.c.bf16 %v899_v41, %v895_v37  ;;  %v911_v31 = vld [vmem:[#allocation4 + $0xe48] sm:$0xff] }
 0x13c   : > { %1793 = vmatmul.mubr.f32.gmra.mrb[46].mxu1 %v4654_v17  ;;  %3242 = vmatprep.subr.bf16.mxu0 %v3241_v48  ;;  %v632_v17 = vld [vmem:[#allocation4 + $0x590] sm:$0xff]  ;;  %v3251_v49 = vpack.c.bf16 %v890_v30, %v886_v16  ;;  %v906_v10 = vld [vmem:[#allocation4 + $0xe20] sm:$0xff]  ;;  %v919_v30 = vld [vmem:[#allocation4 + $0xe88] sm:$0xff] }
 0x13d   : > { %1798 = vmatprep.mubr.f32.mxu1 %v4658_v21  ;;  %3372 = vmatpush1.bf16.msra.mxu1 %v3371_v61  ;;  %v645_v21 = vld [vmem:[#allocation4 + $0x5f8] sm:$0xff]  ;;  %v3379_v46 = vpack.c.bf16 %v636_v24, %v632_v17  ;;  %v644_v48 = vld [vmem:[#allocation4 + $0x5f0] sm:$0xff]  ;;  %v907_v61 = vld [vmem:[#allocation4 + $0xe28] sm:$0xff] }
 0x13e   : > { %1435 = vmatmul.mubr.f32.gmra.mrb[8].mxu0 %v338_v59  ;;  %3374 = vmatprep.subr.bf16.mxu1 %v3373_v22  ;;  %v3381_v51 = vpack.c.bf16 %v645_v21, %v641_v26  ;;  %v898_v59 = vld [vmem:[#allocation4 + $0xde0] sm:$0xff]  ;;  %v660_v24 = vld [vmem:[#allocation4 + $0x670] sm:$0xff]  ;;  %v665_v26 = vld [vmem:[#allocation4 + $0x698] sm:$0xff] }
 0x13f   : > { %1440 = vmatprep.mubr.f32.mxu0 %v347_v60  ;;  %3244 = vmatpush1.bf16.msra.mxu0 %v3243_v1  ;;  %v903_v60 = vld [vmem:[#allocation4 + $0xe08] sm:$0xff]  ;;  %v362_v22 = vld [vmem:[%s4594_s10 + $0x1e0] sm:$0xff]  ;;  %v3255_v3 = vpack.c.bf16 %v898_v59, %v894_v55  ;;  %v669_v21 = vld [vmem:[#allocation4 + $0x6b8] sm:$0xff] }
 0x140   : > { %1799 = vmatmul.mubr.f32.gmra.mrb[48].mxu1 %v4664_v35  ;;  %3246 = vmatprep.subr.bf16.mxu0 %v3245_v4  ;;  %v640_v35 = vld [vmem:[#allocation4 + $0x5d0] sm:$0xff]  ;;  %v657_v4 = vld [vmem:[#allocation4 + $0x658] sm:$0xff]  ;;  %v3257_v5 = vpack.c.bf16 %v907_v61, %v903_v60  ;;  %v914_v16 = vld [vmem:[#allocation4 + $0xe60] sm:$0xff] }
 0x141   : > { %1804 = vmatprep.mubr.f32.mxu1 %v4668_v40  ;;  %3376 = vmatpush1.bf16.msra.mxu1 %v3375_v20  ;;  %v653_v40 = vld [vmem:[#allocation4 + $0x638] sm:$0xff]  ;;  %v3383_v0 = vpack.c.bf16 %v644_v48, %v640_v35  ;;  %v379_v20 = vld [vmem:[%s4594_s10 + $0x268] sm:$0xff]  ;;  %v378_v41 = vld [vmem:[%s4594_s10 + $0x260] sm:$0xff] }
 0x142   : > { %1441 = vmatmul.mubr.f32.gmra.mrb[10].mxu0 %v346_v11  ;;  %3378 = vmatprep.subr.bf16.mxu1 %v3377_v23  ;;  %v3385_v1 = vpack.c.bf16 %v653_v40, %v649_v14  ;;  %v915_v11 = vld [vmem:[#allocation4 + $0xe68] sm:$0xff]  ;;  %v668_v35 = vld [vmem:[#allocation4 + $0x6b0] sm:$0xff]  ;;  %v918_v48 = vld [vmem:[#allocation4 + $0xe80] sm:$0xff] }
 0x143   : > { %1446 = vmatprep.mubr.f32.mxu0 %v355_v15  ;;  %3248 = vmatpush1.bf16.msra.mxu0 %v3247_v36  ;;  %v370_v15 = vld [vmem:[%s4594_s10 + $0x220] sm:$0xff]  ;;  %v3259_v36 = vpack.c.bf16 %v906_v10, %v902_v6  ;;  %v923_v37 = vld [vmem:[#allocation4 + $0xea8] sm:$0xff]  ;;  %v673_v14 = vld [vmem:[#allocation4 + $0x6d8] sm:$0xff] }
 0x144   : > { %1805 = vmatmul.mubr.f32.gmra.mrb[50].mxu1 %v4674_v54  ;;  %3250 = vmatprep.subr.bf16.mxu0 %v3249_v27  ;;  %v648_v54 = vld [vmem:[#allocation4 + $0x610] sm:$0xff]  ;;  %v910_v27 = vld [vmem:[#allocation4 + $0xe40] sm:$0xff]  ;;  %v677_v40 = vld [vmem:[#allocation4 + $0x6f8] sm:$0xff] }
 0x145   : > { %1810 = vmatprep.mubr.f32.mxu1 %v4678_v58  ;;  %3380 = vmatpush1.bf16.msra.mxu1 %v3379_v46  ;;  %v661_v58 = vld [vmem:[#allocation4 + $0x678] sm:$0xff]  ;;  %v3387_v23 = vpack.c.bf16 %v652_v2, %v648_v54  ;;  %v3393_v46 = vpack.c.bf16 %v669_v21, %v665_v26  ;;  %v931_v55 = vld [vmem:[#allocation4 + $0xee8] sm:$0xff]  ;;  %v386_v59 = vld [vmem:[%s4594_s10 + $0x2a0] sm:$0xff] }
 0x146   : > { %1447 = vmatmul.mubr.f32.gmra.mrb[12].mxu0 %v354_v47  ;;  %3382 = vmatprep.subr.bf16.mxu1 %v3381_v51  ;;  %v3389_v17 = vpack.c.bf16 %v661_v58, %v657_v4  ;;  %v387_v47 = vld [vmem:[%s4594_s10 + $0x2a8] sm:$0xff]  ;;  %v664_v51 = vld [vmem:[#allocation4 + $0x690] sm:$0xff]  ;;  %v930_v54 = vld [vmem:[#allocation4 + $0xee0] sm:$0xff] }
 0x147   : > { %1452 = vmatprep.mubr.f32.mxu0 %v363_v43  ;;  %3252 = vmatpush1.bf16.msra.mxu0 %v3251_v49  ;;  %v922_v49 = vld [vmem:[#allocation4 + $0xea0] sm:$0xff]  ;;  %v395_v60 = vld [vmem:[%s4594_s10 + $0x2e8] sm:$0xff]  ;;  %v3395_v61 = vpack.c.bf16 %v668_v35, %v664_v51  ;;  %v681_v2 = vld [vmem:[#allocation4 + $0x718] sm:$0xff] }
 0x148   : > { %1811 = vmatmul.mubr.f32.gmra.mrb[52].mxu1 %v4684_v8  ;;  %3254 = vmatprep.subr.bf16.mxu0 %v3253_v53  ;;  %v656_v8 = vld [vmem:[#allocation4 + $0x650] sm:$0xff]  ;;  %v927_v53 = vld [vmem:[#allocation4 + $0xec8] sm:$0xff]  ;;  %v402_v26 = vld [vmem:[%s4594_s10 + $0x320] sm:$0xff] }
 0x149   : > { %1816 = vmatprep.mubr.f32.mxu1 %v4688_v12  ;;  %3384 = vmatpush1.bf16.msra.mxu1 %v3383_v0  ;;  %v3261_v12 = vpack.c.bf16 %v915_v11, %v911_v31  ;;  %v3391_v43 = vpack.c.bf16 %v660_v24, %v656_v8  ;;  %v676_v0 = vld [vmem:[#allocation4 + $0x6f0] sm:$0xff]  ;;  %v935_v4 = vld [vmem:[#allocation4 + $0xf08] sm:$0xff]  ;;  %v693_v8 = vld [vmem:[#allocation4 + $0x778] sm:$0xff] }
 0x14a   : > { %1453 = vmatmul.mubr.f32.gmra.mrb[14].mxu0 %v362_v22  ;;  %3386 = vmatprep.subr.bf16.mxu1 %v3385_v1  ;;  %v3267_v22 = vpack.c.bf16 %v922_v49, %v918_v48  ;;  %v926_v1 = vld [vmem:[#allocation4 + $0xec0] sm:$0xff]  ;;  %v939_v58 = vld [vmem:[#allocation4 + $0xf28] sm:$0xff]  ;;  %v680_v11 = vld [vmem:[#allocation4 + $0x710] sm:$0xff] }
 0x14b   : > { %1458 = vmatprep.mubr.f32.mxu0 %v371_v63  ;;  %3256 = vmatpush1.bf16.msra.mxu0 %v3255_v3  ;;  %v672_v63 = vld [vmem:[#allocation4 + $0x6d0] sm:$0xff]  ;;  %v685_v3 = vld [vmem:[#allocation4 + $0x738] sm:$0xff]  ;;  %v403_v6 = vld [vmem:[%s4594_s10 + $0x328] sm:$0xff]  ;;  %v3271_v31 = vpack.c.bf16 %v930_v54, %v926_v1 }
 0x14c   : > { %1817 = vmatmul.mubr.f32.gmra.mrb[54].mxu1 %v4694_v29  ;;  %3258 = vmatprep.subr.bf16.mxu0 %v3257_v5  ;;  %v3263_v29 = vpack.c.bf16 %v914_v16, %v910_v27  ;;  %v394_v5 = vld [vmem:[%s4594_s10 + $0x2e0] sm:$0xff]  ;;  %v3399_v10 = vpack.c.bf16 %v676_v0, %v672_v63  ;;  %v943_v24 = vld [vmem:[#allocation4 + $0xf48] sm:$0xff]  ;;  %v688_v16 = vld [vmem:[#allocation4 + $0x750] sm:$0xff] }
 0x14d   : > { %1822 = vmatprep.mubr.f32.mxu1 %v4698_v34  ;;  %3388 = vmatpush1.bf16.msra.mxu1 %v3387_v23  ;;  %v3265_v34 = vpack.c.bf16 %v923_v37, %v919_v30  ;;  %v938_v23 = vld [vmem:[#allocation4 + $0xf20] sm:$0xff]  ;;  %v692_v30 = vld [vmem:[#allocation4 + $0x770] sm:$0xff]  ;;  %v419_v35 = vld [vmem:[%s4594_s10 + $0x3a8] sm:$0xff] }
 0x14e   : > { %1459 = vmatmul.mubr.f32.gmra.mrb[16].mxu0 %v370_v15  ;;  %3390 = vmatprep.subr.bf16.mxu1 %v3389_v17  ;;  %v684_v15 = vld [vmem:[#allocation4 + $0x730] sm:$0xff]  ;;  %v689_v17 = vld [vmem:[#allocation4 + $0x758] sm:$0xff]  ;;  %v942_v37 = vld [vmem:[#allocation4 + $0xf40] sm:$0xff]  ;;  %v3407_v48 = vpack.c.bf16 %v692_v30, %v688_v16 }
 0x14f   : > { %1464 = vmatprep.mubr.f32.mxu0 %v379_v20  ;;  %3260 = vmatpush1.bf16.msra.mxu0 %v3259_v36  ;;  %v934_v20 = vld [vmem:[#allocation4 + $0xf00] sm:$0xff]  ;;  %v947_v36 = vld [vmem:[#allocation4 + $0xf68] sm:$0xff]  ;;  %v3403_v21 = vpack.c.bf16 %v684_v15, %v680_v11  ;;  %v696_v49 = vld [vmem:[#allocation4 + $0x790] sm:$0xff] }
 0x150   : > { %1823 = vmatmul.mubr.f32.gmra.mrb[56].mxu1 %v4704_v50  ;;  %3262 = vmatprep.subr.bf16.mxu0 %v3261_v12  ;;  %v3397_v50 = vpack.c.bf16 %v677_v40, %v673_v14  ;;  %v411_v12 = vld [vmem:[%s4594_s10 + $0x368] sm:$0xff]  ;;  %v3275_v27 = vpack.c.bf16 %v938_v23, %v934_v20  ;;  %v410_v51 = vld [vmem:[%s4594_s10 + $0x360] sm:$0xff]  ;;  %v700_v14 = vld [vmem:[#allocation4 + $0x7b0] sm:$0xff] }
 0x151   : > { %1828 = vmatprep.mubr.f32.mxu1 %v4708_v56  ;;  %3392 = vmatpush1.bf16.msra.mxu1 %v3391_v43  ;;  %v3269_v56 = vpack.c.bf16 %v931_v55, %v927_v53  ;;  %v701_v43 = vld [vmem:[#allocation4 + $0x7b8] sm:$0xff]  ;;  %v950_v40 = vld [vmem:[#allocation4 + $0xf80] sm:$0xff]  ;;  %v3411_v63 = vpack.c.bf16 %v700_v14, %v696_v49  ;;  %v708_v54 = vld [vmem:[#allocation4 + $0x7f0] sm:$0xff] }
 0x152   : > { %1465 = vmatmul.mubr.f32.gmra.mrb[18].mxu0 %v378_v41  ;;  %3394 = vmatprep.subr.bf16.mxu1 %v3393_v46  ;;  %v946_v41 = vld [vmem:[#allocation4 + $0xf60] sm:$0xff]  ;;  %v951_v46 = vld [vmem:[#allocation4 + $0xf88] sm:$0xff]  ;;  %v705_v55 = vld [vmem:[#allocation4 + $0x7d8] sm:$0xff] }
 0x153   : > { %1470 = vmatprep.mubr.f32.mxu0 %v387_v47  ;;  %3264 = vmatpush1.bf16.msra.mxu0 %v3263_v29  ;;  %v697_v47 = vld [vmem:[#allocation4 + $0x798] sm:$0xff]  ;;  %v955_v29 = vld [vmem:[#allocation4 + $0xfa8] sm:$0xff]  ;;  %v954_v53 = vld [vmem:[#allocation4 + $0xfa0] sm:$0xff] }
 0x154   : > { %1829 = vmatmul.mubr.f32.gmra.mrb[58].mxu1 %v4714_v7  ;;  %3266 = vmatprep.subr.bf16.mxu0 %v3265_v34  ;;  %v3401_v7 = vpack.c.bf16 %v685_v3, %v681_v2  ;;  %v3279_v34 = vpack.c.bf16 %v946_v41, %v942_v37  ;;  %v3283_v0 = vpack.c.bf16 %v954_v53, %v950_v40  ;;  %v958_v1 = vld [vmem:[#allocation4 + $0xfc0] sm:$0xff]  ;;  %v713_v3 = vld [vmem:[#allocation4 + $0x818] sm:$0xff]  ;;  %v712_v11 = vld [vmem:[#allocation4 + $0x810] sm:$0xff] }
 0x155   : > { %1834 = vmatprep.mubr.f32.mxu1 %v4718_v13  ;;  %3396 = vmatpush1.bf16.msra.mxu1 %v3395_v61  ;;  %v3273_v13 = vpack.c.bf16 %v939_v58, %v935_v4  ;;  %v963_v61 = vld [vmem:[#allocation4 + $0xfe8] sm:$0xff]  ;;  %v962_v2 = vld [vmem:[#allocation4 + $0xfe0] sm:$0xff]  ;;  %v717_v4 = vld [vmem:[#allocation4 + $0x838] sm:$0xff] }
 0x156   : > { %1471 = vmatmul.mubr.f32.gmra.mrb[20].mxu0 %v386_v59  ;;  %3398 = vmatprep.subr.bf16.mxu1 %v3397_v50  ;;  %v709_v59 = vld [vmem:[#allocation4 + $0x7f8] sm:$0xff]  ;;  %v427_v50 = vld [vmem:[%s4594_s10 + $0x3e8] sm:$0xff]  ;;  %v426_v58 = vld [vmem:[%s4594_s10 + $0x3e0] sm:$0xff] }
 0x157   : > { %1476 = vmatprep.mubr.f32.mxu0 %v395_v60  ;;  %3268 = vmatpush1.bf16.msra.mxu0 %v3267_v22  ;;  %v959_v60 = vld [vmem:[#allocation4 + $0xfc8] sm:$0xff]  ;;  %v418_v22 = vld [vmem:[%s4594_s10 + $0x3a0] sm:$0xff]  ;;  %v716_v15 = vld [vmem:[#allocation4 + $0x830] sm:$0xff] }
 0x158   : > { %1835 = vmatmul.mubr.f32.gmra.mrb[60].mxu1 %v4724_v32  ;;  %3270 = vmatprep.subr.bf16.mxu0 %v3269_v56  ;;  %v3405_v32 = vpack.c.bf16 %v693_v8, %v689_v17  ;;  %v704_v56 = vld [vmem:[#allocation4 + $0x7d0] sm:$0xff]  ;;  %v725_v20 = vld [vmem:[#allocation4 + $0x878] sm:$0xff] }
 0x159   : > { %1840 = vmatprep.mubr.f32.mxu1 %v4728_v39  ;;  %3400 = vmatpush1.bf16.msra.mxu1 %v3399_v10  ;;  %v3277_v39 = vpack.c.bf16 %v947_v36, %v943_v24  ;;  %v3287_v10 = vpack.c.bf16 %v962_v2, %v958_v1  ;;  %v308_v23 = vld [vmem:[%s4594_s10 + $0x30] sm:$0xff]  ;;  %v317_v8 = vld [vmem:[%s4594_s10 + $0x78] sm:$0xff] }
 0x15a   : > { %1477 = vmatmul.mubr.f32.gmra.mrb[22].mxu0 %v394_v5  ;;  %3402 = vmatprep.subr.bf16.mxu1 %v3401_v7  ;;  %v3415_v5 = vpack.c.bf16 %v708_v54, %v704_v56  ;;  %v451_v7 = vld [vmem:[%s4594_s10 + $0x4a8] sm:$0xff]  ;;  %v724_v17 = vld [vmem:[#allocation4 + $0x870] sm:$0xff]  ;;  %v737_v41 = vld [vmem:[#allocation4 + $0x8d8] sm:$0xff] }
 0x15b   : > { %1482 = vmatprep.mubr.f32.mxu0 %v403_v6  ;;  %3272 = vmatpush1.bf16.msra.mxu0 %v3271_v31  ;;  %v435_v6 = vld [vmem:[%s4594_s10 + $0x428] sm:$0xff]  ;;  %v4092_v36 = vld [vmem:[%s4594_s10 + $0x10] sm:$0xff]  ;;  %v745_v49 = vld [vmem:[#allocation4 + $0x918] sm:$0xff] }
 0x15c   : > { %1841 = vmatmul.mubr.f32.gmra.mrb[62].mxu1 %v4734_v57  ;;  %3274 = vmatprep.subr.bf16.mxu0 %v3273_v13  ;;  %v3409_v57 = vpack.c.bf16 %v701_v43, %v697_v47  ;;  %v443_v31 = vld [vmem:[%s4594_s10 + $0x468] sm:$0xff]  ;;  %v4091_v13 = vld [vmem:[%s4594_s10 + $0x18] sm:$0xff]  ;;  %v728_v30 = vld [vmem:[#allocation4 + $0x890] sm:$0xff] }
 0x15d   : > { %1846 = vmatprep.mubr.f32.mxu1 %v4738_v62  ;;  %3404 = vmatpush1.bf16.msra.mxu1 %v3403_v21  ;;  %v3281_v62 = vpack.c.bf16 %v955_v29, %v951_v46  ;;  %v4093_v21 = vld [vmem:[%s4594_s10 + $0x58] sm:$0xff]  ;;  %v732_v37 = vld [vmem:[#allocation4 + $0x8b0] sm:$0xff] }
 0x15e   : > { %1483 = vmatmul.mubr.f32.gmra.mrb[24].mxu0 %v402_v26  ;;  %3406 = vmatprep.subr.bf16.mxu1 %v3405_v32  ;;  %v729_v26 = vld [vmem:[#allocation4 + $0x898] sm:$0xff]  ;;  %v4891_v46 = vld [vmem:[%s4594_s10 + $0xb0] sm:$0xff]  ;;  %v3427_v29 = vpack.c.bf16 %v732_v37, %v728_v30 }
 0x15f   : > { %1488 = vmatprep.mubr.f32.mxu0 %v411_v12  ;;  %3276 = vmatpush1.bf16.msra.mxu0 %v3275_v27  ;;  %v4881_v27 = vld [vmem:[%s4594_s10 + $0x70] sm:$0xff]  ;;  %v4884_v32 = vld [vmem:[%s4594_s10 + $0xb8] sm:$0xff] }
 0x160   : > { %1847 = vmatmul.mubr.f32.gmra.mrb[64].mxu1 %v4744_v19  ;;  %3278 = vmatprep.subr.bf16.mxu0 %v3277_v39  ;;  %v3413_v19 = vpack.c.bf16 %v709_v59, %v705_v55  ;;  %v4094_v39 = vld [vmem:[%s4594_s10 + $0x50] sm:$0xff]  ;;  %v741_v47 = vld [vmem:[#allocation4 + $0x8f8] sm:$0xff] }
 0x161   : > { %1852 = vmatprep.mubr.f32.mxu1 %v4748_v25  ;;  %3408 = vmatpush1.bf16.msra.mxu1 %v3407_v48  ;;  %v3285_v25 = vpack.c.bf16 %v963_v61, %v959_v60  ;;  %v4095_v43 = vld [vmem:[%s4594_s10 + $0x98] sm:$0xff]  ;;  %v736_v48 = vld [vmem:[#allocation4 + $0x8d0] sm:$0xff] }
 0x162   : > { %1489 = vmatmul.mubr.f32.gmra.mrb[26].mxu0 %v410_v51  ;;  %3410 = vmatprep.subr.bf16.mxu1 %v3409_v57  ;;  %v4894_v51 = vld [vmem:[%s4594_s10 + $0xf8] sm:$0xff]  ;;  %v4096_v57 = vld [vmem:[%s4594_s10 + $0x90] sm:$0xff] }
 0x163   : > { %1494 = vmatprep.mubr.f32.mxu0 %v419_v35  ;;  %3280 = vmatpush1.bf16.msra.mxu0 %v3279_v34  ;;  %v3429_v35 = vpack.c.bf16 %v741_v47, %v737_v41  ;;  %v740_v34 = vld [vmem:[#allocation4 + $0x8f0] sm:$0xff]  ;;  %v749_v14 = vld [vmem:[#allocation4 + $0x938] sm:$0xff]  ;;  %v5443_v41 = vmov 0.0|0.0  }
 0x164   : > { %1853 = vmatmul.mubr.f32.gmra.mrb[66].mxu1 %v4754_v45  ;;  %3282 = vmatprep.subr.bf16.mxu0 %v3281_v62  ;;  %v3417_v45 = vpack.c.bf16 %v717_v4, %v713_v3  ;;  %v4097_v40 = vld [vmem:[%s4594_s10 + $0xd8] sm:$0xff]  ;;  %v4901_v62 = vld [vmem:[%s4594_s10 + $0xf0] sm:$0xff]  ;;  %v3431_v53 = vpack.c.bf16 %v740_v34, %v736_v48  ;;  %v3433_v59 = vpack.c.bf16 %v749_v14, %v745_v49 }
 0x165   : > { %1858 = vmatprep.mubr.f32.mxu1 %v4758_v52  ;;  %3412 = vmatpush1.bf16.msra.mxu1 %v3411_v63  ;;  %v434_v52 = vld [vmem:[%s4594_s10 + $0x420] sm:$0xff]  ;;  %v4904_v55 = vld [vmem:[%s4594_s10 + $0x138] sm:$0xff]  ;;  %v744_v60 = vld [vmem:[#allocation4 + $0x910] sm:$0xff] }
 0x166   : > { %1495 = vmatmul.mubr.f32.gmra.mrb[28].mxu0 %v418_v22  ;;  %3414 = vmatprep.subr.bf16.mxu1 %v3413_v19  ;;  %v748_v61 = vld [vmem:[#allocation4 + $0x930] sm:$0xff]  ;;  %v757_v63 = vld [vmem:[#allocation4 + $0x978] sm:$0xff] }
 0x167   : > { %1500 = vmatprep.mubr.f32.mxu0 %v427_v50  ;;  %3284 = vmatpush1.bf16.msra.mxu0 %v3283_v0  ;;  %v4098_v22 = vld [vmem:[%s4594_s10 + $0xd0] sm:$0xff]  ;;  %v753_v50 = vld [vmem:[#allocation4 + $0x958] sm:$0xff]  ;;  %v3435_v1 = vpack.c.bf16 %v748_v61, %v744_v60 }
 0x168   : > { %1859 = vmatmul.mubr.f32.gmra.mrb[68].mxu1 %v4764_v9  ;;  %3286 = vmatprep.subr.bf16.mxu0 %v3285_v25  ;;  %v442_v9 = vld [vmem:[%s4594_s10 + $0x460] sm:$0xff]  ;;  %v4099_v0 = vld [vmem:[%s4594_s10 + $0x118] sm:$0xff]  ;;  %v4911_v19 = vld [vmem:[%s4594_s10 + $0x130] sm:$0xff]  ;;  %v3437_v54 = vpack.c.bf16 %v757_v63, %v753_v50 }
 0x169   : > { %1864 = vmatprep.mubr.f32.mxu1 %v4768_v18  ;;  %3416 = vmatpush1.bf16.msra.mxu1 %v3415_v5  ;;  %v450_v18 = vld [vmem:[%s4594_s10 + $0x4a0] sm:$0xff]  ;;  %v4914_v56 = vld [vmem:[%s4594_s10 + $0x178] sm:$0xff]  ;;  %v752_v25 = vld [vmem:[#allocation4 + $0x950] sm:$0xff] }
 0x16a   : > { %1501 = vmatmul.mubr.f32.gmra.mrb[30].mxu0 %v426_v58  ;;  %3418 = vmatprep.subr.bf16.mxu1 %v3417_v45  ;;  %v756_v2 = vld [vmem:[#allocation4 + $0x970] sm:$0xff]  ;;  %v761_v4 = vld [vmem:[#allocation4 + $0x998] sm:$0xff] }
 0x16b   : > { %1506 = vmatprep.mubr.f32.mxu0 %v435_v6  ;;  %3288 = vmatpush1.bf16.msra.mxu0 %v3287_v10  ;;  %v4100_v3 = vld [vmem:[%s4594_s10 + $0x110] sm:$0xff]  ;;  %v765_v58 = vld [vmem:[#allocation4 + $0x9b8] sm:$0xff]  ;;  %v3439_v10 = vpack.c.bf16 %v756_v2, %v752_v25 }
 0x16c   : > { %1865 = vmatmul.mubr.f32.gmra.mrb[70].mxu1 %v4774_v28  ;;  %v309_v28 = vld [vmem:[%s4594_s10 + $0x38] sm:$0xff]  ;;  %v4921_v6 = vld [vmem:[%s4594_s10 + $0x170] sm:$0xff]  ;;  %3545 = vmatprep.subr.bf16.mxu0 %v5443_v41 }
 0x16d   : > { %1870 = vmatprep.mubr.f32.mxu1 %v4778_v33  ;;  %v721_v33 = vld [vmem:[#allocation4 + $0x858] sm:$0xff]  ;;  %v776_v37 = vld [vmem:[#allocation4 + $0xa10] sm:$0xff] }
 0x16e   : > { %1507 = vmatmul.mubr.f32.gmra.mrb[32].mxu0 %v434_v52  ;;  %v3421_v24 = vpack.c.bf16 %v725_v20, %v721_v33  ;;  %v4101_v5 = vld [vmem:[%s4594_s10 + $0x158] sm:$0xff]  ;;  %v3441_v52 = vpack.c.bf16 %v765_v58, %v761_v4  ;;  %v4106_v47 = vld [vmem:[%s4594_s10 + $0x1d0] sm:$0xff] }
 0x16f   : > { %1512 = vmatprep.mubr.f32.mxu0 %v443_v31  ;;  %v4924_v45 = vld [vmem:[%s4594_s10 + $0x1b8] sm:$0xff]  ;;  %v760_v31 = vld [vmem:[#allocation4 + $0x990] sm:$0xff] }
 0x170   : > { %1871 = vmatmul.mubr.f32.gmra.mrb[72].mxu1 %v4784_v38  ;;  %v3419_v38 = vpack.c.bf16 %v716_v15, %v712_v11  ;;  %v773_v11 = vld [vmem:[#allocation4 + $0x9f8] sm:$0xff]  ;;  %v788_v60 = vld [vmem:[#allocation4 + $0xa70] sm:$0xff] }
 0x171   : > { %1876 = vmatprep.mubr.f32.mxu1 %v4788_v42  ;;  %v720_v42 = vld [vmem:[#allocation4 + $0x850] sm:$0xff]  ;;  %v4103_v15 = vld [vmem:[%s4594_s10 + $0x198] sm:$0xff] }
 0x172   : > { %1513 = vmatmul.mubr.f32.gmra.mrb[34].mxu0 %v442_v9  ;;  %v3423_v12 = vpack.c.bf16 %v724_v17, %v720_v42  ;;  %v764_v9 = vld [vmem:[#allocation4 + $0x9b0] sm:$0xff]  ;;  %v4934_v20 = vld [vmem:[%s4594_s10 + $0x1f8] sm:$0xff] }
 0x173   : > { %1518 = vmatprep.mubr.f32.mxu0 %v451_v7  ;;  %v4102_v7 = vld [vmem:[%s4594_s10 + $0x150] sm:$0xff]  ;;  %v3443_v33 = vpack.c.bf16 %v764_v9, %v760_v31  ;;  %v777_v17 = vld [vmem:[#allocation4 + $0xa18] sm:$0xff] }
 0x174   : > { %1877 = vmatmul.mubr.f32.gmra.mrb[74].mxu1 %v4794_v44  ;;  %v733_v44 = vld [vmem:[#allocation4 + $0x8b8] sm:$0xff]  ;;  %v4104_v42 = vld [vmem:[%s4594_s10 + $0x190] sm:$0xff] }
 0x175   : > { %1947 = vmatprep.mubr.f32.mxu1 %v4091_v13  ;;  %v3425_v16 = vpack.c.bf16 %v733_v44, %v729_v26  ;;  %v2497_v26 = vld [vmem:[#allocation7 + $0x8] sm:$0xff]  ;;  %v2498_v48 = vld [vmem:[#allocation7 + $0x10] sm:$0xff]  ;;  %v2499_v34 = vld [vmem:[#allocation7 + $0x18] sm:$0xff] }
 0x176   : > { %1519 = vmatmul.mubr.f32.gmra.mrb[36].mxu0 %v450_v18  ;;  %v769_v18 = vld [vmem:[#allocation4 + $0x9d8] sm:$0xff]  ;;  %v4941_v44 = vld [vmem:[%s4594_s10 + $0x1f0] sm:$0xff]  ;;  %v3549_v14 = vpack.c.bf16 %v2499_v34, %v2498_v48 }
 0x177   : > { %1589 = vmatprep.mubr.f32.mxu0 %v309_v28  ;;  %v4931_v28 = vld [vmem:[%s4594_s10 + $0x1b0] sm:$0xff]  ;;  %v3445_v13 = vpack.c.bf16 %v773_v11, %v769_v18  ;;  %v797_v50 = vld [vmem:[#allocation4 + $0xab8] sm:$0xff] }
 0x178   : > { %1948 = vmatmul.mubr.f32.vlgmr.msra.gmra.mrb[38].mxu1 %v4092_v36  ;;  %v2496_v36 = vld [vmem:[#allocation7] sm:$0xff]  ;;  %v4108_v61 = vld [vmem:[%s4594_s10 + $0x210] sm:$0xff]  ;;  %v4109_v63 = vld [vmem:[%s4594_s10 + $0x258] sm:$0xff] }
 0x179   : > { %3420 = vmatpush1.bf16.msra.mxu1 %v3419_v38  ;;  %1953 = vmatprep.mubr.f32.mxu1 %v4093_v21  ;;  %v768_v38 = vld [vmem:[#allocation4 + $0x9d0] sm:$0xff]  ;;  %v3546_v21 = vpack.c.bf16 %v2497_v26, %v2496_v36  ;;  %v805_v31 = vld [vmem:[#allocation4 + $0xaf8] sm:$0xff]  ;;  %v2504_v26 = vld [vmem:[#allocation7 + $0x40] sm:$0xff] }
 0x17a   : > { %1590 = vmatmul.mubr.f32.vlgmr.msra.gmra.mrb[0].mxu0 %v308_v23  ;;  %3422 = vmatprep.subr.bf16.mxu1 %v3421_v24  ;;  %v772_v23 = vld [vmem:[#allocation4 + $0x9f0] sm:$0xff]  ;;  %v4105_v24 = vld [vmem:[%s4594_s10 + $0x1d8] sm:$0xff] }
 0x17b   : > { %1595 = vmatprep.mubr.f32.mxu0 %v317_v8  ;;  %v781_v8 = vld [vmem:[#allocation4 + $0xa38] sm:$0xff]  ;;  %3547 = vmatpush1.bf16.msra.mxu0 %v3546_v21  ;;  %v792_v58 = vld [vmem:[#allocation4 + $0xa90] sm:$0xff] }
 0x17c   : > { %1954 = vmatmul.mubr.f32.gmra.mrb[40].mxu1 %v4094_v39  ;;  %v3449_v30 = vpack.c.bf16 %v781_v8, %v777_v17  ;;  %v780_v39 = vld [vmem:[#allocation4 + $0xa30] sm:$0xff]  ;;  %3548 = vmatprep.subr.bf16.mxu0 %v5443_v41  ;;  %v4111_v9 = vld [vmem:[%s4594_s10 + $0x298] sm:$0xff] }
 0x17d   : > { %3424 = vmatpush1.bf16.msra.mxu1 %v3423_v12  ;;  %1959 = vmatprep.mubr.f32.mxu1 %v4095_v43  ;;  %v3447_v12 = vpack.c.bf16 %v772_v23, %v768_v38  ;;  %v785_v43 = vld [vmem:[#allocation4 + $0xa58] sm:$0xff]  ;;  %v3451_v49 = vpack.c.bf16 %v780_v39, %v776_v37  ;;  %v4974_v11 = vld [vmem:[%s4594_s10 + $0x2b0] sm:$0xff] }
 0x17e   : > { %1596 = vmatmul.mubr.f32.gmra.mrb[2].mxu0 %v4881_v27  ;;  %3426 = vmatprep.subr.bf16.mxu1 %v3425_v16  ;;  %v4944_v16 = vld [vmem:[%s4594_s10 + $0x238] sm:$0xff]  ;;  %v800_v23 = vld [vmem:[#allocation4 + $0xad0] sm:$0xff] }
 0x17f   : > { %1601 = vmatprep.mubr.f32.mxu0 %v4884_v32  ;;  %3550 = vmatpush1.bf16.msra.mxu0 %v3549_v14  ;;  %v2503_v18 = vld [vmem:[#allocation7 + $0x38] sm:$0xff]  ;;  %v4112_v17 = vld [vmem:[%s4594_s10 + $0x290] sm:$0xff] }
 0x180   : > { %1960 = vmatmul.mubr.f32.gmra.mrb[42].mxu1 %v4096_v57  ;;  %v4952_v57 = vld [vmem:[%s4594_s10 + $0x230] sm:$0xff]  ;;  %3551 = vmatprep.subr.bf16.mxu0 %v5443_v41  ;;  %v809_v8 = vld [vmem:[#allocation4 + $0xb18] sm:$0xff] }
 0x181   : > { %1965 = vmatprep.mubr.f32.mxu1 %v4097_v40  ;;  %3428 = vmatpush1.bf16.msra.mxu1 %v3427_v29  ;;  %v789_v29 = vld [vmem:[#allocation4 + $0xa78] sm:$0xff]  ;;  %v4985_v21 = vld [vmem:[%s4594_s10 + $0x2f0] sm:$0xff] }
 0x182   : > { %1602 = vmatmul.mubr.f32.gmra.mrb[4].mxu0 %v4891_v46  ;;  %3430 = vmatprep.subr.bf16.mxu1 %v3429_v35  ;;  %v4107_v35 = vld [vmem:[%s4594_s10 + $0x218] sm:$0xff] }
 0x183   : > { %1607 = vmatprep.mubr.f32.mxu0 %v4894_v51  ;;  %v4955_v40 = vld [vmem:[%s4594_s10 + $0x278] sm:$0xff] }
 0x184   : > { %1966 = vmatmul.mubr.f32.gmra.mrb[44].mxu1 %v4098_v22  ;;  %v793_v22 = vld [vmem:[#allocation4 + $0xa98] sm:$0xff] }
 0x185   : > { %1971 = vmatprep.mubr.f32.mxu1 %v4099_v0  ;;  %3432 = vmatpush1.bf16.msra.mxu1 %v3431_v53  ;;  %v3453_v53 = vpack.c.bf16 %v789_v29, %v785_v43  ;;  %v2500_v0 = vld [vmem:[#allocation7 + $0x20] sm:$0xff]  ;;  %v3457_v4 = vpack.c.bf16 %v797_v50, %v793_v22  ;;  %v4113_v36 = vld [vmem:[%s4594_s10 + $0x2d8] sm:$0xff]  ;;  %v808_v43 = vld [vmem:[#allocation4 + $0xb10] sm:$0xff] }
 0x186   : > { %1608 = vmatmul.mubr.f32.gmra.mrb[6].mxu0 %v4901_v62  ;;  %3434 = vmatprep.subr.bf16.mxu1 %v3433_v59  ;;  %v784_v59 = vld [vmem:[#allocation4 + $0xa50] sm:$0xff]  ;;  %v4988_v39 = vld [vmem:[%s4594_s10 + $0x338] sm:$0xff] }
 0x187   : > { %1613 = vmatprep.mubr.f32.mxu0 %v4904_v55  ;;  %v3455_v25 = vpack.c.bf16 %v788_v60, %v784_v59  ;;  %v812_v29 = vld [vmem:[#allocation4 + $0xb30] sm:$0xff]  ;;  %v817_v48 = vld [vmem:[#allocation4 + $0xb58] sm:$0xff] }
 0x188   : > { %1972 = vmatmul.mubr.f32.gmra.mrb[46].mxu1 %v4100_v3  ;;  %v4966_v3 = vld [vmem:[%s4594_s10 + $0x2b8] sm:$0xff]  ;;  %v4996_v59 = vld [vmem:[%s4594_s10 + $0x330] sm:$0xff]  ;;  %v3467_v60 = vpack.c.bf16 %v812_v29, %v808_v43 }
 0x189   : > { %1977 = vmatprep.mubr.f32.mxu1 %v4101_v5  ;;  %3436 = vmatpush1.bf16.msra.mxu1 %v3435_v1  ;;  %v2501_v1 = vld [vmem:[#allocation7 + $0x28] sm:$0xff]  ;;  %v821_v34 = vld [vmem:[#allocation4 + $0xb78] sm:$0xff] }
 0x18a   : > { %1614 = vmatmul.mubr.f32.gmra.mrb[8].mxu0 %v4911_v19  ;;  %3438 = vmatprep.subr.bf16.mxu1 %v3437_v54  ;;  %v4963_v54 = vld [vmem:[%s4594_s10 + $0x270] sm:$0xff]  ;;  %v3552_v2 = vpack.c.bf16 %v2501_v1, %v2500_v0  ;;  %v4999_v22 = vld [vmem:[%s4594_s10 + $0x378] sm:$0xff]  ;;  %v3469_v50 = vpack.c.bf16 %v821_v34, %v817_v48  ;;  %v2512_v34 = vld [vmem:[#allocation7 + $0x80] sm:$0xff] }
 0x18b   : > { %1619 = vmatprep.mubr.f32.mxu0 %v4914_v56  ;;  %v796_v5 = vld [vmem:[#allocation4 + $0xab0] sm:$0xff]  ;;  %v841_v29 = vld [vmem:[#allocation4 + $0xc18] sm:$0xff] }
 0x18c   : > { %1978 = vmatmul.mubr.f32.gmra.mrb[48].mxu1 %v4102_v7  ;;  %3553 = vmatpush1.bf16.msra.mxu0 %v3552_v2  ;;  %v2502_v7 = vld [vmem:[#allocation7 + $0x30] sm:$0xff] }
 0x18d   : > { %1983 = vmatprep.mubr.f32.mxu1 %v4103_v15  ;;  %3440 = vmatpush1.bf16.msra.mxu1 %v3439_v10  ;;  %v4110_v10 = vld [vmem:[%s4594_s10 + $0x250] sm:$0xff]  ;;  %v3459_v15 = vpack.c.bf16 %v796_v5, %v792_v58  ;;  %v829_v2 = vld [vmem:[#allocation4 + $0xbb8] sm:$0xff]  ;;  %v2508_v58 = vld [vmem:[#allocation7 + $0x60] sm:$0xff] }
 0x18e   : > { %1620 = vmatmul.mubr.f32.gmra.mrb[10].mxu0 %v4921_v6  ;;  %3442 = vmatprep.subr.bf16.mxu1 %v3441_v52  ;;  %v801_v52 = vld [vmem:[#allocation4 + $0xad8] sm:$0xff]  ;;  %v820_v0 = vld [vmem:[#allocation4 + $0xb70] sm:$0xff] }
 0x18f   : > { %1625 = vmatprep.mubr.f32.mxu0 %v4924_v45  ;;  %v3461_v38 = vpack.c.bf16 %v805_v31, %v801_v52  ;;  %3554 = vmatprep.subr.bf16.mxu0 %v5443_v41  ;;  %v2506_v14 = vld [vmem:[#allocation7 + $0x50] sm:$0xff]  ;;  %v2509_v5 = vld [vmem:[#allocation7 + $0x68] sm:$0xff] }
 0x190   : > { %1984 = vmatmul.mubr.f32.gmra.mrb[50].mxu1 %v4104_v42  ;;  %v804_v42 = vld [vmem:[#allocation4 + $0xaf0] sm:$0xff]  ;;  %v3564_v31 = vpack.c.bf16 %v2509_v5, %v2508_v58  ;;  %v4121_v48 = vld [vmem:[%s4594_s10 + $0x3d8] sm:$0xff] }
 0x191   : > { %1989 = vmatprep.mubr.f32.mxu1 %v4105_v24  ;;  %3444 = vmatpush1.bf16.msra.mxu1 %v3443_v33  ;;  %v3555_v33 = vpack.c.bf16 %v2503_v18, %v2502_v7  ;;  %v813_v24 = vld [vmem:[#allocation4 + $0xb38] sm:$0xff]  ;;  %v4116_v1 = vld [vmem:[%s4594_s10 + $0x310] sm:$0xff] }
 0x192   : > { %1626 = vmatmul.mubr.f32.gmra.mrb[12].mxu0 %v4931_v28  ;;  %3446 = vmatprep.subr.bf16.mxu1 %v3445_v13  ;;  %v4977_v13 = vld [vmem:[%s4594_s10 + $0x2f8] sm:$0xff]  ;;  %v824_v18 = vld [vmem:[#allocation4 + $0xb90] sm:$0xff] }
 0x193   : > { %1631 = vmatprep.mubr.f32.mxu0 %v4934_v20  ;;  %3556 = vmatpush1.bf16.msra.mxu0 %v3555_v33  ;;  %v4118_v33 = vld [vmem:[%s4594_s10 + $0x350] sm:$0xff] }
 0x194   : > { %1990 = vmatmul.mubr.f32.gmra.mrb[52].mxu1 %v4106_v47  ;;  %v3465_v47 = vpack.c.bf16 %v813_v24, %v809_v8  ;;  %3557 = vmatprep.subr.bf16.mxu0 %v5443_v41  ;;  %v2511_v8 = vld [vmem:[#allocation7 + $0x78] sm:$0xff]  ;;  %v5018_v24 = vld [vmem:[%s4594_s10 + $0x3b0] sm:$0xff] }
 0x195   : > { %1995 = vmatprep.mubr.f32.mxu1 %v4107_v35  ;;  %3448 = vmatpush1.bf16.msra.mxu1 %v3447_v12  ;;  %v2505_v12 = vld [vmem:[#allocation7 + $0x48] sm:$0xff] }
 0x196   : > { %1632 = vmatmul.mubr.f32.gmra.mrb[14].mxu0 %v4941_v44  ;;  %3450 = vmatprep.subr.bf16.mxu1 %v3449_v30  ;;  %v3463_v30 = vpack.c.bf16 %v804_v42, %v800_v23  ;;  %v3558_v37 = vpack.c.bf16 %v2505_v12, %v2504_v26  ;;  %v4114_v35 = vld [vmem:[%s4594_s10 + $0x2d0] sm:$0xff]  ;;  %v837_v23 = vld [vmem:[#allocation4 + $0xbf8] sm:$0xff] }
 0x197   : > { %1637 = vmatprep.mubr.f32.mxu0 %v4944_v16  ;;  %v4119_v42 = vld [vmem:[%s4594_s10 + $0x398] sm:$0xff]  ;;  %v4120_v43 = vld [vmem:[%s4594_s10 + $0x390] sm:$0xff] }
 0x198   : > { %1996 = vmatmul.mubr.f32.gmra.mrb[54].mxu1 %v4108_v61  ;;  %3559 = vmatpush1.bf16.msra.mxu0 %v3558_v37  ;;  %v5021_v12 = vld [vmem:[%s4594_s10 + $0x3f8] sm:$0xff]  ;;  %v832_v37 = vld [vmem:[#allocation4 + $0xbd0] sm:$0xff] }
 0x199   : > { %2001 = vmatprep.mubr.f32.mxu1 %v4109_v63  ;;  %3452 = vmatpush1.bf16.msra.mxu1 %v3451_v49  ;;  %v4115_v49 = vld [vmem:[%s4594_s10 + $0x318] sm:$0xff]  ;;  %v816_v63 = vld [vmem:[#allocation4 + $0xb50] sm:$0xff] }
 0x19a   : > { %1638 = vmatmul.mubr.f32.gmra.mrb[16].mxu0 %v4952_v57  ;;  %3454 = vmatprep.subr.bf16.mxu1 %v3453_v53  ;;  %v2507_v53 = vld [vmem:[#allocation7 + $0x58] sm:$0xff]  ;;  %v3471_v52 = vpack.c.bf16 %v820_v0, %v816_v63  ;;  %v5044_v58 = vld [vmem:[%s4594_s10 + $0x430] sm:$0xff] }
 0x19b   : > { %1643 = vmatprep.mubr.f32.mxu0 %v4955_v40  ;;  %v3561_v61 = vpack.c.bf16 %v2507_v53, %v2506_v14  ;;  %3560 = vmatprep.subr.bf16.mxu0 %v5443_v41  ;;  %v5029_v14 = vld [vmem:[%s4594_s10 + $0x3f0] sm:$0xff] }
 0x19c   : > { %2002 = vmatmul.mubr.f32.gmra.mrb[56].mxu1 %v4110_v10  ;;  %v5007_v10 = vld [vmem:[%s4594_s10 + $0x370] sm:$0xff] }
 0x19d   : > { %2007 = vmatprep.mubr.f32.mxu1 %v4111_v9  ;;  %3456 = vmatpush1.bf16.msra.mxu1 %v3455_v25  ;;  %v825_v25 = vld [vmem:[#allocation4 + $0xb98] sm:$0xff] }
 0x19e   : > { %1644 = vmatmul.mubr.f32.gmra.mrb[18].mxu0 %v4963_v54  ;;  %3458 = vmatprep.subr.bf16.mxu1 %v3457_v4  ;;  %v4117_v4 = vld [vmem:[%s4594_s10 + $0x358] sm:$0xff]  ;;  %v3473_v7 = vpack.c.bf16 %v829_v2, %v825_v25 }
 0x19f   : > { %1649 = vmatprep.mubr.f32.mxu0 %v4966_v3  ;;  %3562 = vmatpush1.bf16.msra.mxu0 %v3561_v61  ;;  %v5010_v9 = vld [vmem:[%s4594_s10 + $0x3b8] sm:$0xff] }
 0x1a0   : > { %2008 = vmatmul.mubr.f32.gmra.mrb[58].mxu1 %v4112_v17  ;;  %3563 = vmatprep.subr.bf16.mxu0 %v5443_v41  ;;  %v2510_v17 = vld [vmem:[#allocation7 + $0x70] sm:$0xff] }
 0x1a1   : > { %2013 = vmatprep.mubr.f32.mxu1 %v4113_v36  ;;  %3460 = vmatpush1.bf16.msra.mxu1 %v3459_v15  ;;  %v828_v15 = vld [vmem:[#allocation4 + $0xbb0] sm:$0xff]  ;;  %v3567_v26 = vpack.c.bf16 %v2511_v8, %v2510_v17  ;;  %v4123_v25 = vld [vmem:[%s4594_s10 + $0x418] sm:$0xff] }
 0x1a2   : > { %1650 = vmatmul.mubr.f32.gmra.mrb[20].mxu0 %v4974_v11  ;;  %3462 = vmatprep.subr.bf16.mxu1 %v3461_v38  ;;  %v833_v38 = vld [vmem:[#allocation4 + $0xbd8] sm:$0xff]  ;;  %v3475_v36 = vpack.c.bf16 %v828_v15, %v824_v18  ;;  %v4124_v18 = vld [vmem:[%s4594_s10 + $0x410] sm:$0xff] }
 0x1a3   : > { %1655 = vmatprep.mubr.f32.mxu0 %v4977_v13  ;;  %3565 = vmatpush1.bf16.msra.mxu0 %v3564_v31  ;;  %v2514_v2 = vld [vmem:[#allocation7 + $0x90] sm:$0xff] }
 0x1a4   : > { %2014 = vmatmul.mubr.f32.gmra.mrb[60].mxu1 %v4114_v35  ;;  %3566 = vmatprep.subr.bf16.mxu0 %v5443_v41  ;;  %v845_v35 = vld [vmem:[#allocation4 + $0xc38] sm:$0xff] }
 0x1a5   : > { %2019 = vmatprep.mubr.f32.mxu1 %v4115_v49  ;;  %3464 = vmatpush1.bf16.msra.mxu1 %v3463_v30  ;;  %v3477_v30 = vpack.c.bf16 %v837_v23, %v833_v38  ;;  %v2513_v49 = vld [vmem:[#allocation7 + $0x88] sm:$0xff]  ;;  %v3481_v63 = vpack.c.bf16 %v845_v35, %v841_v29  ;;  %v5049_v31 = vld [vmem:[%s4594_s10 + $0x478] sm:$0xff] }
 0x1a6   : > { %1656 = vmatmul.mubr.f32.gmra.mrb[22].mxu0 %v4985_v21  ;;  %3466 = vmatprep.subr.bf16.mxu1 %v3465_v47  ;;  %v836_v47 = vld [vmem:[#allocation4 + $0xbf0] sm:$0xff]  ;;  %v4125_v15 = vld [vmem:[%s4594_s10 + $0x458] sm:$0xff] }
 0x1a7   : > { %1661 = vmatprep.mubr.f32.mxu0 %v4988_v39  ;;  %3568 = vmatpush1.bf16.msra.mxu0 %v3567_v26  ;;  %v3479_v53 = vpack.c.bf16 %v836_v47, %v832_v37  ;;  %v2517_v38 = vld [vmem:[#allocation7 + $0xa8] sm:$0xff]  ;;  %v5065_v8 = vld [vmem:[%s4594_s10 + $0x4b8] sm:$0xff] }
 0x1a8   : > { %2020 = vmatmul.mubr.f32.gmra.mrb[62].mxu1 %v4116_v1  ;;  %3569 = vmatprep.subr.bf16.mxu0 %v5443_v41  ;;  %v4122_v1 = vld [vmem:[%s4594_s10 + $0x3d0] sm:$0xff]  ;;  %v2519_v47 = vld [vmem:[#allocation7 + $0xb8] sm:$0xff] }
 0x1a9   : > { %2025 = vmatprep.mubr.f32.mxu1 %v4117_v4  ;;  %3468 = vmatpush1.bf16.msra.mxu1 %v3467_v60  ;;  %v3570_v60 = vpack.c.bf16 %v2513_v49, %v2512_v34  ;;  %v2515_v4 = vld [vmem:[#allocation7 + $0x98] sm:$0xff]  ;;  %v5059_v23 = vld [vmem:[%s4594_s10 + $0x470] sm:$0xff] }
 0x1aa   : > { %1662 = vmatmul.mubr.f32.gmra.mrb[24].mxu0 %v4996_v59  ;;  %3470 = vmatprep.subr.bf16.mxu1 %v3469_v50  ;;  %v5034_v50 = vld [vmem:[%s4594_s10 + $0x438] sm:$0xff]  ;;  %v3573_v5 = vpack.c.bf16 %v2515_v4, %v2514_v2  ;;  %v4126_v26 = vld [vmem:[%s4594_s10 + $0x450] sm:$0xff]  ;;  %v2520_v2 = vld [vmem:[#allocation7 + $0xc0] sm:$0xff] }
 0x1ab   : > { %1667 = vmatprep.mubr.f32.mxu0 %v4999_v22  ;;  %3571 = vmatpush1.bf16.msra.mxu0 %v3570_v60  ;;  %v2518_v37 = vld [vmem:[#allocation7 + $0xb0] sm:$0xff]  ;;  %v2521_v4 = vld [vmem:[#allocation7 + $0xc8] sm:$0xff] }
 0x1ac   : > { %2026 = vmatmul.mubr.f32.gmra.mrb[64].mxu1 %v4118_v33  ;;  %3572 = vmatprep.subr.bf16.mxu0 %v5443_v41  ;;  %v2516_v33 = vld [vmem:[#allocation7 + $0xa0] sm:$0xff]  ;;  %v840_v29 = vld [vmem:[#allocation4 + $0xc10] sm:$0xff]  ;;  %v849_v49 = vld [vmem:[#allocation4 + $0xc58] sm:$0xff] }
 0x1ad   : > { %2031 = vmatprep.mubr.f32.mxu1 %v4119_v42  ;;  %3472 = vmatpush1.bf16.msra.mxu1 %v3471_v52  ;;  %v3576_v42 = vpack.c.bf16 %v2517_v38, %v2516_v33  ;;  %v844_v35 = vld [vmem:[#allocation4 + $0xc30] sm:$0xff]  ;;  %v3582_v33 = vpack.c.bf16 %v2521_v4, %v2520_v2  ;;  %v865_v4 = vld [vmem:[#allocation4 + $0xcd8] sm:$0xff] }
 0x1ae   : > { %1668 = vmatmul.mubr.f32.gmra.mrb[26].mxu0 %v5007_v10  ;;  %3474 = vmatprep.subr.bf16.mxu1 %v3473_v7 }
 0x1af   : > { %1673 = vmatprep.mubr.f32.mxu0 %v5010_v9  ;;  %3574 = vmatpush1.bf16.msra.mxu0 %v3573_v5 }
 0x1b0   : > { %2032 = vmatmul.mubr.f32.gmra.mrb[66].mxu1 %v4120_v43  ;;  %3575 = vmatprep.subr.bf16.mxu0 %v5443_v41  ;;  %v5074_v43 = vld [vmem:[%s4594_s10 + $0x4b0] sm:$0xff] }
 0x1b1   : > { %2037 = vmatprep.mubr.f32.mxu1 %v4121_v48  ;;  %3476 = vmatpush1.bf16.msra.mxu1 %v3475_v36  ;;  %v3579_v48 = vpack.c.bf16 %v2519_v47, %v2518_v37  ;;  %v4130_v37 = vld [vmem:[%s4594_s10 + $0x20] sm:$0xff]  ;;  %v4131_v47 = vld [vmem:[%s4594_s10 + $0x68] sm:$0xff] }
 0x1b2   : > { %1674 = vmatmul.mubr.f32.gmra.mrb[28].mxu0 %v5018_v24  ;;  %3478 = vmatprep.subr.bf16.mxu1 %v3477_v30  ;;  %v4127_v30 = vld [vmem:[%s4594_s10 + $0x498] sm:$0xff] }
 0x1b3   : > { %1679 = vmatprep.mubr.f32.mxu0 %v5021_v12  ;;  %v5031_v61 = vpop.f32.mrb[0].mxu1  ;;  %3577 = vmatpush1.bf16.msra.mxu0 %v3576_v42  ;;  %v857_v42 = vld [vmem:[#allocation4 + $0xc98] sm:$0xff] }
 0x1b4   : > { %v5037_v0 = vpop.f32.mrb[1].mxu1  ;;  %2038 = vmatmul.mubr.f32.gmra.mrb[68].mxu1 %v4122_v1  ;;  %3578 = vmatprep.subr.bf16.mxu0 %v5443_v41  ;;  %v4129_v1 = vld [vmem:[%s4594_s10 + $0x28] sm:$0xff] }
 0x1b5   : > { %2043 = vmatprep.mubr.f32.mxu1 %v4123_v25  ;;  %3480 = vmatpush1.bf16.msra.mxu1 %v3479_v53  ;;  %v853_v53 = vld [vmem:[#allocation4 + $0xc78] sm:$0xff]  ;;  %v3483_v25 = vpack.c.bf16 %v844_v35, %v840_v29 }
 0x1b6   : > { %1680 = vmatmul.mubr.f32.gmra.mrb[30].mxu0 %v5029_v14  ;;  %3482 = vmatprep.subr.bf16.mxu1 %v3481_v63  ;;  %v4128_v63 = vld [vmem:[%s4594_s10 + $0x490] sm:$0xff]  ;;  %v3485_v5 = vpack.c.bf16 %v853_v53, %v849_v49 }
 0x1b7   : > { %1685 = vmatprep.mubr.f32.mxu0 %v5034_v50  ;;  %v5046_v52 = vpop.f32.mrb[2].mxu1  ;;  %3580 = vmatpush1.bf16.msra.mxu0 %v3579_v48  ;;  %v2522_v35 = vld [vmem:[#allocation7 + $0xd0] sm:$0xff]  ;;  %v2523_v48 = vld [vmem:[#allocation7 + $0xd8] sm:$0xff] }
 0x1b8   : > { %v5052_v7 = vpop.f32.mrb[3].mxu1  ;;  %2044 = vmatmul.mubr.f32.gmra.mrb[70].mxu1 %v4124_v18  ;;  %v848_v18 = vld [vmem:[#allocation4 + $0xc50] sm:$0xff]  ;;  %3581 = vmatprep.subr.bf16.mxu0 %v5443_v41 }
 0x1b9   : > { %2049 = vmatprep.mubr.f32.mxu1 %v4125_v15  ;;  %v852_v15 = vld [vmem:[#allocation4 + $0xc70] sm:$0xff] }
 0x1ba   : > { %1686 = vmatmul.mubr.f32.gmra.mrb[32].mxu0 %v5044_v58  ;;  %v3487_v29 = vpack.c.bf16 %v852_v15, %v848_v18  ;;  %v856_v53 = vld [vmem:[#allocation4 + $0xc90] sm:$0xff]  ;;  %v4133_v18 = vld [vmem:[%s4594_s10 + $0xa8] sm:$0xff] }
 0x1bb   : > { %1691 = vmatprep.mubr.f32.mxu0 %v5049_v31  ;;  %v5062_v17 = vpop.f32.mrb[4].mxu1  ;;  %3583 = vmatpush1.bf16.msra.mxu0 %v3582_v33  ;;  %v2524_v15 = vld [vmem:[#allocation7 + $0xe0] sm:$0xff] }
 0x1bc   : > { %v5067_v36 = vpop.f32.mrb[5].mxu1  ;;  %2050 = vmatmul.mubr.f32.gmra.mrb[72].mxu1 %v4126_v26  ;;  %v861_v26 = vld [vmem:[#allocation4 + $0xcb8] sm:$0xff]  ;;  %3584 = vmatprep.subr.bf16.mxu0 %v5443_v41 }
 0x1bd   : > { %2055 = vmatprep.mubr.f32.mxu1 %v4127_v30  ;;  %v3489_v49 = vpack.c.bf16 %v861_v26, %v857_v42  ;;  %v2525_v42 = vld [vmem:[#allocation7 + $0xe8] sm:$0xff] }
 0x1be   : > { %1692 = vmatmul.mubr.f32.gmra.mrb[34].mxu0 %v5059_v23 }
 0x1bf   : > { %1697 = vmatprep.mubr.f32.mxu0 %v5065_v8  ;;  %v5077_v34 = vpop.f32.mrb[6].mxu1 }
 0x1c0   : > { %v5079_v60 = vpop.f32.mrb[7].mxu1  ;;  %2056 = vmatmul.mubr.f32.gmra.mrb[74].mxu1 %v4128_v63  ;;  %v860_v63 = vld [vmem:[#allocation4 + $0xcb0] sm:$0xff] }
 0x1c1   : > { %2126 = vmatprep.mubr.f32.mxu1 %v4129_v1  ;;  %v3585_v1 = vpack.c.bf16 %v2523_v48, %v2522_v35  ;;  %v868_v35 = vld [vmem:[#allocation4 + $0xcf0] sm:$0xff]  ;;  %v3588_v48 = vpack.c.bf16 %v2525_v42, %v2524_v15 }
 0x1c2   : > { %1698 = vmatmul.mubr.f32.gmra.mrb[36].mxu0 %v5074_v43  ;;  %v876_v15 = vld [vmem:[#allocation4 + $0xd30] sm:$0xff] }
 0x1c3   : > { %v5085_v38 = vpop.f32.mrb[8].mxu1  ;;  %3586 = vmatpush1.bf16.msra.mxu0 %v3585_v1 }
 0x1c4   : > { %v5087_v30 = vpop.f32.mrb[9].mxu1  ;;  %2127 = vmatmul.mubr.f32.vlgmr.msra.gmra.mrb[38].mxu1 %v4130_v37  ;;  %v869_v37 = vld [vmem:[#allocation4 + $0xcf8] sm:$0xff]  ;;  %3587 = vmatprep.subr.bf16.mxu0 %v5443_v41 }
 0x1c5   : > { %5454 = vst [vmem:[#allocation13_spill] sm:$0xff] %v5087_v30  ;;  %3484 = vmatpush1.bf16.msra.mxu1 %v3483_v25  ;;  %2132 = vmatprep.mubr.f32.mxu1 %v4131_v47  ;;  %v4132_v25 = vld [vmem:[%s4594_s10 + $0x60] sm:$0xff]  ;;  %v3493_v26 = vpack.c.bf16 %v869_v37, %v865_v4  ;;  %v864_v47 = vld [vmem:[#allocation4 + $0xcd0] sm:$0xff] }
 0x1c6   : > { %3486 = vmatprep.subr.bf16.mxu1 %v3485_v5  ;;  %v3491_v5 = vpack.c.bf16 %v860_v63, %v856_v53  ;;  %v4135_v53 = vld [vmem:[%s4594_s10 + $0xe8] sm:$0xff]  ;;  %v2526_v63 = vld [vmem:[#allocation7 + $0xf0] sm:$0xff]  ;;  %v2527_v4 = vld [vmem:[#allocation7 + $0xf8] sm:$0xff] }
 0x1c7   : > { %v5092_v2 = vpop.f32.mrb[10].mxu1  ;;  %3589 = vmatpush1.bf16.msra.mxu0 %v3588_v48  ;;  %v3591_v42 = vpack.c.bf16 %v2527_v4, %v2526_v63  ;;  %v4136_v30 = vld [vmem:[%s4594_s10 + $0xe0] sm:$0xff]  ;;  %v893_v63 = vld [vmem:[#allocation4 + $0xdb8] sm:$0xff] }
 0x1c8   : > { %5455 = vst [vmem:[#allocation14_spill] sm:$0xff] %v5092_v2  ;;  %v5094_v33 = vpop.f32.mrb[11].mxu1  ;;  %2133 = vmatmul.mubr.f32.gmra.mrb[40].mxu1 %v4132_v25  ;;  %v877_v25 = vld [vmem:[#allocation4 + $0xd38] sm:$0xff]  ;;  %3590 = vmatprep.subr.bf16.mxu0 %v5443_v41 }
 0x1c9   : > { %5456 = vst [vmem:[#allocation15_spill] sm:$0xff] %v5094_v33  ;;  %3488 = vmatpush1.bf16.msra.mxu1 %v3487_v29  ;;  %2138 = vmatprep.mubr.f32.mxu1 %v4133_v18  ;;  %v873_v33 = vld [vmem:[#allocation4 + $0xd18] sm:$0xff]  ;;  %v4134_v29 = vld [vmem:[%s4594_s10 + $0xa0] sm:$0xff]  ;;  %v872_v18 = vld [vmem:[#allocation4 + $0xd10] sm:$0xff] }
 0x1ca   : > { %3490 = vmatprep.subr.bf16.mxu1 %v3489_v49  ;;  %v3495_v49 = vpack.c.bf16 %v868_v35, %v864_v47  ;;  %v3497_v37 = vpack.c.bf16 %v877_v25, %v873_v33  ;;  %v3499_v33 = vpack.c.bf16 %v876_v15, %v872_v18  ;;  %v880_v47 = vld [vmem:[#allocation4 + $0xd50] sm:$0xff] }
 0x1cb   : > { %v5099_v2 = vpop.f32.mrb[12].mxu1  ;;  %3592 = vmatpush1.bf16.msra.mxu0 %v3591_v42  ;;  %v884_v35 = vld [vmem:[#allocation4 + $0xd70] sm:$0xff]  ;;  %v4139_v42 = vld [vmem:[%s4594_s10 + $0x168] sm:$0xff] }
 0x1cc   : > { %5457 = vst [vmem:[#allocation16_spill] sm:$0xff] %v5099_v2  ;;  %v5101_v1 = vpop.f32.mrb[13].mxu1  ;;  %2139 = vmatmul.mubr.f32.gmra.mrb[42].mxu1 %v4134_v29  ;;  %v885_v29 = vld [vmem:[#allocation4 + $0xd78] sm:$0xff]  ;;  %3593 = vmatprep.subr.bf16.mxu0 %v5443_v41  ;;  %v892_v18 = vld [vmem:[#allocation4 + $0xdb0] sm:$0xff] }
 0x1cd   : > { %5458 = vst [vmem:[#allocation17_spill] sm:$0xff] %v5101_v1  ;;  %2144 = vmatprep.mubr.f32.mxu1 %v4135_v53  ;;  %3492 = vmatpush1.bf16.msra.mxu1 %v3491_v5  ;;  %v881_v1 = vld [vmem:[#allocation4 + $0xd58] sm:$0xff]  ;;  %v4137_v5 = vld [vmem:[%s4594_s10 + $0x128] sm:$0xff] }
 0x1ce   : > { %3494 = vmatprep.subr.bf16.mxu1 %v3493_v26  ;;  %v3501_v26 = vpack.c.bf16 %v885_v29, %v881_v1  ;;  %v889_v53 = vld [vmem:[#allocation4 + $0xd98] sm:$0xff] }
 0x1cf   : > { %v5106_v2 = vpop.f32.mrb[14].mxu1  ;;  %v3505_v1 = vpack.c.bf16 %v893_v63, %v889_v53  ;;  %v897_v29 = vld [vmem:[#allocation4 + $0xdd8] sm:$0xff] }
 0x1d0   : > { %v5108_v48 = vpop.f32.mrb[15].mxu1  ;;  %2145 = vmatmul.mubr.f32.gmra.mrb[44].mxu1 %v4136_v30  ;;  %v4138_v30 = vld [vmem:[%s4594_s10 + $0x120] sm:$0xff]  ;;  %v905_v53 = vld [vmem:[#allocation4 + $0xe18] sm:$0xff] }
 0x1d1   : > { %2150 = vmatprep.mubr.f32.mxu1 %v4137_v5  ;;  %3496 = vmatpush1.bf16.msra.mxu1 %v3495_v49  ;;  %v3503_v49 = vpack.c.bf16 %v884_v35, %v880_v47  ;;  %v901_v5 = vld [vmem:[#allocation4 + $0xdf8] sm:$0xff]  ;;  %v900_v47 = vld [vmem:[#allocation4 + $0xdf0] sm:$0xff] }
 0x1d2   : > { %3498 = vmatprep.subr.bf16.mxu1 %v3497_v37  ;;  %v888_v37 = vld [vmem:[#allocation4 + $0xd90] sm:$0xff]  ;;  %v909_v63 = vld [vmem:[#allocation4 + $0xe38] sm:$0xff] }
 0x1d3   : > { %v5113_v25 = vpop.f32.mrb[16].mxu1 }
 0x1d4   : > { %5459 = vst [vmem:[#allocation18_spill] sm:$0xff] %v5113_v25  ;;  %v5115_v4 = vpop.f32.mrb[17].mxu1  ;;  %2151 = vmatmul.mubr.f32.gmra.mrb[46].mxu1 %v4138_v30  ;;  %v4140_v25 = vld [vmem:[%s4594_s10 + $0x160] sm:$0xff]  ;;  %v3507_v30 = vpack.c.bf16 %v892_v18, %v888_v37  ;;  %v913_v18 = vld [vmem:[#allocation4 + $0xe58] sm:$0xff] }
 0x1d5   : > { %5460 = vst [vmem:[#allocation19_spill] sm:$0xff] %v5115_v4  ;;  %2156 = vmatprep.mubr.f32.mxu1 %v4139_v42  ;;  %3500 = vmatpush1.bf16.msra.mxu1 %v3499_v33  ;;  %v4141_v4 = vld [vmem:[%s4594_s10 + $0x1a8] sm:$0xff]  ;;  %v3509_v33 = vpack.c.bf16 %v901_v5, %v897_v29  ;;  %v917_v29 = vld [vmem:[#allocation4 + $0xe78] sm:$0xff] }
 0x1d6   : > { %3502 = vmatprep.subr.bf16.mxu1 %v3501_v26  ;;  %v896_v26 = vld [vmem:[#allocation4 + $0xdd0] sm:$0xff] }
 0x1d7   : > { %v5119_v15 = vpop.f32.mrb[18].mxu1 }
 0x1d8   : > { %5461 = vst [vmem:[#allocation20_spill] sm:$0xff] %v5119_v15  ;;  %v5121_v41 = vpop.f32.mrb[19].mxu1  ;;  %2157 = vmatmul.mubr.f32.gmra.mrb[48].mxu1 %v4140_v25  ;;  %v4142_v15 = vld [vmem:[%s4594_s10 + $0x1a0] sm:$0xff]  ;;  %v3511_v25 = vpack.c.bf16 %v900_v47, %v896_v26  ;;  %v921_v47 = vld [vmem:[#allocation4 + $0xe98] sm:$0xff] }
 0x1d9   : > { %5462 = vst [vmem:[#allocation21_spill] sm:$0xff] %v5121_v41  ;;  %2162 = vmatprep.mubr.f32.mxu1 %v4141_v4  ;;  %3504 = vmatpush1.bf16.msra.mxu1 %v3503_v49  ;;  %v4143_v41 = vld [vmem:[%s4594_s10 + $0x1e8] sm:$0xff]  ;;  %v3513_v4 = vpack.c.bf16 %v909_v63, %v905_v53  ;;  %v904_v49 = vld [vmem:[#allocation4 + $0xe10] sm:$0xff]  ;;  %v925_v53 = vld [vmem:[#allocation4 + $0xeb8] sm:$0xff] }
 0x1da   : > { %3506 = vmatprep.subr.bf16.mxu1 %v3505_v1  ;;  %v908_v1 = vld [vmem:[#allocation4 + $0xe30] sm:$0xff] }
 0x1db   : > { %v5125_v35 = vpop.f32.mrb[20].mxu1 }
 0x1dc   : > { %5463 = vst [vmem:[#allocation22_spill] sm:$0xff] %v5125_v35  ;;  %v5127_v42 = vpop.f32.mrb[21].mxu1  ;;  %2163 = vmatmul.mubr.f32.gmra.mrb[50].mxu1 %v4142_v15  ;;  %v4144_v35 = vld [vmem:[%s4594_s10 + $0x1e0] sm:$0xff]  ;;  %v3517_v15 = vpack.c.bf16 %v917_v29, %v913_v18  ;;  %v933_v18 = vld [vmem:[#allocation4 + $0xef8] sm:$0xff] }
 0x1dd   : > { %5464 = vst [vmem:[#allocation23_spill] sm:$0xff] %v5127_v42  ;;  %2168 = vmatprep.mubr.f32.mxu1 %v4143_v41  ;;  %3508 = vmatpush1.bf16.msra.mxu1 %v3507_v30  ;;  %v4145_v42 = vld [vmem:[%s4594_s10 + $0x228] sm:$0xff]  ;;  %v3515_v41 = vpack.c.bf16 %v908_v1, %v904_v49  ;;  %v912_v30 = vld [vmem:[#allocation4 + $0xe50] sm:$0xff]  ;;  %v929_v1 = vld [vmem:[#allocation4 + $0xed8] sm:$0xff] }
 0x1de   : > { %3510 = vmatprep.subr.bf16.mxu1 %v3509_v33  ;;  %v916_v33 = vld [vmem:[#allocation4 + $0xe70] sm:$0xff] }
 0x1df   : > { %v5131_v37 = vpop.f32.mrb[22].mxu1 }
 0x1e0   : > { %5465 = vst [vmem:[#allocation24_spill] sm:$0xff] %v5131_v37  ;;  %v5133_v5 = vpop.f32.mrb[23].mxu1  ;;  %2169 = vmatmul.mubr.f32.gmra.mrb[52].mxu1 %v4144_v35  ;;  %v4146_v37 = vld [vmem:[%s4594_s10 + $0x220] sm:$0xff]  ;;  %v3519_v35 = vpack.c.bf16 %v916_v33, %v912_v30  ;;  %v937_v33 = vld [vmem:[#allocation4 + $0xf18] sm:$0xff] }
 0x1e1   : > { %5466 = vst [vmem:[#allocation25_spill] sm:$0xff] %v5133_v5  ;;  %2174 = vmatprep.mubr.f32.mxu1 %v4145_v42  ;;  %3512 = vmatpush1.bf16.msra.mxu1 %v3511_v25  ;;  %v4147_v5 = vld [vmem:[%s4594_s10 + $0x268] sm:$0xff]  ;;  %v3521_v42 = vpack.c.bf16 %v925_v53, %v921_v47  ;;  %v920_v25 = vld [vmem:[#allocation4 + $0xe90] sm:$0xff]  ;;  %v941_v47 = vld [vmem:[#allocation4 + $0xf38] sm:$0xff] }
 0x1e2   : > { %3514 = vmatprep.subr.bf16.mxu1 %v3513_v4  ;;  %v924_v4 = vld [vmem:[#allocation4 + $0xeb0] sm:$0xff] }
 0x1e3   : > { %v5137_v26 = vpop.f32.mrb[24].mxu1 }
 0x1e4   : > { %5467 = vst [vmem:[#allocation26_spill] sm:$0xff] %v5137_v26  ;;  %v5139_v63 = vpop.f32.mrb[25].mxu1  ;;  %2175 = vmatmul.mubr.f32.gmra.mrb[54].mxu1 %v4146_v37  ;;  %v4148_v26 = vld [vmem:[%s4594_s10 + $0x260] sm:$0xff]  ;;  %v3523_v37 = vpack.c.bf16 %v924_v4, %v920_v25  ;;  %v945_v4 = vld [vmem:[#allocation4 + $0xf58] sm:$0xff] }
 0x1e5   : > { %5468 = vst [vmem:[#allocation27_spill] sm:$0xff] %v5139_v63  ;;  %2180 = vmatprep.mubr.f32.mxu1 %v4147_v5  ;;  %3516 = vmatpush1.bf16.msra.mxu1 %v3515_v41  ;;  %v4149_v63 = vld [vmem:[%s4594_s10 + $0x2a8] sm:$0xff]  ;;  %v3525_v5 = vpack.c.bf16 %v933_v18, %v929_v1  ;;  %v928_v41 = vld [vmem:[#allocation4 + $0xed0] sm:$0xff]  ;;  %v949_v1 = vld [vmem:[#allocation4 + $0xf78] sm:$0xff] }
 0x1e6   : > { %3518 = vmatprep.subr.bf16.mxu1 %v3517_v15  ;;  %v932_v15 = vld [vmem:[#allocation4 + $0xef0] sm:$0xff] }
 0x1e7   : > { %v5143_v49 = vpop.f32.mrb[26].mxu1 }
 0x1e8   : > { %5469 = vst [vmem:[#allocation28_spill] sm:$0xff] %v5143_v49  ;;  %v5145_v29 = vpop.f32.mrb[27].mxu1  ;;  %2181 = vmatmul.mubr.f32.gmra.mrb[56].mxu1 %v4148_v26  ;;  %v4150_v49 = vld [vmem:[%s4594_s10 + $0x2a0] sm:$0xff]  ;;  %v3527_v26 = vpack.c.bf16 %v932_v15, %v928_v41  ;;  %v953_v15 = vld [vmem:[#allocation4 + $0xf98] sm:$0xff] }
 0x1e9   : > { %5470 = vst [vmem:[#allocation29_spill] sm:$0xff] %v5145_v29  ;;  %2186 = vmatprep.mubr.f32.mxu1 %v4149_v63  ;;  %3520 = vmatpush1.bf16.msra.mxu1 %v3519_v35  ;;  %v4151_v29 = vld [vmem:[%s4594_s10 + $0x2e8] sm:$0xff]  ;;  %v3529_v63 = vpack.c.bf16 %v941_v47, %v937_v33  ;;  %v936_v35 = vld [vmem:[#allocation4 + $0xf10] sm:$0xff]  ;;  %v957_v33 = vld [vmem:[#allocation4 + $0xfb8] sm:$0xff] }
 0x1ea   : > { %3522 = vmatprep.subr.bf16.mxu1 %v3521_v42  ;;  %v940_v42 = vld [vmem:[#allocation4 + $0xf30] sm:$0xff] }
 0x1eb   : > { %v5149_v30 = vpop.f32.mrb[28].mxu1 }
 0x1ec   : > { %5471 = vst [vmem:[#allocation30_spill] sm:$0xff] %v5149_v30  ;;  %v5151_v53 = vpop.f32.mrb[29].mxu1  ;;  %2187 = vmatmul.mubr.f32.gmra.mrb[58].mxu1 %v4150_v49  ;;  %v4152_v30 = vld [vmem:[%s4594_s10 + $0x2e0] sm:$0xff]  ;;  %v3531_v49 = vpack.c.bf16 %v940_v42, %v936_v35  ;;  %v961_v42 = vld [vmem:[#allocation4 + $0xfd8] sm:$0xff] }
 0x1ed   : > { %5472 = vst [vmem:[#allocation31_spill] sm:$0xff] %v5151_v53  ;;  %2192 = vmatprep.mubr.f32.mxu1 %v4151_v29  ;;  %3524 = vmatpush1.bf16.msra.mxu1 %v3523_v37  ;;  %v4153_v53 = vld [vmem:[%s4594_s10 + $0x328] sm:$0xff]  ;;  %v3533_v29 = vpack.c.bf16 %v949_v1, %v945_v4  ;;  %v944_v37 = vld [vmem:[#allocation4 + $0xf50] sm:$0xff]  ;;  %v965_v4 = vld [vmem:[#allocation4 + $0xff8] sm:$0xff] }
 0x1ee   : > { %3526 = vmatprep.subr.bf16.mxu1 %v3525_v5  ;;  %v948_v5 = vld [vmem:[#allocation4 + $0xf70] sm:$0xff] }
 0x1ef   : > { %v5155_v25 = vpop.f32.mrb[30].mxu1 }
 0x1f0   : > { %5473 = vst [vmem:[#allocation32_spill] sm:$0xff] %v5155_v25  ;;  %v5157_v18 = vpop.f32.mrb[31].mxu1  ;;  %2193 = vmatmul.mubr.f32.gmra.mrb[60].mxu1 %v4152_v30  ;;  %v4154_v25 = vld [vmem:[%s4594_s10 + $0x320] sm:$0xff]  ;;  %v3535_v30 = vpack.c.bf16 %v948_v5, %v944_v37 }
 0x1f1   : > { %5474 = vst [vmem:[#allocation33_spill] sm:$0xff] %v5157_v18  ;;  %2198 = vmatprep.mubr.f32.mxu1 %v4153_v53  ;;  %3528 = vmatpush1.bf16.msra.mxu1 %v3527_v26  ;;  %v4155_v18 = vld [vmem:[%s4594_s10 + $0x368] sm:$0xff]  ;;  %v3537_v53 = vpack.c.bf16 %v957_v33, %v953_v15  ;;  %v952_v26 = vld [vmem:[#allocation4 + $0xf90] sm:$0xff]  ;;  %v4158_v15 = vld [vmem:[%s4594_s10 + $0x3a0] sm:$0xff] }
 0x1f2   : > { %3530 = vmatprep.subr.bf16.mxu1 %v3529_v63  ;;  %v956_v63 = vld [vmem:[#allocation4 + $0xfb0] sm:$0xff]  ;;  %v4159_v33 = vld [vmem:[%s4594_s10 + $0x3e8] sm:$0xff] }
 0x1f3   : > { %v5161_v41 = vpop.f32.mrb[32].mxu1 }
 0x1f4   : > { %5475 = vst [vmem:[#allocation34_spill] sm:$0xff] %v5161_v41  ;;  %v5163_v47 = vpop.f32.mrb[33].mxu1  ;;  %2199 = vmatmul.mubr.f32.gmra.mrb[62].mxu1 %v4154_v25  ;;  %v4157_v41 = vld [vmem:[%s4594_s10 + $0x3a8] sm:$0xff]  ;;  %v3539_v25 = vpack.c.bf16 %v956_v63, %v952_v26  ;;  %v4164_v63 = vld [vmem:[%s4594_s10 + $0x460] sm:$0xff] }
 0x1f5   : > { %5476 = vst [vmem:[#allocation35_spill] sm:$0xff] %v5163_v47  ;;  %2204 = vmatprep.mubr.f32.mxu1 %v4155_v18  ;;  %3532 = vmatpush1.bf16.msra.mxu1 %v3531_v49  ;;  %v4156_v47 = vld [vmem:[%s4594_s10 + $0x360] sm:$0xff]  ;;  %v3541_v18 = vpack.c.bf16 %v965_v4, %v961_v42  ;;  %v960_v49 = vld [vmem:[#allocation4 + $0xfd0] sm:$0xff]  ;;  %v4163_v26 = vld [vmem:[%s4594_s10 + $0x468] sm:$0xff] }
 0x1f6   : > { %3534 = vmatprep.subr.bf16.mxu1 %v3533_v29  ;;  %v964_v29 = vld [vmem:[#allocation4 + $0xff0] sm:$0xff]  ;;  %v4165_v42 = vld [vmem:[%s4594_s10 + $0x4a8] sm:$0xff]  ;;  %v4166_v4 = vld [vmem:[%s4594_s10 + $0x4a0] sm:$0xff] }
 0x1f7   : > { %v5167_v35 = vpop.f32.mrb[34].mxu1 }
 0x1f8   : > { %v5169_v1 = vpop.f32.mrb[35].mxu1  ;;  %2205 = vmatmul.mubr.f32.gmra.mrb[64].mxu1 %v4156_v47  ;;  %v4160_v47 = vld [vmem:[%s4594_s10 + $0x3e0] sm:$0xff] }
 0x1f9   : > { %2210 = vmatprep.mubr.f32.mxu1 %v4157_v41  ;;  %3536 = vmatpush1.bf16.msra.mxu1 %v3535_v30  ;;  %v3543_v41 = vpack.c.bf16 %v964_v29, %v960_v49  ;;  %v4161_v30 = vld [vmem:[%s4594_s10 + $0x428] sm:$0xff]  ;;  %v4169_v49 = vld [vmem:[%s4594_s10 + $0x78] sm:$0xff] }
 0x1fa   : > { %3538 = vmatprep.subr.bf16.mxu1 %v3537_v53  ;;  %v4162_v53 = vld [vmem:[%s4594_s10 + $0x420] sm:$0xff]  ;;  %v2533_v29 = vld [vmem:[#allocation7 + $0x128] sm:$0xff] }
 0x1fb   : > { %v5173_v37 = vpop.f32.mrb[36].mxu1 }
 0x1fc   : > { %v5175_v5 = vpop.f32.mrb[37].mxu1  ;;  %2211 = vmatmul.mubr.f32.gmra.mrb[66].mxu1 %v4158_v15 }
 0x1fd   : > { %2216 = vmatprep.mubr.f32.mxu1 %v4159_v33  ;;  %3540 = vmatpush1.bf16.msra.mxu1 %v3539_v25  ;;  %v4167_v25 = vld [vmem:[%s4594_s10 + $0x38] sm:$0xff] }
 0x1fe   : > { %3542 = vmatprep.subr.bf16.mxu1 %v3541_v18  ;;  %v4168_v18 = vld [vmem:[%s4594_s10 + $0x30] sm:$0xff] }
 0x200   : > { %2217 = vmatmul.mubr.f32.gmra.mrb[68].mxu1 %v4160_v47 }
 0x201   : > { %2222 = vmatprep.mubr.f32.mxu1 %v4161_v30  ;;  %3544 = vmatpush1.bf16.msra.mxu1 %v3543_v41 }
 0x204   : > { %2223 = vmatmul.mubr.f32.gmra.mrb[70].mxu1 %v4162_v53  ;;  %v2534_v53 = vld [vmem:[#allocation7 + $0x130] sm:$0xff] }
 0x205   : > { %2228 = vmatprep.mubr.f32.mxu1 %v4163_v26  ;;  %v2535_v26 = vld [vmem:[#allocation7 + $0x138] sm:$0xff] }
 0x208   : > { %2229 = vmatmul.mubr.f32.gmra.mrb[72].mxu1 %v4164_v63 }
 0x209   : > { %2234 = vmatprep.mubr.f32.mxu1 %v4165_v42 }
 0x20c   : > { %2235 = vmatmul.mubr.f32.gmra.mrb[74].mxu1 %v4166_v4 }
 0x20d   : > { %2305 = vmatprep.mubr.f32.mxu1 %v4167_v25  ;;  %v3603_v25 = vpack.c.bf16 %v2535_v26, %v2534_v53  ;;  %v5484_v53 = vld [vmem:[#allocation19_spill] sm:$0xff] }
 0x210   : > { %2306 = vmatmul.mubr.f32.vlgmr.msra.gmra.mrb[38].mxu1 %v4168_v18 }
 0x211   : > { %2311 = vmatprep.mubr.f32.mxu1 %v4169_v49 }
 0x214   : > { %2312 = vmatmul.mubr.f32.gmra.mrb[40].mxu1 %v4881_v27  ;;  %v968_v27 = vlaneseq }
 0x215   : > { %2317 = vmatprep.mubr.f32.mxu1 %v4884_v32 }
 0x216   : > { %v5211_v32 = vshrl.u32 %v968_v27, 7 }
 0x218   : > { %2318 = vmatmul.mubr.f32.gmra.mrb[42].mxu1 %v4891_v46  ;;  %v970_v46 = vsub.s32 0, %v5211_v32 }
 0x219   : > { %2323 = vmatprep.mubr.f32.mxu1 %v4894_v51  ;;  %v5216_v51 = vld [vmem:[#allocation6] sm:$0xf] }
 0x21c   : > { %2324 = vmatmul.mubr.f32.gmra.mrb[44].mxu1 %v4901_v62  ;;  %v974_v62 = vsub.s32 1, %v5211_v32 }
 0x21d   : > { %2329 = vmatprep.mubr.f32.mxu1 %v4904_v55  ;;  %v5222_v55 = vrot.slane %v5216_v51, %v970_v46  ;;  %v2536_v46 = vld [vmem:[#allocation7 + $0x140] sm:$0xff] }
 0x220   : > { %2330 = vmatmul.mubr.f32.gmra.mrb[46].mxu1 %v4911_v19  ;;  %v5225_v19 = vrot.slane %v5216_v51, %v974_v62  ;;  %v2537_v62 = vld [vmem:[#allocation7 + $0x148] sm:$0xff] }
 0x221   : > { %2335 = vmatprep.mubr.f32.mxu1 %v4914_v56  ;;  %v1055_v56 = vadd.f32 %v5031_v61, %v5222_v55 }
 0x224   : > { %2336 = vmatmul.mubr.f32.gmra.mrb[48].mxu1 %v4921_v6  ;;  %v1057_v6 = vadd.f32 %v5037_v0, %v5225_v19 }
 0x225   : > { %2341 = vmatprep.mubr.f32.mxu1 %v4924_v45 }
 0x228   : > { %2342 = vmatmul.mubr.f32.gmra.mrb[50].mxu1 %v4931_v28 }
 0x229   : > { %2347 = vmatprep.mubr.f32.mxu1 %v4934_v20 }
 0x22c   : > { %2348 = vmatmul.mubr.f32.gmra.mrb[52].mxu1 %v4941_v44  ;;  %v2528_v44 = vld [vmem:[#allocation7 + $0x100] sm:$0xff] }
 0x22d   : > { %2353 = vmatprep.mubr.f32.mxu1 %v4944_v16  ;;  %v2529_v16 = vld [vmem:[#allocation7 + $0x108] sm:$0xff] }
 0x230   : > { %2354 = vmatmul.mubr.f32.gmra.mrb[54].mxu1 %v4952_v57 }
 0x231   : > { %2359 = vmatprep.mubr.f32.mxu1 %v4955_v40  ;;  %v1061_v40 = vadd.f32 %v5046_v52, %v5222_v55 }
 0x234   : > { %2360 = vmatmul.mubr.f32.gmra.mrb[56].mxu1 %v4963_v54  ;;  %v1063_v54 = vadd.f32 %v5052_v7, %v5225_v19  ;;  %v2532_v7 = vld [vmem:[#allocation7 + $0x120] sm:$0xff] }
 0x235   : > { %2365 = vmatprep.mubr.f32.mxu1 %v4966_v3  ;;  %v3600_v41 = vpack.c.bf16 %v2533_v29, %v2532_v7  ;;  %v1099_v7 = vadd.f32 %v5108_v48, %v5225_v19  ;;  %v1105_v48 = vadd.f32 %v5484_v53, %v5225_v19 }
 0x238   : > { %2366 = vmatmul.mubr.f32.gmra.mrb[58].mxu1 %v4974_v11 }
 0x239   : > { %2371 = vmatprep.mubr.f32.mxu1 %v4977_v13  ;;  %v3594_v13 = vpack.c.bf16 %v2529_v16, %v2528_v44  ;;  %v3606_v16 = vpack.c.bf16 %v2537_v62, %v2536_v46  ;;  %v5486_v46 = vld [vmem:[#allocation21_spill] sm:$0xff] }
 0x23a   : > { %v1111_v62 = vadd.f32 %v5486_v46, %v5225_v19 }
 0x23c   : > { %2372 = vmatmul.mubr.f32.gmra.mrb[60].mxu1 %v4985_v21 }
 0x23d   : > { %2377 = vmatprep.mubr.f32.mxu1 %v4988_v39 }
 0x240   : > { %2378 = vmatmul.mubr.f32.gmra.mrb[62].mxu1 %v4996_v59 }
 0x241   : > { %2383 = vmatprep.mubr.f32.mxu1 %v4999_v22  ;;  %v2530_v22 = vld [vmem:[#allocation7 + $0x110] sm:$0xff] }
 0x244   : > { %2384 = vmatmul.mubr.f32.gmra.mrb[64].mxu1 %v5007_v10  ;;  %v2531_v10 = vld [vmem:[#allocation7 + $0x118] sm:$0xff] }
 0x245   : > { %2389 = vmatprep.mubr.f32.mxu1 %v5010_v9 }
 0x248   : > { %2390 = vmatmul.mubr.f32.gmra.mrb[66].mxu1 %v5018_v24  ;;  %v1067_v24 = vadd.f32 %v5062_v17, %v5222_v55 }
 0x249   : > { %2395 = vmatprep.mubr.f32.mxu1 %v5021_v12  ;;  %v1069_v12 = vadd.f32 %v5067_v36, %v5225_v19  ;;  %v1073_v36 = vadd.f32 %v5077_v34, %v5222_v55  ;;  %v1079_v34 = vadd.f32 %v5085_v38, %v5222_v55 }
 0x24c   : > { %2396 = vmatmul.mubr.f32.gmra.mrb[68].mxu1 %v5029_v14 }
 0x24d   : > { %v1591_v45 = vpop.f32.mrb[0].mxu0  ;;  %2401 = vmatprep.mubr.f32.mxu1 %v5034_v50  ;;  %v3597_v50 = vpack.c.bf16 %v2531_v10, %v2530_v22 }
 0x24e   : > { %v3642_v28 = vadd.f32 %v1591_v45, %v1055_v56  ;;  %v1593_v20 = vpop.f32.mrb[1].mxu0  ;;  %v5480_v45 = vld [vmem:[#allocation15_spill] sm:$0xff] }
 0x24f   : > { %v3644_v57 = vadd.f32 %v1593_v20, %v1057_v6  ;;  %v5479_v6 = vld [vmem:[#allocation14_spill] sm:$0xff] }
 0x250   : > { %2402 = vmatmul.mubr.f32.gmra.mrb[70].mxu1 %v5044_v58  ;;  %v2420_v21 = vmax.f32 %v3642_v28, 0.0  ;;  %v1085_v38 = vadd.f32 %v5479_v6, %v5222_v55  ;;  %v1087_v28 = vadd.f32 %v5480_v45, %v5225_v19 }
 0x251   : > { %v2421_v3 = vmax.f32 %v3644_v57, 0.0  ;;  %v1597_v11 = vpop.f32.mrb[2].mxu0  ;;  %2407 = vmatprep.mubr.f32.mxu1 %v5049_v31  ;;  %v5477_v31 = vmov 0.0|0.0  }
 0x252   : > { %v3646_v39 = vadd.f32 %v1597_v11, %v1061_v40  ;;  %v1599_v59 = vpop.f32.mrb[3].mxu0  ;;  %v2539_v11 = vld [vmem:[#allocation7 + $0x158] sm:$0xff] }
 0x253   : > { %v3648_v9 = vadd.f32 %v1599_v59, %v1063_v54  ;;  %2631 = vmatprep.mubr.f32.mxu0 %v2421_v3  ;;  %v2538_v3 = vld [vmem:[#allocation7 + $0x150] sm:$0xff]  ;;  %v5482_v59 = vld [vmem:[#allocation17_spill] sm:$0xff] }
 0x254   : > { %2632 = vmatmul.mubr.f32.vlgmr.msra.gmra.mrb[38].mxu0 %v2420_v21  ;;  %2408 = vmatmul.mubr.f32.gmra.mrb[72].mxu1 %v5059_v23  ;;  %v2424_v0 = vmax.f32 %v3646_v39, 0.0  ;;  %v1075_v23 = vadd.f32 %v5079_v60, %v5225_v19  ;;  %v5478_v60 = vld [vmem:[#allocation13_spill] sm:$0xff]  ;;  %v5481_v21 = vld [vmem:[#allocation16_spill] sm:$0xff]  ;;  %v1093_v22 = vadd.f32 %v5482_v59, %v5225_v19 }
 0x255   : > { %v2425_v14 = vmax.f32 %v3648_v9, 0.0  ;;  %v1603_v61 = vpop.f32.mrb[4].mxu0  ;;  %3595 = vmatpush1.bf16.msra.mxu0 %v3594_v13  ;;  %2413 = vmatprep.mubr.f32.mxu1 %v5065_v8  ;;  %v1081_v42 = vadd.f32 %v5478_v60, %v5225_v19  ;;  %v1091_v39 = vadd.f32 %v5481_v21, %v5222_v55 }
 0x256   : > { %v3650_v58 = vadd.f32 %v1603_v61, %v1067_v24  ;;  %v1605_v52 = vpop.f32.mrb[5].mxu0  ;;  %3596 = vmatprep.subr.bf16.mxu0 %v5477_v31  ;;  %v3609_v24 = vpack.c.bf16 %v2539_v11, %v2538_v3  ;;  %v5488_v3 = vld [vmem:[#allocation23_spill] sm:$0xff] }
 0x257   : > { %v3652_v17 = vadd.f32 %v1605_v52, %v1069_v12  ;;  %2636 = vmatprep.mubr.f32.mxu0 %v2425_v14  ;;  %v1097_v52 = vadd.f32 %v5106_v2, %v5222_v55  ;;  %v1117_v11 = vadd.f32 %v5488_v3, %v5225_v19 }
 0x258   : > { %2637 = vmatmul.mubr.f32.gmra.mrb[40].mxu0 %v2424_v0  ;;  %2414 = vmatmul.mubr.f32.gmra.mrb[74].mxu1 %v5074_v43  ;;  %v2428_v8 = vmax.f32 %v3650_v58, 0.0  ;;  %v2541_v0 = vld [vmem:[#allocation7 + $0x168] sm:$0xff] }
 0x259   : > { %v2429_v15 = vmax.f32 %v3652_v17, 0.0  ;;  %v1609_v33 = vpop.f32.mrb[6].mxu0  ;;  %3598 = vmatpush1.bf16.msra.mxu0 %v3597_v50  ;;  %v2540_v50 = vld [vmem:[#allocation7 + $0x160] sm:$0xff] }
 0x25a   : > { %v3654_v47 = vadd.f32 %v1609_v33, %v1073_v36  ;;  %v1611_v30 = vpop.f32.mrb[7].mxu0  ;;  %3599 = vmatprep.subr.bf16.mxu0 %v5477_v31  ;;  %v3612_v36 = vpack.c.bf16 %v2541_v0, %v2540_v50  ;;  %v5490_v50 = vld [vmem:[#allocation25_spill] sm:$0xff] }
 0x25b   : > { %v3656_v63 = vadd.f32 %v1611_v30, %v1075_v23  ;;  %2641 = vmatprep.mubr.f32.mxu0 %v2429_v15  ;;  %v5483_v30 = vld [vmem:[#allocation18_spill] sm:$0xff]  ;;  %v1123_v0 = vadd.f32 %v5490_v50, %v5225_v19 }
 0x25c   : > { %2642 = vmatmul.mubr.f32.gmra.mrb[42].mxu0 %v2428_v8  ;;  %v2432_v18 = vmax.f32 %v3654_v47, 0.0  ;;  %v2543_v8 = vld [vmem:[#allocation7 + $0x178] sm:$0xff]  ;;  %v1103_v2 = vadd.f32 %v5483_v30, %v5222_v55 }
 0x25d   : > { %v2433_v4 = vmax.f32 %v3656_v63, 0.0  ;;  %v1615_v43 = vpop.f32.mrb[8].mxu0  ;;  %3601 = vmatpush1.bf16.msra.mxu0 %v3600_v41  ;;  %v2542_v41 = vld [vmem:[#allocation7 + $0x170] sm:$0xff] }
 0x25e   : > { %v3658_v49 = vadd.f32 %v1615_v43, %v1079_v34  ;;  %v1617_v27 = vpop.f32.mrb[9].mxu0  ;;  %3602 = vmatprep.subr.bf16.mxu0 %v5477_v31  ;;  %v3615_v34 = vpack.c.bf16 %v2543_v8, %v2542_v41  ;;  %v2544_v43 = vld [vmem:[#allocation7 + $0x180] sm:$0xff]  ;;  %v5491_v41 = vld [vmem:[#allocation26_spill] sm:$0xff] }
 0x25f   : > { %v3660_v56 = vadd.f32 %v1617_v27, %v1081_v42  ;;  %2646 = vmatprep.mubr.f32.mxu0 %v2433_v4  ;;  %v1127_v8 = vadd.f32 %v5491_v41, %v5222_v55 }
 0x260   : > { %2647 = vmatmul.mubr.f32.gmra.mrb[44].mxu0 %v2432_v18  ;;  %v2436_v57 = vmax.f32 %v3658_v49, 0.0  ;;  %v5485_v49 = vld [vmem:[#allocation20_spill] sm:$0xff] }
 0x261   : > { %v2437_v20 = vmax.f32 %v3660_v56, 0.0  ;;  %v1621_v44 = vpop.f32.mrb[10].mxu0  ;;  %3604 = vmatpush1.bf16.msra.mxu0 %v3603_v25  ;;  %v2545_v25 = vld [vmem:[#allocation7 + $0x188] sm:$0xff]  ;;  %v1109_v27 = vadd.f32 %v5485_v49, %v5222_v55 }
 0x262   : > { %v3662_v40 = vadd.f32 %v1621_v44, %v1085_v38  ;;  %v1623_v54 = vpop.f32.mrb[11].mxu0  ;;  %3605 = vmatprep.subr.bf16.mxu0 %v5477_v31  ;;  %v3618_v38 = vpack.c.bf16 %v2545_v25, %v2544_v43  ;;  %v2546_v44 = vld [vmem:[#allocation7 + $0x190] sm:$0xff]  ;;  %v5493_v43 = vld [vmem:[#allocation28_spill] sm:$0xff] }
 0x263   : > { %v3664_v13 = vadd.f32 %v1623_v54, %v1087_v28  ;;  %2651 = vmatprep.mubr.f32.mxu0 %v2437_v20  ;;  %v1133_v25 = vadd.f32 %v5493_v43, %v5222_v55 }
 0x264   : > { %2652 = vmatmul.mubr.f32.gmra.mrb[46].mxu0 %v2436_v57  ;;  %v2440_v12 = vmax.f32 %v3662_v40, 0.0  ;;  %v5487_v40 = vld [vmem:[#allocation22_spill] sm:$0xff] }
 0x265   : > { %v2441_v10 = vmax.f32 %v3664_v13, 0.0  ;;  %v1627_v9 = vpop.f32.mrb[12].mxu0  ;;  %3607 = vmatpush1.bf16.msra.mxu0 %v3606_v16  ;;  %v2547_v16 = vld [vmem:[#allocation7 + $0x198] sm:$0xff]  ;;  %v1115_v54 = vadd.f32 %v5487_v40, %v5222_v55 }
 0x266   : > { %v3666_v14 = vadd.f32 %v1627_v9, %v1091_v39  ;;  %v1629_v61 = vpop.f32.mrb[13].mxu0  ;;  %3608 = vmatprep.subr.bf16.mxu0 %v5477_v31  ;;  %v3621_v39 = vpack.c.bf16 %v2547_v16, %v2546_v44  ;;  %v2548_v9 = vld [vmem:[#allocation7 + $0x1a0] sm:$0xff]  ;;  %v5495_v44 = vld [vmem:[#allocation30_spill] sm:$0xff] }
 0x267   : > { %v3668_v58 = vadd.f32 %v1629_v61, %v1093_v22  ;;  %2656 = vmatprep.mubr.f32.mxu0 %v2441_v10  ;;  %v1139_v16 = vadd.f32 %v5495_v44, %v5222_v55 }
 0x268   : > { %2657 = vmatmul.mubr.f32.gmra.mrb[48].mxu0 %v2440_v12  ;;  %v2444_v23 = vmax.f32 %v3666_v14, 0.0  ;;  %v5489_v14 = vld [vmem:[#allocation24_spill] sm:$0xff] }
 0x269   : > { %v2445_v29 = vmax.f32 %v3668_v58, 0.0  ;;  %v1633_v17 = vpop.f32.mrb[14].mxu0  ;;  %3610 = vmatpush1.bf16.msra.mxu0 %v3609_v24  ;;  %v2549_v24 = vld [vmem:[#allocation7 + $0x1a8] sm:$0xff]  ;;  %v1121_v61 = vadd.f32 %v5489_v14, %v5222_v55 }
 0x26a   : > { %v3670_v15 = vadd.f32 %v1633_v17, %v1097_v52  ;;  %v1635_v33 = vpop.f32.mrb[15].mxu0  ;;  %3611 = vmatprep.subr.bf16.mxu0 %v5477_v31 }
 0x26b   : > { %v3672_v47 = vadd.f32 %v1635_v33, %v1099_v7  ;;  %2661 = vmatprep.mubr.f32.mxu0 %v2445_v29  ;;  %v3624_v7 = vpack.c.bf16 %v2549_v24, %v2548_v9  ;;  %v5497_v9 = vld [vmem:[#allocation32_spill] sm:$0xff] }
 0x26c   : > { %2662 = vmatmul.mubr.f32.gmra.mrb[50].mxu0 %v2444_v23  ;;  %v2448_v60 = vmax.f32 %v3670_v15, 0.0  ;;  %v2550_v23 = vld [vmem:[#allocation7 + $0x1b0] sm:$0xff]  ;;  %v2551_v15 = vld [vmem:[#allocation7 + $0x1b8] sm:$0xff]  ;;  %v1145_v24 = vadd.f32 %v5497_v9, %v5222_v55 }
 0x26d   : > { %v2449_v26 = vmax.f32 %v3672_v47, 0.0  ;;  %v1639_v63 = vpop.f32.mrb[16].mxu0  ;;  %3613 = vmatpush1.bf16.msra.mxu0 %v3612_v36  ;;  %v5492_v47 = vld [vmem:[#allocation27_spill] sm:$0xff] }
 0x26e   : > { %v3674_v42 = vadd.f32 %v1639_v63, %v1103_v2  ;;  %v1641_v4 = vpop.f32.mrb[17].mxu0  ;;  %3614 = vmatprep.subr.bf16.mxu0 %v5477_v31  ;;  %v1129_v30 = vadd.f32 %v5492_v47, %v5225_v19 }
 0x26f   : > { %v3676_v18 = vadd.f32 %v1641_v4, %v1105_v48  ;;  %2666 = vmatprep.mubr.f32.mxu0 %v2449_v26  ;;  %v3627_v48 = vpack.c.bf16 %v2551_v15, %v2550_v23  ;;  %v5499_v23 = vld [vmem:[#allocation34_spill] sm:$0xff] }
 0x270   : > { %2667 = vmatmul.mubr.f32.gmra.mrb[52].mxu0 %v2448_v60  ;;  %v2452_v45 = vmax.f32 %v3674_v42, 0.0  ;;  %v2552_v60 = vld [vmem:[#allocation7 + $0x1c0] sm:$0xff]  ;;  %v2553_v42 = vld [vmem:[#allocation7 + $0x1c8] sm:$0xff]  ;;  %v1151_v15 = vadd.f32 %v5499_v23, %v5222_v55 }
 0x271   : > { %v2453_v56 = vmax.f32 %v3676_v18, 0.0  ;;  %v1645_v6 = vpop.f32.mrb[18].mxu0  ;;  %3616 = vmatpush1.bf16.msra.mxu0 %v3615_v34  ;;  %v5494_v18 = vld [vmem:[#allocation29_spill] sm:$0xff] }
 0x272   : > { %v3678_v28 = vadd.f32 %v1645_v6, %v1109_v27  ;;  %v1647_v20 = vpop.f32.mrb[19].mxu0  ;;  %3617 = vmatprep.subr.bf16.mxu0 %v5477_v31  ;;  %v1135_v49 = vadd.f32 %v5494_v18, %v5225_v19 }
 0x273   : > { %v3680_v57 = vadd.f32 %v1647_v20, %v1111_v62  ;;  %2671 = vmatprep.mubr.f32.mxu0 %v2453_v56  ;;  %v3630_v62 = vpack.c.bf16 %v2553_v42, %v2552_v60 }
 0x274   : > { %2672 = vmatmul.mubr.f32.gmra.mrb[54].mxu0 %v2452_v45  ;;  %v2456_v59 = vmax.f32 %v3678_v28, 0.0  ;;  %v2554_v45 = vld [vmem:[#allocation7 + $0x1d0] sm:$0xff]  ;;  %v2555_v28 = vld [vmem:[#allocation7 + $0x1d8] sm:$0xff] }
 0x275   : > { %v2457_v13 = vmax.f32 %v3680_v57, 0.0  ;;  %v1651_v21 = vpop.f32.mrb[20].mxu0  ;;  %3619 = vmatpush1.bf16.msra.mxu0 %v3618_v38  ;;  %v5496_v57 = vld [vmem:[#allocation31_spill] sm:$0xff] }
 0x276   : > { %v3682_v22 = vadd.f32 %v1651_v21, %v1115_v54  ;;  %v1653_v10 = vpop.f32.mrb[21].mxu0  ;;  %3620 = vmatprep.subr.bf16.mxu0 %v5477_v31  ;;  %v1141_v40 = vadd.f32 %v5496_v57, %v5225_v19 }
 0x277   : > { %v3684_v12 = vadd.f32 %v1653_v10, %v1117_v11  ;;  %2676 = vmatprep.mubr.f32.mxu0 %v2457_v13  ;;  %v3633_v11 = vpack.c.bf16 %v2555_v28, %v2554_v45  ;;  %v978_v45 = vsub.s32 2, %v5211_v32 }
 0x278   : > { %2677 = vmatmul.mubr.f32.gmra.mrb[56].mxu0 %v2456_v59  ;;  %v2460_v29 = vmax.f32 %v3682_v22, 0.0  ;;  %v2556_v59 = vld [vmem:[#allocation7 + $0x1e0] sm:$0xff]  ;;  %v2557_v22 = vld [vmem:[#allocation7 + $0x1e8] sm:$0xff] }
 0x279   : > { %v2461_v58 = vmax.f32 %v3684_v12, 0.0  ;;  %v1657_v52 = vpop.f32.mrb[22].mxu0  ;;  %3622 = vmatpush1.bf16.msra.mxu0 %v3621_v39  ;;  %v5498_v12 = vld [vmem:[#allocation33_spill] sm:$0xff] }
 0x27a   : > { %v3686_v17 = vadd.f32 %v1657_v52, %v1121_v61  ;;  %v1659_v36 = vpop.f32.mrb[23].mxu0  ;;  %3623 = vmatprep.subr.bf16.mxu0 %v5477_v31  ;;  %v1147_v14 = vadd.f32 %v5498_v12, %v5225_v19 }
 0x27b   : > { %v3688_v33 = vadd.f32 %v1659_v36, %v1123_v0  ;;  %2681 = vmatprep.mubr.f32.mxu0 %v2461_v58  ;;  %v3636_v0 = vpack.c.bf16 %v2557_v22, %v2556_v59 }
 0x27c   : > { %2682 = vmatmul.mubr.f32.gmra.mrb[58].mxu0 %v2460_v29  ;;  %v2464_v26 = vmax.f32 %v3686_v17, 0.0  ;;  %v2558_v29 = vld [vmem:[#allocation7 + $0x1f0] sm:$0xff]  ;;  %v2559_v17 = vld [vmem:[#allocation7 + $0x1f8] sm:$0xff] }
 0x27d   : > { %v2465_v2 = vmax.f32 %v3688_v33, 0.0  ;;  %v1663_v53 = vpop.f32.mrb[24].mxu0  ;;  %3625 = vmatpush1.bf16.msra.mxu0 %v3624_v7  ;;  %v5500_v33 = vld [vmem:[#allocation35_spill] sm:$0xff] }
 0x27e   : > { %v3690_v63 = vadd.f32 %v1663_v53, %v1127_v8  ;;  %v1665_v34 = vpop.f32.mrb[25].mxu0  ;;  %3626 = vmatprep.subr.bf16.mxu0 %v5477_v31  ;;  %v1153_v41 = vadd.f32 %v5500_v33, %v5225_v19 }
 0x27f   : > { %v3692_v4 = vadd.f32 %v1665_v34, %v1129_v30  ;;  %2686 = vmatprep.mubr.f32.mxu0 %v2465_v2  ;;  %v3639_v30 = vpack.c.bf16 %v2559_v17, %v2558_v29  ;;  %v1159_v34 = vadd.f32 %v5169_v1, %v5225_v19 }
 0x280   : > { %2687 = vmatmul.mubr.f32.gmra.mrb[60].mxu0 %v2464_v26  ;;  %v2468_v56 = vmax.f32 %v3690_v63, 0.0  ;;  %v1157_v63 = vadd.f32 %v5167_v35, %v5222_v55 }
 0x281   : > { %v2469_v27 = vmax.f32 %v3692_v4, 0.0  ;;  %v1669_v46 = vpop.f32.mrb[26].mxu0  ;;  %3628 = vmatpush1.bf16.msra.mxu0 %v3627_v48 }
 0x282   : > { %v3694_v6 = vadd.f32 %v1669_v46, %v1133_v25  ;;  %v1671_v38 = vpop.f32.mrb[27].mxu0  ;;  %3629 = vmatprep.subr.bf16.mxu0 %v5477_v31 }
 0x283   : > { %v3696_v20 = vadd.f32 %v1671_v38, %v1135_v49  ;;  %2691 = vmatprep.mubr.f32.mxu0 %v2469_v27  ;;  %v1165_v49 = vadd.f32 %v5175_v5, %v5225_v19 }
 0x284   : > { %2692 = vmatmul.mubr.f32.gmra.mrb[62].mxu0 %v2468_v56  ;;  %v2472_v13 = vmax.f32 %v3694_v6, 0.0 }
 0x285   : > { %v2473_v54 = vmax.f32 %v3696_v20, 0.0  ;;  %v1675_v3 = vpop.f32.mrb[28].mxu0  ;;  %3631 = vmatpush1.bf16.msra.mxu0 %v3630_v62 }
 0x286   : > { %v3698_v21 = vadd.f32 %v1675_v3, %v1139_v16  ;;  %v1677_v39 = vpop.f32.mrb[29].mxu0  ;;  %3632 = vmatprep.subr.bf16.mxu0 %v5477_v31 }
 0x287   : > { %v3700_v10 = vadd.f32 %v1677_v39, %v1141_v40  ;;  %2696 = vmatprep.mubr.f32.mxu0 %v2473_v54 }
 0x288   : > { %2697 = vmatmul.mubr.f32.gmra.mrb[64].mxu0 %v2472_v13  ;;  %v2476_v58 = vmax.f32 %v3698_v21, 0.0 }
 0x289   : > { %v2477_v61 = vmax.f32 %v3700_v10, 0.0  ;;  %v1681_v50 = vpop.f32.mrb[30].mxu0  ;;  %3634 = vmatpush1.bf16.msra.mxu0 %v3633_v11 }
 0x28a   : > { %v3702_v52 = vadd.f32 %v1681_v50, %v1145_v24  ;;  %v1683_v7 = vpop.f32.mrb[31].mxu0  ;;  %3635 = vmatprep.subr.bf16.mxu0 %v5477_v31 }
 0x28b   : > { %v3704_v36 = vadd.f32 %v1683_v7, %v1147_v14  ;;  %2701 = vmatprep.mubr.f32.mxu0 %v2477_v61 }
 0x28c   : > { %2702 = vmatmul.mubr.f32.gmra.mrb[66].mxu0 %v2476_v58  ;;  %v2480_v2 = vmax.f32 %v3702_v52, 0.0 }
 0x28d   : > { %v2481_v8 = vmax.f32 %v3704_v36, 0.0  ;;  %v1687_v47 = vpop.f32.mrb[32].mxu0  ;;  %3637 = vmatpush1.bf16.msra.mxu0 %v3636_v0 }
 0x28e   : > { %v3706_v53 = vadd.f32 %v1687_v47, %v1151_v15  ;;  %v1689_v48 = vpop.f32.mrb[33].mxu0  ;;  %3638 = vmatprep.subr.bf16.mxu0 %v5477_v31  ;;  %v1163_v31 = vadd.f32 %v5173_v37, %v5222_v55  ;;  %v982_v37 = vsub.s32 3, %v5211_v32  ;;  %v5330_v55 = vrot.slane %v5216_v51, %v978_v45 }
 0x28f   : > { %v3708_v26 = vadd.f32 %v1689_v48, %v1153_v41  ;;  %2706 = vmatprep.mubr.f32.mxu0 %v2481_v8 }
 0x290   : > { %2707 = vmatmul.mubr.f32.gmra.mrb[68].mxu0 %v2480_v2  ;;  %v2484_v4 = vmax.f32 %v3706_v53, 0.0  ;;  %v5333_v5 = vrot.slane %v5216_v51, %v982_v37 }
 0x291   : > { %v2485_v60 = vmax.f32 %v3708_v26, 0.0  ;;  %v1693_v42 = vpop.f32.mrb[34].mxu0  ;;  %3640 = vmatpush1.bf16.msra.mxu0 %v3639_v30 }
 0x292   : > { %v3710_v43 = vadd.f32 %v1693_v42, %v1157_v63  ;;  %v1695_v25 = vpop.f32.mrb[35].mxu0 }
 0x293   : > { %v3712_v18 = vadd.f32 %v1695_v25, %v1159_v34  ;;  %2711 = vmatprep.mubr.f32.mxu0 %v2485_v60 }
 0x294   : > { %2712 = vmatmul.mubr.f32.gmra.mrb[70].mxu0 %v2484_v4  ;;  %v2488_v46 = vmax.f32 %v3710_v43, 0.0 }
 0x295   : > { %v2489_v35 = vmax.f32 %v3712_v18, 0.0  ;;  %v1699_v27 = vpop.f32.mrb[36].mxu0 }
 0x296   : > { %v3714_v62 = vadd.f32 %v1699_v27, %v1163_v31  ;;  %v1701_v1 = vpop.f32.mrb[37].mxu0 }
 0x297   : > { %v3716_v56 = vadd.f32 %v1701_v1, %v1165_v49  ;;  %2716 = vmatprep.mubr.f32.mxu0 %v2489_v35 }
 0x298   : > { %2717 = vmatmul.mubr.f32.gmra.mrb[72].mxu0 %v2488_v46  ;;  %v2492_v38 = vmax.f32 %v3714_v62, 0.0 }
 0x299   : > { %v2493_v6 = vmax.f32 %v3716_v56, 0.0 }
 0x29b   : > { %2721 = vmatprep.mubr.f32.mxu0 %v2493_v6 }
 0x29c   : > { %2722 = vmatmul.mubr.f32.gmra.mrb[74].mxu0 %v2492_v38 }
 0x2e3   : > { %v2307_v19 = vpop.f32.mrb[38].mxu1 }
 0x2e4   : > { %v3717_v28 = vadd.f32 %v2307_v19, %v5330_v55  ;;  %v2309_v20 = vpop.f32.mrb[39].mxu1 }
 0x2e5   : > { %v3718_v44 = vadd.f32 %v2309_v20, %v5333_v5 }
 0x2e6   : > { %v2422_v40 = vmax.f32 %v3717_v28, 0.0 }
 0x2e7   : > { %v2423_v16 = vmax.f32 %v3718_v44, 0.0  ;;  %v2313_v57 = vpop.f32.mrb[40].mxu1 }
 0x2e8   : > { %v3719_v54 = vadd.f32 %v2313_v57, %v5330_v55  ;;  %v2315_v3 = vpop.f32.mrb[41].mxu1 }
 0x2e9   : > { %v3720_v32 = vadd.f32 %v2315_v3, %v5333_v5  ;;  %2791 = vmatprep.mubr.f32.mxu0 %v2423_v16 }
 0x2ea   : > { %2792 = vmatmul.mubr.f32.vlgmr.msra.gmra.mrb[38].mxu0 %v2422_v40  ;;  %v2426_v51 = vmax.f32 %v3719_v54, 0.0 }
 0x2eb   : > { %v2427_v11 = vmax.f32 %v3720_v32, 0.0  ;;  %v2319_v13 = vpop.f32.mrb[42].mxu1 }
 0x2ec   : > { %v3721_v21 = vadd.f32 %v2319_v13, %v5330_v55  ;;  %v2321_v39 = vpop.f32.mrb[43].mxu1 }
 0x2ed   : > { %v3722_v59 = vadd.f32 %v2321_v39, %v5333_v5  ;;  %2796 = vmatprep.mubr.f32.mxu0 %v2427_v11 }
 0x2ee   : > { %2797 = vmatmul.mubr.f32.gmra.mrb[40].mxu0 %v2426_v51  ;;  %v2430_v9 = vmax.f32 %v3721_v21, 0.0 }
 0x2ef   : > { %v2431_v22 = vmax.f32 %v3722_v59, 0.0  ;;  %v2325_v10 = vpop.f32.mrb[44].mxu1 }
 0x2f0   : > { %v3723_v24 = vadd.f32 %v2325_v10, %v5330_v55  ;;  %v2327_v12 = vpop.f32.mrb[45].mxu1 }
 0x2f1   : > { %v3724_v14 = vadd.f32 %v2327_v12, %v5333_v5  ;;  %2801 = vmatprep.mubr.f32.mxu0 %v2431_v22 }
 0x2f2   : > { %2802 = vmatmul.mubr.f32.gmra.mrb[42].mxu0 %v2430_v9  ;;  %v2434_v0 = vmax.f32 %v3723_v24, 0.0 }
 0x2f3   : > { %v2435_v61 = vmax.f32 %v3724_v14, 0.0  ;;  %v2331_v50 = vpop.f32.mrb[46].mxu1 }
 0x2f4   : > { %v3725_v58 = vadd.f32 %v2331_v50, %v5330_v55  ;;  %v2333_v52 = vpop.f32.mrb[47].mxu1 }
 0x2f5   : > { %v3726_v7 = vadd.f32 %v2333_v52, %v5333_v5  ;;  %2806 = vmatprep.mubr.f32.mxu0 %v2435_v61 }
 0x2f6   : > { %2807 = vmatmul.mubr.f32.gmra.mrb[44].mxu0 %v2434_v0  ;;  %v2438_v36 = vmax.f32 %v3725_v58, 0.0 }
 0x2f7   : > { %v2439_v29 = vmax.f32 %v3726_v7, 0.0  ;;  %v2337_v17 = vpop.f32.mrb[48].mxu1 }
 0x2f8   : > { %v3727_v23 = vadd.f32 %v2337_v17, %v5330_v55  ;;  %v2339_v15 = vpop.f32.mrb[49].mxu1 }
 0x2f9   : > { %v3728_v33 = vadd.f32 %v2339_v15, %v5333_v5  ;;  %2811 = vmatprep.mubr.f32.mxu0 %v2439_v29 }
 0x2fa   : > { %2812 = vmatmul.mubr.f32.gmra.mrb[46].mxu0 %v2438_v36  ;;  %v2442_v47 = vmax.f32 %v3727_v23, 0.0 }
 0x2fb   : > { %v2443_v41 = vmax.f32 %v3728_v33, 0.0  ;;  %v2343_v8 = vpop.f32.mrb[50].mxu1 }
 0x2fc   : > { %v3729_v30 = vadd.f32 %v2343_v8, %v5330_v55  ;;  %v2345_v2 = vpop.f32.mrb[51].mxu1 }
 0x2fd   : > { %v3730_v53 = vadd.f32 %v2345_v2, %v5333_v5  ;;  %2816 = vmatprep.mubr.f32.mxu0 %v2443_v41 }
 0x2fe   : > { %2817 = vmatmul.mubr.f32.gmra.mrb[48].mxu0 %v2442_v47  ;;  %v2446_v63 = vmax.f32 %v3729_v30, 0.0 }
 0x2ff   : > { %v2447_v48 = vmax.f32 %v3730_v53, 0.0  ;;  %v2349_v26 = vpop.f32.mrb[52].mxu1 }
 0x300   : > { %v3731_v34 = vadd.f32 %v2349_v26, %v5330_v55  ;;  %v2351_v60 = vpop.f32.mrb[53].mxu1 }
 0x301   : > { %v3732_v42 = vadd.f32 %v2351_v60, %v5333_v5  ;;  %2821 = vmatprep.mubr.f32.mxu0 %v2447_v48 }
 0x302   : > { %2822 = vmatmul.mubr.f32.gmra.mrb[50].mxu0 %v2446_v63  ;;  %v2450_v25 = vmax.f32 %v3731_v34, 0.0 }
 0x303   : > { %v2451_v4 = vmax.f32 %v3732_v42, 0.0  ;;  %v2355_v43 = vpop.f32.mrb[54].mxu1 }
 0x304   : > { %v3733_v18 = vadd.f32 %v2355_v43, %v5330_v55  ;;  %v2357_v31 = vpop.f32.mrb[55].mxu1 }
 0x305   : > { %v3734_v49 = vadd.f32 %v2357_v31, %v5333_v5  ;;  %2826 = vmatprep.mubr.f32.mxu0 %v2451_v4 }
 0x306   : > { %2827 = vmatmul.mubr.f32.gmra.mrb[52].mxu0 %v2450_v25  ;;  %v2454_v46 = vmax.f32 %v3733_v18, 0.0 }
 0x307   : > { %v2455_v35 = vmax.f32 %v3734_v49, 0.0  ;;  %v2361_v27 = vpop.f32.mrb[56].mxu1 }
 0x308   : > { %v3735_v62 = vadd.f32 %v2361_v27, %v5330_v55  ;;  %v2363_v1 = vpop.f32.mrb[57].mxu1 }
 0x309   : > { %v3736_v56 = vadd.f32 %v2363_v1, %v5333_v5  ;;  %2831 = vmatprep.mubr.f32.mxu0 %v2455_v35  ;;  %v5375_v35 = vld [vmem:[#allocation9] ss:$0 sm:$0xff] }
 0x30a   : > { %2832 = vmatmul.mubr.f32.gmra.mrb[54].mxu0 %v2454_v46  ;;  %v2458_v45 = vmax.f32 %v3735_v62, 0.0 }
 0x30b   : > { %v2459_v6 = vmax.f32 %v3736_v56, 0.0  ;;  %v2367_v38 = vpop.f32.mrb[58].mxu1 }
 0x30c   : > { %v3737_v37 = vadd.f32 %v2367_v38, %v5330_v55  ;;  %v2369_v19 = vpop.f32.mrb[59].mxu1 }
 0x30d   : > { %v3738_v28 = vadd.f32 %v2369_v19, %v5333_v5  ;;  %2836 = vmatprep.mubr.f32.mxu0 %v2459_v6 }
 0x30e   : > { %2837 = vmatmul.mubr.f32.gmra.mrb[56].mxu0 %v2458_v45  ;;  %v2462_v16 = vmax.f32 %v3737_v37, 0.0 }
 0x30f   : > { %v2463_v20 = vmax.f32 %v3738_v28, 0.0  ;;  %v2373_v44 = vpop.f32.mrb[60].mxu1 }
 0x310   : > { %v3739_v57 = vadd.f32 %v2373_v44, %v5330_v55  ;;  %v2375_v40 = vpop.f32.mrb[61].mxu1 }
 0x311   : > { %v3740_v54 = vadd.f32 %v2375_v40, %v5333_v5  ;;  %2841 = vmatprep.mubr.f32.mxu0 %v2463_v20 }
 0x312   : > { %2842 = vmatmul.mubr.f32.gmra.mrb[58].mxu0 %v2462_v16  ;;  %v2466_v11 = vmax.f32 %v3739_v57, 0.0 }
 0x313   : > { %v2467_v3 = vmax.f32 %v3740_v54, 0.0  ;;  %v2379_v32 = vpop.f32.mrb[62].mxu1 }
 0x314   : > { %v3741_v13 = vadd.f32 %v2379_v32, %v5330_v55  ;;  %v2381_v51 = vpop.f32.mrb[63].mxu1 }
 0x315   : > { %v3742_v21 = vadd.f32 %v2381_v51, %v5333_v5  ;;  %2846 = vmatprep.mubr.f32.mxu0 %v2467_v3 }
 0x316   : > { %2847 = vmatmul.mubr.f32.gmra.mrb[60].mxu0 %v2466_v11  ;;  %v2470_v22 = vmax.f32 %v3741_v13, 0.0 }
 0x317   : > { %v2471_v39 = vmax.f32 %v3742_v21, 0.0  ;;  %v2385_v59 = vpop.f32.mrb[64].mxu1 }
 0x318   : > { %v3743_v10 = vadd.f32 %v2385_v59, %v5330_v55  ;;  %v2387_v9 = vpop.f32.mrb[65].mxu1 }
 0x319   : > { %v3744_v24 = vadd.f32 %v2387_v9, %v5333_v5  ;;  %2851 = vmatprep.mubr.f32.mxu0 %v2471_v39 }
 0x31a   : > { %2852 = vmatmul.mubr.f32.gmra.mrb[62].mxu0 %v2470_v22  ;;  %v2474_v61 = vmax.f32 %v3743_v10, 0.0 }
 0x31b   : > { %v2475_v12 = vmax.f32 %v3744_v24, 0.0  ;;  %v2391_v14 = vpop.f32.mrb[66].mxu1 }
 0x31c   : > { %v3745_v50 = vadd.f32 %v2391_v14, %v5330_v55  ;;  %v2393_v0 = vpop.f32.mrb[67].mxu1 }
 0x31d   : > { %v3746_v58 = vadd.f32 %v2393_v0, %v5333_v5  ;;  %2856 = vmatprep.mubr.f32.mxu0 %v2475_v12 }
 0x31e   : > { %2857 = vmatmul.mubr.f32.gmra.mrb[64].mxu0 %v2474_v61  ;;  %v2478_v29 = vmax.f32 %v3745_v50, 0.0 }
 0x31f   : > { %v2479_v52 = vmax.f32 %v3746_v58, 0.0  ;;  %v2397_v7 = vpop.f32.mrb[68].mxu1 }
 0x320   : > { %v3747_v17 = vadd.f32 %v2397_v7, %v5330_v55  ;;  %v2399_v36 = vpop.f32.mrb[69].mxu1 }
 0x321   : > { %v3748_v23 = vadd.f32 %v2399_v36, %v5333_v5  ;;  %2861 = vmatprep.mubr.f32.mxu0 %v2479_v52 }
 0x322   : > { %2862 = vmatmul.mubr.f32.gmra.mrb[66].mxu0 %v2478_v29  ;;  %v2482_v41 = vmax.f32 %v3747_v17, 0.0 }
 0x323   : > { %v2483_v15 = vmax.f32 %v3748_v23, 0.0  ;;  %v2403_v33 = vpop.f32.mrb[70].mxu1 }
 0x324   : > { %v3749_v8 = vadd.f32 %v2403_v33, %v5330_v55  ;;  %v2405_v47 = vpop.f32.mrb[71].mxu1 }
 0x325   : > { %v3750_v30 = vadd.f32 %v2405_v47, %v5333_v5  ;;  %2866 = vmatprep.mubr.f32.mxu0 %v2483_v15 }
 0x326   : > { %2867 = vmatmul.mubr.f32.gmra.mrb[68].mxu0 %v2482_v41  ;;  %v2486_v48 = vmax.f32 %v3749_v8, 0.0 }
 0x327   : > { %v2487_v2 = vmax.f32 %v3750_v30, 0.0  ;;  %v2409_v53 = vpop.f32.mrb[72].mxu1 }
 0x328   : > { %v3751_v26 = vadd.f32 %v2409_v53, %v5330_v55  ;;  %v2411_v63 = vpop.f32.mrb[73].mxu1 }
 0x329   : > { %v3752_v34 = vadd.f32 %v2411_v63, %v5333_v5  ;;  %2871 = vmatprep.mubr.f32.mxu0 %v2487_v2 }
 0x32a   : > { %2872 = vmatmul.mubr.f32.gmra.mrb[70].mxu0 %v2486_v48  ;;  %v2490_v4 = vmax.f32 %v3751_v26, 0.0 }
 0x32b   : > { %v2491_v60 = vmax.f32 %v3752_v34, 0.0  ;;  %v2415_v42 = vpop.f32.mrb[74].mxu1 }
 0x32c   : > { %v3753_v43 = vadd.f32 %v2415_v42, %v5330_v55  ;;  %v2417_v25 = vpop.f32.mrb[75].mxu1 }
 0x32d   : > { %v3754_v18 = vadd.f32 %v2417_v25, %v5333_v5  ;;  %2876 = vmatprep.mubr.f32.mxu0 %v2491_v60 }
 0x32e   : > { %2877 = vmatmul.mubr.f32.gmra.mrb[72].mxu0 %v2490_v4  ;;  %v2494_v49 = vmax.f32 %v3753_v43, 0.0 }
 0x32f   : > { %v2495_v31 = vmax.f32 %v3754_v18, 0.0 }
 0x331   : > { %2881 = vmatprep.mubr.f32.mxu0 %v2495_v31 }
 0x332   : > { %2882 = vmatmul.mubr.f32.gmra.mrb[74].mxu0 %v2494_v49 }
 0x3bd   : > { %v2793_v55 = vpop.f32.mrb[38].mxu0 }
 0x3be   : > { %v3755_v5 = vadd.f32 %v5375_v35, %v2793_v55  ;;  %v2795_v27 = vpop.f32.mrb[39].mxu0 }
 0x3c0   : > { %2887 = vst [vmem:[%s5380_s26] sm:$0xff] %v3755_v5 }
 0x3c1   : > { %v2798_v46 = vpop.f32.mrb[40].mxu0 }
 0x3c2   : > { %v3756_v62 = vadd.f32 %v5375_v35, %v2798_v46  ;;  %v2800_v1 = vpop.f32.mrb[41].mxu0 }
 0x3c4   : > { %2888 = vst [vmem:[%s5380_s26 + $0x8] sm:$0xff] %v3756_v62 }
 0x3c5   : > { %v2803_v56 = vpop.f32.mrb[42].mxu0 }
 0x3c6   : > { %v3757_v6 = vadd.f32 %v5375_v35, %v2803_v56  ;;  %v2805_v38 = vpop.f32.mrb[43].mxu0 }
 0x3c8   : > { %2889 = vst [vmem:[%s5380_s26 + $0x10] sm:$0xff] %v3757_v6 }
 0x3c9   : > { %v2808_v45 = vpop.f32.mrb[44].mxu0 }
 0x3ca   : > { %v3758_v37 = vadd.f32 %v5375_v35, %v2808_v45  ;;  %v2810_v19 = vpop.f32.mrb[45].mxu0 }
 0x3cc   : > { %2890 = vst [vmem:[%s5380_s26 + $0x18] sm:$0xff] %v3758_v37 }
 0x3cd   : > { %v2813_v28 = vpop.f32.mrb[46].mxu0 }
 0x3ce   : > { %v3759_v20 = vadd.f32 %v5375_v35, %v2813_v28  ;;  %v2815_v44 = vpop.f32.mrb[47].mxu0 }
 0x3d0   : > { %2891 = vst [vmem:[%s5380_s26 + $0x20] sm:$0xff] %v3759_v20 }
 0x3d1   : > { %v2818_v16 = vpop.f32.mrb[48].mxu0 }
 0x3d2   : > { %v3760_v57 = vadd.f32 %v5375_v35, %v2818_v16  ;;  %v2820_v40 = vpop.f32.mrb[49].mxu0 }
 0x3d4   : > { %2892 = vst [vmem:[%s5380_s26 + $0x28] sm:$0xff] %v3760_v57 }
 0x3d5   : > { %v2823_v54 = vpop.f32.mrb[50].mxu0 }
 0x3d6   : > { %v3761_v3 = vadd.f32 %v5375_v35, %v2823_v54  ;;  %v2825_v32 = vpop.f32.mrb[51].mxu0 }
 0x3d8   : > { %2893 = vst [vmem:[%s5380_s26 + $0x30] sm:$0xff] %v3761_v3 }
 0x3d9   : > { %v2828_v11 = vpop.f32.mrb[52].mxu0 }
 0x3da   : > { %v3762_v13 = vadd.f32 %v5375_v35, %v2828_v11  ;;  %v2830_v51 = vpop.f32.mrb[53].mxu0 }
 0x3dc   : > { %2894 = vst [vmem:[%s5380_s26 + $0x38] sm:$0xff] %v3762_v13 }
 0x3dd   : > { %v2833_v21 = vpop.f32.mrb[54].mxu0 }
 0x3de   : > { %v3763_v39 = vadd.f32 %v5375_v35, %v2833_v21  ;;  %v2835_v59 = vpop.f32.mrb[55].mxu0 }
 0x3e0   : > { %2895 = vst [vmem:[%s5380_s26 + $0x40] sm:$0xff] %v3763_v39 }
 0x3e1   : > { %v2838_v22 = vpop.f32.mrb[56].mxu0 }
 0x3e2   : > { %v3764_v10 = vadd.f32 %v5375_v35, %v2838_v22  ;;  %v2840_v9 = vpop.f32.mrb[57].mxu0 }
 0x3e4   : > { %2896 = vst [vmem:[%s5380_s26 + $0x48] sm:$0xff] %v3764_v10 }
 0x3e5   : > { %v2843_v24 = vpop.f32.mrb[58].mxu0 }
 0x3e6   : > { %v3765_v12 = vadd.f32 %v5375_v35, %v2843_v24  ;;  %v2845_v14 = vpop.f32.mrb[59].mxu0 }
 0x3e8   : > { %2897 = vst [vmem:[%s5380_s26 + $0x50] sm:$0xff] %v3765_v12 }
 0x3e9   : > { %v2848_v61 = vpop.f32.mrb[60].mxu0 }
 0x3ea   : > { %v3766_v50 = vadd.f32 %v5375_v35, %v2848_v61  ;;  %v2850_v0 = vpop.f32.mrb[61].mxu0 }
 0x3ec   : > { %2898 = vst [vmem:[%s5380_s26 + $0x58] sm:$0xff] %v3766_v50 }
 0x3ed   : > { %v2853_v58 = vpop.f32.mrb[62].mxu0 }
 0x3ee   : > { %v3767_v52 = vadd.f32 %v5375_v35, %v2853_v58  ;;  %v2855_v7 = vpop.f32.mrb[63].mxu0 }
 0x3f0   : > { %2899 = vst [vmem:[%s5380_s26 + $0x60] sm:$0xff] %v3767_v52 }
 0x3f1   : > { %v2858_v29 = vpop.f32.mrb[64].mxu0 }
 0x3f2   : > { %v3768_v17 = vadd.f32 %v5375_v35, %v2858_v29  ;;  %v2860_v36 = vpop.f32.mrb[65].mxu0 }
 0x3f4   : > { %2900 = vst [vmem:[%s5380_s26 + $0x68] sm:$0xff] %v3768_v17 }
 0x3f5   : > { %v2863_v23 = vpop.f32.mrb[66].mxu0 }
 0x3f6   : > { %v3769_v15 = vadd.f32 %v5375_v35, %v2863_v23  ;;  %v2865_v33 = vpop.f32.mrb[67].mxu0 }
 0x3f8   : > { %2901 = vst [vmem:[%s5380_s26 + $0x70] sm:$0xff] %v3769_v15 }
 0x3f9   : > { %v2868_v41 = vpop.f32.mrb[68].mxu0 }
 0x3fa   : > { %v3770_v8 = vadd.f32 %v5375_v35, %v2868_v41  ;;  %v2870_v47 = vpop.f32.mrb[69].mxu0 }
 0x3fc   : > { %2902 = vst [vmem:[%s5380_s26 + $0x78] sm:$0xff] %v3770_v8 }
 0x3fd   : > { %v2873_v30 = vpop.f32.mrb[70].mxu0 }
 0x3fe   : > { %v3771_v2 = vadd.f32 %v5375_v35, %v2873_v30  ;;  %v2875_v53 = vpop.f32.mrb[71].mxu0 }
 0x400   : > { %2903 = vst [vmem:[%s5380_s26 + $0x80] sm:$0xff] %v3771_v2 }
 0x401   : > { %v2878_v48 = vpop.f32.mrb[72].mxu0 }
 0x402   : > { %v3772_v26 = vadd.f32 %v5375_v35, %v2878_v48  ;;  %v2880_v63 = vpop.f32.mrb[73].mxu0 }
 0x404   : > { %2904 = vst [vmem:[%s5380_s26 + $0x88] sm:$0xff] %v3772_v26 }
 0x405   : > { %v2883_v34 = vpop.f32.mrb[74].mxu0 }
 0x406   : > { %v3773_v60 = vadd.f32 %v5375_v35, %v2883_v34  ;;  %v2885_v42 = vpop.f32.mrb[75].mxu0 }
 0x408   : > { %2905 = vst [vmem:[%s5380_s26 + $0x90] sm:$0xff] %v3773_v60 }
 0x409 PF: > { %p17_p6 = scmp.ge.s32.totalorder %s4538_s11, 4   ;;  %s5501_s18 = smov %s4346_s19 }
 0x40a   : > { %s5502_s19 = smov %s4350_s20  ;;  %s5503_s20 = smov %s4547_s27 }
 0x40b   : > { %s5504_s21 = smov %s4538_s11  ;;  %19 = sbr.rel (!%p17_p6) target bundleno = 5 (0x5), region = 96 }
 0x412   :  { %2928 = vsyncpa [#allocation3], 1 }
 0x413   :  { %2930 = vsyncpa [#allocation3 + $0x1], 1 }
 0x414   :  { %2931 = vsyncpa [#allocation5], 1 }
 0x415   :  { %2932 = vsyncpa [#allocation8], 1 }

</bundles_post_ra>
